<compile_context>
chip_gen: v7x
topology: tpu7x:2x2x1
jax: 0.10.0
libtpu: 0.0.40
codegen_flags: <defaults>
</compile_context>

<pallas_src>
import math

import numpy as np
import jax
import jax.numpy as jnp
from jax.experimental import pallas as pl
from jax.experimental.pallas import tpu as pltpu

# ----------------------------- configuration --------------------------------
BATCH = 2
INPUT_SIZE = 8            # C : Conv1d length axis
WINDOW_SIZE = 4           # W : Conv1d channel axis == LSTM sequence length
KERNEL_SIZE = 5
DILATION_BASE = 2
LSTM_HIDDEN = 320
LSTM_LAYERS = 1

NUM_LAYERS = int(
    math.log((WINDOW_SIZE - 1) * (DILATION_BASE - 1) / (KERNEL_SIZE - 1) + 1)
    / math.log(DILATION_BASE)) + 1                      # == 1 for these params
SPATIAL_DILATION = DILATION_BASE ** (NUM_LAYERS - 1)    # leftover loop variable
SPATIAL_PADDING = SPATIAL_DILATION * (KERNEL_SIZE - 1)

_SUM_D = sum(DILATION_BASE ** i for i in range(NUM_LAYERS))
SCD_RF = (INPUT_SIZE + (KERNEL_SIZE - 1) * _SUM_D) // 2          # 6
C1D_RF = (INPUT_SIZE - 3 + 1) // 2                               # 3
F1D_RF = (INPUT_SIZE + (INPUT_SIZE - 1)) // 2                    # 7
RECEPTIVE_FIELD = SCD_RF + C1D_RF + F1D_RF                       # 16 -> Linear(16,2)

POOL_HALF = 128                                   # lane-aligned maxpool halves
HIDDEN_PAD = ((LSTM_HIDDEN + 127) // 128) * 128   # 320 -> 384 (gate slices aligned)
GATE_W = 4 * HIDDEN_PAD                           # fused [i|f|g|o] width = 1536


# ----------------------------- fused Pallas kernel ---------------------------
def _movement1_kernel(x_ref, wc_ref, bc_ref, wl1_ref, bl1_ref,
                      wih_ref, bih_ref, whh_ref, wl2_ref, bl2_ref, o_ref):
    """Whole Movement_1 forward. All operands resident in VMEM.

    x_ref   (B, W*C)                 f32  flattened input
    wc_ref  (W*C, 2*POOL_HALF)       f32  3 Conv1d branches folded into one matmul,
                                          cols = [even pool taps | odd pool taps]
    bc_ref  (1, 2*POOL_HALF)         f32
    wl1_ref (POOL_HALF, W*2)         f32  block-diagonal linear_1 (per-channel 16->2)
    bl1_ref (1, W*2)                 f32
    wih_ref (W*2, W*GATE_W)          bf16 LSTM input projection, all timesteps
    bih_ref (1, W*GATE_W)            f32  b_ih + b_hh, broadcast per timestep
    whh_ref (HIDDEN_PAD, GATE_W)     bf16 fused [i|f|g|o] recurrent weights (0-padded)
    wl2_ref (1, HIDDEN_PAD)          f32  linear_2 row (0-padded)
    bl2_ref (1, 1)                   f32
    o_ref   (B, 1)                   f32
    """
    def sigmoid(z):                        # exact sigmoid via EUP tanh (no divide)
        return 0.5 * (jnp.tanh(0.5 * z) + 1.0)

    bsz = x_ref.shape[0]
    hp = whh_ref.shape[0]                  # HIDDEN_PAD
    gw = whh_ref.shape[1]                  # 4 * HIDDEN_PAD

    # --- all three conv branches as one matmul; MaxPool1d(2) via aligned halves
    y = jnp.dot(x_ref[...], wc_ref[...], preferred_element_type=jnp.float32)
    y = y + bc_ref[...]
    pooled = jnp.maximum(y[:, :POOL_HALF], y[:, POOL_HALF:])        # (B, 128)

    # --- linear_1 (block diagonal) + ReLU -> flattened LSTM sequence (B, W*2)
    seq = jnp.dot(pooled, wl1_ref[...], preferred_element_type=jnp.float32)
    seq = jnp.maximum(seq + bl1_ref[...], 0.0)

    # --- LSTM input projection for every timestep, hoisted out of recurrence
    xproj = jnp.dot(seq.astype(wih_ref.dtype), wih_ref[...],
                    preferred_element_type=jnp.float32) + bih_ref[...]  # (B, W*gw)

    # --- recurrence: one fused (B,hp)@(hp,4hp) matmul per step (T unrolled)
    h = jnp.zeros((bsz, hp), jnp.float32)
    c = jnp.zeros((bsz, hp), jnp.float32)
    for t in range(WINDOW_SIZE):
        gates = xproj[:, t * gw:(t + 1) * gw] + jnp.dot(
            h.astype(whh_ref.dtype), whh_ref[...],
            preferred_element_type=jnp.float32)
        i_g = sigmoid(gates[:, 0 * hp:1 * hp])
        f_g = sigmoid(gates[:, 1 * hp:2 * hp])
        g_g = jnp.tanh(gates[:, 2 * hp:3 * hp])
        o_g = sigmoid(gates[:, 3 * hp:4 * hp])
        c = f_g * c + i_g * g_g
        h = o_g * jnp.tanh(c)

    # --- h_n -> Linear(320,1) as VPU mul + lane reduce; Dropout(eval)=id; Sigmoid
    logits = jnp.sum(h * wl2_ref[...], axis=-1, keepdims=True) + bl2_ref[...]
    o_ref[...] = sigmoid(logits)


# ----------------------------- parameter init (PyTorch-shaped) ---------------
def init_params(key):
    keys = jax.random.split(key, 12)

    def unif(k, shape, fan_in):
        bound = 1.0 / math.sqrt(fan_in)
        return jax.random.uniform(k, shape, jnp.float32, -bound, bound)

    p = {}
    # spatial dilated conv layers (sub_small_num_layer == num_layers == 1)
    p["spatial_w"] = [unif(keys[0], (WINDOW_SIZE, WINDOW_SIZE, KERNEL_SIZE),
                           WINDOW_SIZE * KERNEL_SIZE)]
    p["spatial_b"] = [unif(keys[1], (WINDOW_SIZE,), WINDOW_SIZE * KERNEL_SIZE)]
    # causal_1d layer: Conv1d(W, W, 3, padding=0)
    p["c1d_w"] = unif(keys[2], (WINDOW_SIZE, WINDOW_SIZE, 3), WINDOW_SIZE * 3)
    p["c1d_b"] = unif(keys[3], (WINDOW_SIZE,), WINDOW_SIZE * 3)
    # causal_full layer: Conv1d(W, W, input_size, padding=input_size-1)
    p["full_w"] = unif(keys[4], (WINDOW_SIZE, WINDOW_SIZE, INPUT_SIZE),
                       WINDOW_SIZE * INPUT_SIZE)
    p["full_b"] = unif(keys[5], (WINDOW_SIZE,), WINDOW_SIZE * INPUT_SIZE)
    # linear_1 (RF -> 2), stored transposed for x @ W
    p["l1_w"] = unif(keys[6], (RECEPTIVE_FIELD, 2), RECEPTIVE_FIELD)
    p["l1_b"] = unif(keys[7], (1, 2), RECEPTIVE_FIELD)
    # LSTM (1 layer, input 2, hidden 320): xavier-ish weights, zero biases
    p["wih"] = unif(keys[8], (4, 2, LSTM_HIDDEN), 2 + LSTM_HIDDEN)
    p["whh"] = unif(keys[9], (4, LSTM_HIDDEN, LSTM_HIDDEN), 2 * LSTM_HIDDEN)
    p["lstm_b"] = jnp.zeros((4, 1, LSTM_HIDDEN), jnp.float32)  # init_weights: bias=0
    # linear_2 (320 -> 1), stored transposed
    p["l2_w"] = unif(keys[10], (LSTM_HIDDEN * LSTM_LAYERS, 1),
                     LSTM_HIDDEN * LSTM_LAYERS)
    p["l2_b"] = unif(keys[11], (1, 1), LSTM_HIDDEN * LSTM_LAYERS)
    return p


# --------------- fold module weights into lane-aligned kernel operands -------
def pack_params(p):
    W, C, RF = WINDOW_SIZE, INPUT_SIZE, RECEPTIVE_FIELD
    HP, GW = HIDDEN_PAD, GATE_W

    # --- three Conv1d branches (+bias) folded into one (W*C, 2*128) matmul ----
    # column layout: col = half*POOL_HALF + out_channel*RF + concat_feature,
    # half 0/1 = the two elements of each MaxPool1d(2) pair.
    wconv = np.zeros((W * C, 2 * POOL_HALF), np.float32)
    bconv = np.zeros((1, 2 * POOL_HALF), np.float32)

    def add_conv(w, b, kernel, dilation, padding, feat_off):
        w = np.asarray(w, np.float32)
        b = np.asarray(b, np.float32)
        l_out = C + 2 * padding - dilation * (kernel - 1)
        for o in range(W):
            for r in range(l_out // 2):             # floor-mode pool drops tail
                for half in (0, 1):
                    l = 2 * r + half
                    col = half * POOL_HALF + o * RF + feat_off + r
                    bconv[0, col] = b[o]
                    for ci in range(W):
                        for t in range(kernel):
                            src = l - padding + t * dilation
                            if 0 <= src < C:
                                wconv[ci * C + src, col] += w[o, ci, t]

    add_conv(p["spatial_w"][0], p["spatial_b"][0],
             KERNEL_SIZE, SPATIAL_DILATION, SPATIAL_PADDING, 0)
    add_conv(p["c1d_w"], p["c1d_b"], 3, 1, 0, SCD_RF)
    add_conv(p["full_w"], p["full_b"], C, 1, C - 1, SCD_RF + C1D_RF)

    # --- linear_1 as block-diagonal (POOL_HALF, W*2): per-channel 16 -> 2 ------
    wl1 = np.asarray(p["l1_w"], np.float32)         # (RF, 2)
    bl1 = np.asarray(p["l1_b"], np.float32)         # (1, 2)
    wl1_big = np.zeros((POOL_HALF, W * 2), np.float32)
    bl1_big = np.zeros((1, W * 2), np.float32)
    for t in range(W):
        wl1_big[t * RF:(t + 1) * RF, t * 2:(t + 1) * 2] = wl1
        bl1_big[0, t * 2:(t + 1) * 2] = bl1[0]

    # --- LSTM input projection for all timesteps (block diag, H padded to 384) -
    wih = np.asarray(p["wih"], np.float32)          # (4, 2, H)
    bih = np.asarray(p["lstm_b"], np.float32)       # (4, 1, H)
    wih_big = np.zeros((W * 2, W * GW), np.float32)
    bih_big = np.zeros((1, W * GW), np.float32)
    for t in range(W):
        for g in range(4):
            lo = t * GW + g * HP
            wih_big[t * 2:(t + 1) * 2, lo:lo + LSTM_HIDDEN] = wih[g]
            bih_big[0, lo:lo + LSTM_HIDDEN] = bih[g, 0]

    # --- fused recurrent weights, zero-padded to (HP, 4*HP) --------------------
    whh = np.asarray(p["whh"], np.float32)          # (4, H, H)
    whh_big = np.zeros((HP, GW), np.float32)
    for g in range(4):
        whh_big[:LSTM_HIDDEN, g * HP:g * HP + LSTM_HIDDEN] = whh[g]

    # --- linear_2 row, zero-padded ---------------------------------------------
    wl2 = np.asarray(p["l2_w"], np.float32).reshape(-1)
    wl2_big = np.zeros((1, HP), np.float32)
    wl2_big[0, :LSTM_HIDDEN] = wl2
    bl2 = np.asarray(p["l2_b"], np.float32).reshape(1, 1)

    return dict(
        wconv=jnp.asarray(wconv), bconv=jnp.asarray(bconv),
        wl1=jnp.asarray(wl1_big), bl1=jnp.asarray(bl1_big),
        wih=jnp.asarray(wih_big).astype(jnp.bfloat16),   # bf16 weights, f32 accum
        bih=jnp.asarray(bih_big),
        whh=jnp.asarray(whh_big).astype(jnp.bfloat16),
        wl2=jnp.asarray(wl2_big), bl2=jnp.asarray(bl2),
    )


# ----------------------------- forward (single pallas_call) ------------------
@jax.jit
def movement1_forward(x, kp):
    bsz = x.shape[0]
    xflat = x.reshape(bsz, WINDOW_SIZE * INPUT_SIZE)
    return pl.pallas_call(
        _movement1_kernel,
        out_shape=jax.ShapeDtypeStruct((bsz, 1), jnp.float32),
        in_specs=[pl.BlockSpec(memory_space=pltpu.MemorySpace.VMEM)] * 10,
        out_specs=pl.BlockSpec(memory_space=pltpu.MemorySpace.VMEM),
    )(xflat, kp["wconv"], kp["bconv"], kp["wl1"], kp["bl1"],
      kp["wih"], kp["bih"], kp["whh"], kp["wl2"], kp["bl2"])


# ----------------------------- main -------------------------------------------
if __name__ == "__main__":
    key = jax.random.PRNGKey(0)
    pkey, xkey = jax.random.split(key)
    params = init_params(pkey)
    kparams = pack_params(params)          # one-time weight folding (exact)
    x = jax.random.normal(xkey, (BATCH, WINDOW_SIZE, INPUT_SIZE), jnp.float32)

    out = movement1_forward(x, kparams)
    out = jax.block_until_ready(out)

    assert out.shape == (BATCH, 1), out.shape
    assert bool(jnp.all(jnp.isfinite(out)))
    assert bool(jnp.all((out >= 0.0) & (out <= 1.0)))   # sigmoid output range
    print("KERNEL_OK")
</pallas_src>

<mosaic_0001>
module attributes {stable_mosaic.version = 11 : i64} {
  func.func @_movement1_kernel(%arg0: memref<2x32xf32, #tpu.memory_space<vmem>>, %arg1: memref<32x256xf32, #tpu.memory_space<vmem>>, %arg2: memref<1x256xf32, #tpu.memory_space<vmem>>, %arg3: memref<128x8xf32, #tpu.memory_space<vmem>>, %arg4: memref<1x8xf32, #tpu.memory_space<vmem>>, %arg5: memref<8x6144xbf16, #tpu.memory_space<vmem>>, %arg6: memref<1x6144xf32, #tpu.memory_space<vmem>>, %arg7: memref<384x1536xbf16, #tpu.memory_space<vmem>>, %arg8: memref<1x384xf32, #tpu.memory_space<vmem>>, %arg9: memref<1x1xf32, #tpu.memory_space<vmem>>, %arg10: memref<2x1xf32, #tpu.memory_space<vmem>>) attributes {dimension_semantics = [], scalar_prefetch = 0 : i64, scratch_operands = 0 : i64, tpu.core_type = #tpu.core_type<tc>} {
    %c0 = arith.constant 0 : index
    %c0_0 = arith.constant 0 : index
    %0 = vector.load %arg0[%c0, %c0_0] : memref<2x32xf32, #tpu.memory_space<vmem>>, vector<2x32xf32>
    %c0_1 = arith.constant 0 : index
    %c0_2 = arith.constant 0 : index
    %1 = vector.load %arg1[%c0_1, %c0_2] : memref<32x256xf32, #tpu.memory_space<vmem>>, vector<32x256xf32>
    %cst = arith.constant dense<0.000000e+00> : vector<2x256xf32>
    %2 = tpu.matmul %0, %1, %cst {dimension_numbers = #tpu.dot_dimension_numbers<[1], [0], [0], [1], [0, 0, 1, 1], [], []>} : vector<2x32xf32>, vector<32x256xf32>, vector<2x256xf32> -> vector<2x256xf32>
    %c0_3 = arith.constant 0 : index
    %c0_4 = arith.constant 0 : index
    %3 = vector.load %arg2[%c0_3, %c0_4] : memref<1x256xf32, #tpu.memory_space<vmem>>, vector<1x256xf32>
    %4 = vector.broadcast %3 : vector<1x256xf32> to vector<2x256xf32>
    %5 = arith.addf %2, %4 : vector<2x256xf32>
    %6 = vector.extract_strided_slice %5 {offsets = [0, 0], sizes = [2, 128], strides = [1, 1]} : vector<2x256xf32> to vector<2x128xf32>
    %7 = vector.extract_strided_slice %5 {offsets = [0, 128], sizes = [2, 128], strides = [1, 1]} : vector<2x256xf32> to vector<2x128xf32>
    %8 = arith.maximumf %6, %7 : vector<2x128xf32>
    %c0_5 = arith.constant 0 : index
    %c0_6 = arith.constant 0 : index
    %9 = vector.load %arg3[%c0_5, %c0_6] : memref<128x8xf32, #tpu.memory_space<vmem>>, vector<128x8xf32>
    %cst_7 = arith.constant dense<0.000000e+00> : vector<2x8xf32>
    %10 = tpu.matmul %8, %9, %cst_7 {dimension_numbers = #tpu.dot_dimension_numbers<[1], [0], [0], [1], [0, 0, 1, 1], [], []>} : vector<2x128xf32>, vector<128x8xf32>, vector<2x8xf32> -> vector<2x8xf32>
    %c0_8 = arith.constant 0 : index
    %c0_9 = arith.constant 0 : index
    %11 = vector.load %arg4[%c0_8, %c0_9] : memref<1x8xf32, #tpu.memory_space<vmem>>, vector<1x8xf32>
    %12 = vector.broadcast %11 : vector<1x8xf32> to vector<2x8xf32>
    %13 = arith.addf %10, %12 : vector<2x8xf32>
    %cst_10 = arith.constant 0.000000e+00 : f32
    %14 = vector.broadcast %cst_10 : f32 to vector<2x8xf32>
    %15 = arith.maximumf %13, %14 : vector<2x8xf32>
    %16 = arith.truncf %15 : vector<2x8xf32> to vector<2x8xbf16>
    %c0_11 = arith.constant 0 : index
    %c0_12 = arith.constant 0 : index
    %17 = vector.load %arg5[%c0_11, %c0_12] : memref<8x6144xbf16, #tpu.memory_space<vmem>>, vector<8x6144xbf16>
    %cst_13 = arith.constant dense<0.000000e+00> : vector<2x6144xf32>
    %18 = tpu.matmul %16, %17, %cst_13 {dimension_numbers = #tpu.dot_dimension_numbers<[1], [0], [0], [1], [0, 0, 1, 1], [], []>} : vector<2x8xbf16>, vector<8x6144xbf16>, vector<2x6144xf32> -> vector<2x6144xf32>
    %c0_14 = arith.constant 0 : index
    %c0_15 = arith.constant 0 : index
    %19 = vector.load %arg6[%c0_14, %c0_15] : memref<1x6144xf32, #tpu.memory_space<vmem>>, vector<1x6144xf32>
    %20 = vector.broadcast %19 : vector<1x6144xf32> to vector<2x6144xf32>
    %21 = arith.addf %18, %20 : vector<2x6144xf32>
    %cst_16 = arith.constant 0.000000e+00 : f32
    %22 = vector.broadcast %cst_16 : f32 to vector<2x384xf32>
    %cst_17 = arith.constant 0.000000e+00 : f32
    %23 = vector.broadcast %cst_17 : f32 to vector<2x384xf32>
    %24 = vector.extract_strided_slice %21 {offsets = [0, 0], sizes = [2, 1536], strides = [1, 1]} : vector<2x6144xf32> to vector<2x1536xf32>
    %25 = arith.truncf %22 : vector<2x384xf32> to vector<2x384xbf16>
    %c0_18 = arith.constant 0 : index
    %c0_19 = arith.constant 0 : index
    %26 = vector.load %arg7[%c0_18, %c0_19] : memref<384x1536xbf16, #tpu.memory_space<vmem>>, vector<384x1536xbf16>
    %cst_20 = arith.constant dense<0.000000e+00> : vector<2x1536xf32>
    %27 = tpu.matmul %25, %26, %cst_20 {dimension_numbers = #tpu.dot_dimension_numbers<[1], [0], [0], [1], [0, 0, 1, 1], [], []>} : vector<2x384xbf16>, vector<384x1536xbf16>, vector<2x1536xf32> -> vector<2x1536xf32>
    %28 = arith.addf %24, %27 : vector<2x1536xf32>
    %29 = vector.extract_strided_slice %28 {offsets = [0, 0], sizes = [2, 384], strides = [1, 1]} : vector<2x1536xf32> to vector<2x384xf32>
    %cst_21 = arith.constant 5.000000e-01 : f32
    %30 = vector.broadcast %cst_21 : f32 to vector<2x384xf32>
    %31 = arith.mulf %30, %29 : vector<2x384xf32>
    %32 = math.tanh %31 : vector<2x384xf32>
    %cst_22 = arith.constant 1.000000e+00 : f32
    %33 = vector.broadcast %cst_22 : f32 to vector<2x384xf32>
    %34 = arith.addf %32, %33 : vector<2x384xf32>
    %cst_23 = arith.constant 5.000000e-01 : f32
    %35 = vector.broadcast %cst_23 : f32 to vector<2x384xf32>
    %36 = arith.mulf %35, %34 : vector<2x384xf32>
    %37 = vector.extract_strided_slice %28 {offsets = [0, 384], sizes = [2, 384], strides = [1, 1]} : vector<2x1536xf32> to vector<2x384xf32>
    %cst_24 = arith.constant 5.000000e-01 : f32
    %38 = vector.broadcast %cst_24 : f32 to vector<2x384xf32>
    %39 = arith.mulf %38, %37 : vector<2x384xf32>
    %40 = math.tanh %39 : vector<2x384xf32>
    %cst_25 = arith.constant 1.000000e+00 : f32
    %41 = vector.broadcast %cst_25 : f32 to vector<2x384xf32>
    %42 = arith.addf %40, %41 : vector<2x384xf32>
    %cst_26 = arith.constant 5.000000e-01 : f32
    %43 = vector.broadcast %cst_26 : f32 to vector<2x384xf32>
    %44 = arith.mulf %43, %42 : vector<2x384xf32>
    %45 = vector.extract_strided_slice %28 {offsets = [0, 768], sizes = [2, 384], strides = [1, 1]} : vector<2x1536xf32> to vector<2x384xf32>
    %46 = math.tanh %45 : vector<2x384xf32>
    %47 = vector.extract_strided_slice %28 {offsets = [0, 1152], sizes = [2, 384], strides = [1, 1]} : vector<2x1536xf32> to vector<2x384xf32>
    %cst_27 = arith.constant 5.000000e-01 : f32
    %48 = vector.broadcast %cst_27 : f32 to vector<2x384xf32>
    %49 = arith.mulf %48, %47 : vector<2x384xf32>
    %50 = math.tanh %49 : vector<2x384xf32>
    %cst_28 = arith.constant 1.000000e+00 : f32
    %51 = vector.broadcast %cst_28 : f32 to vector<2x384xf32>
    %52 = arith.addf %50, %51 : vector<2x384xf32>
    %cst_29 = arith.constant 5.000000e-01 : f32
    %53 = vector.broadcast %cst_29 : f32 to vector<2x384xf32>
    %54 = arith.mulf %53, %52 : vector<2x384xf32>
    %55 = arith.mulf %44, %23 : vector<2x384xf32>
    %56 = arith.mulf %36, %46 : vector<2x384xf32>
    %57 = arith.addf %55, %56 : vector<2x384xf32>
    %58 = math.tanh %57 : vector<2x384xf32>
    %59 = arith.mulf %54, %58 : vector<2x384xf32>
    %60 = vector.extract_strided_slice %21 {offsets = [0, 1536], sizes = [2, 1536], strides = [1, 1]} : vector<2x6144xf32> to vector<2x1536xf32>
    %61 = arith.truncf %59 : vector<2x384xf32> to vector<2x384xbf16>
    %c0_30 = arith.constant 0 : index
    %c0_31 = arith.constant 0 : index
    %62 = vector.load %arg7[%c0_30, %c0_31] : memref<384x1536xbf16, #tpu.memory_space<vmem>>, vector<384x1536xbf16>
    %cst_32 = arith.constant dense<0.000000e+00> : vector<2x1536xf32>
    %63 = tpu.matmul %61, %62, %cst_32 {dimension_numbers = #tpu.dot_dimension_numbers<[1], [0], [0], [1], [0, 0, 1, 1], [], []>} : vector<2x384xbf16>, vector<384x1536xbf16>, vector<2x1536xf32> -> vector<2x1536xf32>
    %64 = arith.addf %60, %63 : vector<2x1536xf32>
    %65 = vector.extract_strided_slice %64 {offsets = [0, 0], sizes = [2, 384], strides = [1, 1]} : vector<2x1536xf32> to vector<2x384xf32>
    %cst_33 = arith.constant 5.000000e-01 : f32
    %66 = vector.broadcast %cst_33 : f32 to vector<2x384xf32>
    %67 = arith.mulf %66, %65 : vector<2x384xf32>
    %68 = math.tanh %67 : vector<2x384xf32>
    %cst_34 = arith.constant 1.000000e+00 : f32
    %69 = vector.broadcast %cst_34 : f32 to vector<2x384xf32>
    %70 = arith.addf %68, %69 : vector<2x384xf32>
    %cst_35 = arith.constant 5.000000e-01 : f32
    %71 = vector.broadcast %cst_35 : f32 to vector<2x384xf32>
    %72 = arith.mulf %71, %70 : vector<2x384xf32>
    %73 = vector.extract_strided_slice %64 {offsets = [0, 384], sizes = [2, 384], strides = [1, 1]} : vector<2x1536xf32> to vector<2x384xf32>
    %cst_36 = arith.constant 5.000000e-01 : f32
    %74 = vector.broadcast %cst_36 : f32 to vector<2x384xf32>
    %75 = arith.mulf %74, %73 : vector<2x384xf32>
    %76 = math.tanh %75 : vector<2x384xf32>
    %cst_37 = arith.constant 1.000000e+00 : f32
    %77 = vector.broadcast %cst_37 : f32 to vector<2x384xf32>
    %78 = arith.addf %76, %77 : vector<2x384xf32>
    %cst_38 = arith.constant 5.000000e-01 : f32
    %79 = vector.broadcast %cst_38 : f32 to vector<2x384xf32>
    %80 = arith.mulf %79, %78 : vector<2x384xf32>
    %81 = vector.extract_strided_slice %64 {offsets = [0, 768], sizes = [2, 384], strides = [1, 1]} : vector<2x1536xf32> to vector<2x384xf32>
    %82 = math.tanh %81 : vector<2x384xf32>
    %83 = vector.extract_strided_slice %64 {offsets = [0, 1152], sizes = [2, 384], strides = [1, 1]} : vector<2x1536xf32> to vector<2x384xf32>
    %cst_39 = arith.constant 5.000000e-01 : f32
    %84 = vector.broadcast %cst_39 : f32 to vector<2x384xf32>
    %85 = arith.mulf %84, %83 : vector<2x384xf32>
    %86 = math.tanh %85 : vector<2x384xf32>
    %cst_40 = arith.constant 1.000000e+00 : f32
    %87 = vector.broadcast %cst_40 : f32 to vector<2x384xf32>
    %88 = arith.addf %86, %87 : vector<2x384xf32>
    %cst_41 = arith.constant 5.000000e-01 : f32
    %89 = vector.broadcast %cst_41 : f32 to vector<2x384xf32>
    %90 = arith.mulf %89, %88 : vector<2x384xf32>
    %91 = arith.mulf %80, %57 : vector<2x384xf32>
    %92 = arith.mulf %72, %82 : vector<2x384xf32>
    %93 = arith.addf %91, %92 : vector<2x384xf32>
    %94 = math.tanh %93 : vector<2x384xf32>
    %95 = arith.mulf %90, %94 : vector<2x384xf32>
    %96 = vector.extract_strided_slice %21 {offsets = [0, 3072], sizes = [2, 1536], strides = [1, 1]} : vector<2x6144xf32> to vector<2x1536xf32>
    %97 = arith.truncf %95 : vector<2x384xf32> to vector<2x384xbf16>
    %c0_42 = arith.constant 0 : index
    %c0_43 = arith.constant 0 : index
    %98 = vector.load %arg7[%c0_42, %c0_43] : memref<384x1536xbf16, #tpu.memory_space<vmem>>, vector<384x1536xbf16>
    %cst_44 = arith.constant dense<0.000000e+00> : vector<2x1536xf32>
    %99 = tpu.matmul %97, %98, %cst_44 {dimension_numbers = #tpu.dot_dimension_numbers<[1], [0], [0], [1], [0, 0, 1, 1], [], []>} : vector<2x384xbf16>, vector<384x1536xbf16>, vector<2x1536xf32> -> vector<2x1536xf32>
    %100 = arith.addf %96, %99 : vector<2x1536xf32>
    %101 = vector.extract_strided_slice %100 {offsets = [0, 0], sizes = [2, 384], strides = [1, 1]} : vector<2x1536xf32> to vector<2x384xf32>
    %cst_45 = arith.constant 5.000000e-01 : f32
    %102 = vector.broadcast %cst_45 : f32 to vector<2x384xf32>
    %103 = arith.mulf %102, %101 : vector<2x384xf32>
    %104 = math.tanh %103 : vector<2x384xf32>
    %cst_46 = arith.constant 1.000000e+00 : f32
    %105 = vector.broadcast %cst_46 : f32 to vector<2x384xf32>
    %106 = arith.addf %104, %105 : vector<2x384xf32>
    %cst_47 = arith.constant 5.000000e-01 : f32
    %107 = vector.broadcast %cst_47 : f32 to vector<2x384xf32>
    %108 = arith.mulf %107, %106 : vector<2x384xf32>
    %109 = vector.extract_strided_slice %100 {offsets = [0, 384], sizes = [2, 384], strides = [1, 1]} : vector<2x1536xf32> to vector<2x384xf32>
    %cst_48 = arith.constant 5.000000e-01 : f32
    %110 = vector.broadcast %cst_48 : f32 to vector<2x384xf32>
    %111 = arith.mulf %110, %109 : vector<2x384xf32>
    %112 = math.tanh %111 : vector<2x384xf32>
    %cst_49 = arith.constant 1.000000e+00 : f32
    %113 = vector.broadcast %cst_49 : f32 to vector<2x384xf32>
    %114 = arith.addf %112, %113 : vector<2x384xf32>
    %cst_50 = arith.constant 5.000000e-01 : f32
    %115 = vector.broadcast %cst_50 : f32 to vector<2x384xf32>
    %116 = arith.mulf %115, %114 : vector<2x384xf32>
    %117 = vector.extract_strided_slice %100 {offsets = [0, 768], sizes = [2, 384], strides = [1, 1]} : vector<2x1536xf32> to vector<2x384xf32>
    %118 = math.tanh %117 : vector<2x384xf32>
    %119 = vector.extract_strided_slice %100 {offsets = [0, 1152], sizes = [2, 384], strides = [1, 1]} : vector<2x1536xf32> to vector<2x384xf32>
    %cst_51 = arith.constant 5.000000e-01 : f32
    %120 = vector.broadcast %cst_51 : f32 to vector<2x384xf32>
    %121 = arith.mulf %120, %119 : vector<2x384xf32>
    %122 = math.tanh %121 : vector<2x384xf32>
    %cst_52 = arith.constant 1.000000e+00 : f32
    %123 = vector.broadcast %cst_52 : f32 to vector<2x384xf32>
    %124 = arith.addf %122, %123 : vector<2x384xf32>
    %cst_53 = arith.constant 5.000000e-01 : f32
    %125 = vector.broadcast %cst_53 : f32 to vector<2x384xf32>
    %126 = arith.mulf %125, %124 : vector<2x384xf32>
    %127 = arith.mulf %116, %93 : vector<2x384xf32>
    %128 = arith.mulf %108, %118 : vector<2x384xf32>
    %129 = arith.addf %127, %128 : vector<2x384xf32>
    %130 = math.tanh %129 : vector<2x384xf32>
    %131 = arith.mulf %126, %130 : vector<2x384xf32>
    %132 = vector.extract_strided_slice %21 {offsets = [0, 4608], sizes = [2, 1536], strides = [1, 1]} : vector<2x6144xf32> to vector<2x1536xf32>
    %133 = arith.truncf %131 : vector<2x384xf32> to vector<2x384xbf16>
    %c0_54 = arith.constant 0 : index
    %c0_55 = arith.constant 0 : index
    %134 = vector.load %arg7[%c0_54, %c0_55] : memref<384x1536xbf16, #tpu.memory_space<vmem>>, vector<384x1536xbf16>
    %cst_56 = arith.constant dense<0.000000e+00> : vector<2x1536xf32>
    %135 = tpu.matmul %133, %134, %cst_56 {dimension_numbers = #tpu.dot_dimension_numbers<[1], [0], [0], [1], [0, 0, 1, 1], [], []>} : vector<2x384xbf16>, vector<384x1536xbf16>, vector<2x1536xf32> -> vector<2x1536xf32>
    %136 = arith.addf %132, %135 : vector<2x1536xf32>
    %137 = vector.extract_strided_slice %136 {offsets = [0, 0], sizes = [2, 384], strides = [1, 1]} : vector<2x1536xf32> to vector<2x384xf32>
    %cst_57 = arith.constant 5.000000e-01 : f32
    %138 = vector.broadcast %cst_57 : f32 to vector<2x384xf32>
    %139 = arith.mulf %138, %137 : vector<2x384xf32>
    %140 = math.tanh %139 : vector<2x384xf32>
    %cst_58 = arith.constant 1.000000e+00 : f32
    %141 = vector.broadcast %cst_58 : f32 to vector<2x384xf32>
    %142 = arith.addf %140, %141 : vector<2x384xf32>
    %cst_59 = arith.constant 5.000000e-01 : f32
    %143 = vector.broadcast %cst_59 : f32 to vector<2x384xf32>
    %144 = arith.mulf %143, %142 : vector<2x384xf32>
    %145 = vector.extract_strided_slice %136 {offsets = [0, 384], sizes = [2, 384], strides = [1, 1]} : vector<2x1536xf32> to vector<2x384xf32>
    %cst_60 = arith.constant 5.000000e-01 : f32
    %146 = vector.broadcast %cst_60 : f32 to vector<2x384xf32>
    %147 = arith.mulf %146, %145 : vector<2x384xf32>
    %148 = math.tanh %147 : vector<2x384xf32>
    %cst_61 = arith.constant 1.000000e+00 : f32
    %149 = vector.broadcast %cst_61 : f32 to vector<2x384xf32>
    %150 = arith.addf %148, %149 : vector<2x384xf32>
    %cst_62 = arith.constant 5.000000e-01 : f32
    %151 = vector.broadcast %cst_62 : f32 to vector<2x384xf32>
    %152 = arith.mulf %151, %150 : vector<2x384xf32>
    %153 = vector.extract_strided_slice %136 {offsets = [0, 768], sizes = [2, 384], strides = [1, 1]} : vector<2x1536xf32> to vector<2x384xf32>
    %154 = math.tanh %153 : vector<2x384xf32>
    %155 = vector.extract_strided_slice %136 {offsets = [0, 1152], sizes = [2, 384], strides = [1, 1]} : vector<2x1536xf32> to vector<2x384xf32>
    %cst_63 = arith.constant 5.000000e-01 : f32
    %156 = vector.broadcast %cst_63 : f32 to vector<2x384xf32>
    %157 = arith.mulf %156, %155 : vector<2x384xf32>
    %158 = math.tanh %157 : vector<2x384xf32>
    %cst_64 = arith.constant 1.000000e+00 : f32
    %159 = vector.broadcast %cst_64 : f32 to vector<2x384xf32>
    %160 = arith.addf %158, %159 : vector<2x384xf32>
    %cst_65 = arith.constant 5.000000e-01 : f32
    %161 = vector.broadcast %cst_65 : f32 to vector<2x384xf32>
    %162 = arith.mulf %161, %160 : vector<2x384xf32>
    %163 = arith.mulf %152, %129 : vector<2x384xf32>
    %164 = arith.mulf %144, %154 : vector<2x384xf32>
    %165 = arith.addf %163, %164 : vector<2x384xf32>
    %166 = math.tanh %165 : vector<2x384xf32>
    %167 = arith.mulf %162, %166 : vector<2x384xf32>
    %c0_66 = arith.constant 0 : index
    %c0_67 = arith.constant 0 : index
    %168 = vector.load %arg8[%c0_66, %c0_67] : memref<1x384xf32, #tpu.memory_space<vmem>>, vector<1x384xf32>
    %169 = vector.broadcast %168 : vector<1x384xf32> to vector<2x384xf32>
    %170 = arith.mulf %167, %169 : vector<2x384xf32>
    %cst_68 = arith.constant dense<0.000000e+00> : vector<2xf32>
    %171 = vector.multi_reduction <add>, %170, %cst_68 [1] : vector<2x384xf32> to vector<2xf32>
    %172 = vector.shape_cast %171 : vector<2xf32> to vector<2x1xf32>
    %c0_69 = arith.constant 0 : index
    %c0_70 = arith.constant 0 : index
    %173 = vector.load %arg9[%c0_69, %c0_70] : memref<1x1xf32, #tpu.memory_space<vmem>>, vector<1x1xf32>
    %174 = vector.broadcast %173 : vector<1x1xf32> to vector<2x1xf32>
    %175 = arith.addf %172, %174 : vector<2x1xf32>
    %cst_71 = arith.constant 5.000000e-01 : f32
    %176 = vector.broadcast %cst_71 : f32 to vector<2x1xf32>
    %177 = arith.mulf %176, %175 : vector<2x1xf32>
    %178 = math.tanh %177 : vector<2x1xf32>
    %cst_72 = arith.constant 1.000000e+00 : f32
    %179 = vector.broadcast %cst_72 : f32 to vector<2x1xf32>
    %180 = arith.addf %178, %179 : vector<2x1xf32>
    %cst_73 = arith.constant 5.000000e-01 : f32
    %181 = vector.broadcast %cst_73 : f32 to vector<2x1xf32>
    %182 = arith.mulf %181, %180 : vector<2x1xf32>
    %c0_74 = arith.constant 0 : index
    %c0_75 = arith.constant 0 : index
    %183 = vector.load %arg10[%c0_74, %c0_75] : memref<2x1xf32, #tpu.memory_space<vmem>>, vector<2x1xf32>
    tpu.vector_store %arg10[%c0_74, %c0_75], %182 {strides = array<i32>} : memref<2x1xf32, #tpu.memory_space<vmem>>, vector<2x1xf32>,
    return
  }
}

</mosaic_0001>

<bundles_post_ra>
// kernel: movement1_forward.1
= control target key start
LH: loop header
LB: loop body
LE: loop exit
PB: predicated region body
PF: predicated region fallthrough
CT: control target
= control target key end

     0   :  { %s9899_s0 = inlined_call_operand.vmem [shape: f32[2,32], index: 0, kind: input, shape index: {}]   ;;  %s9900_s1 = inlined_call_operand.hbm [shape: f32[32,256], index: 1, kind: input, shape index: {}]   ;;  %s9901_s2 = inlined_call_operand.hbm [shape: f32[1,256], index: 2, kind: input, shape index: {}]   ;;  %s9902_s3 = inlined_call_operand.vmem [shape: f32[128,8], index: 3, kind: input, shape index: {}]   ;;  %s9903_s4 = inlined_call_operand.hbm [shape: f32[1,8], index: 4, kind: input, shape index: {}]   ;;  %s9904_s5 = inlined_call_operand.hbm [shape: bf16[8,6144], index: 5, kind: input, shape index: {}]   ;;  %s9905_s6 = inlined_call_operand.hbm [shape: f32[1,6144], index: 6, kind: input, shape index: {}]   ;;  %s9906_s7 = inlined_call_operand.hbm [shape: bf16[384,1536], index: 7, kind: input, shape index: {}]   ;;  %s9907_s8 = inlined_call_operand.hbm [shape: f32[1,384], index: 8, kind: input, shape index: {}]   ;;  %s9908_s9 = inlined_call_operand.<no memory space> [shape: f32[1,1], index: 9, kind: input, shape index: {}]   ;;  %s9909_s10 = inlined_call_operand.vmem [shape: f32[2,1], index: 10, kind: output, shape index: {}]  }
   0x1   :  { %v15_v0 = vstv %s9908_s9 }
   0x2   :  { %16 = vst [vmem:[#allocation2] sm:$0x1] %v15_v0 }
   0x3   :  { %17 = vsyncpa [#allocation4], 0 }
   0x4   :  { %18 = vsyncpa [#allocation6], 0 }
   0x5   :  { %19 = vsyncpa [#allocation9], 0 }
   0x6   :  { %20 = vsyncpa [#allocation12], 0  ;;  %s7865_s15 = smov [#allocation5]   ;;  %s7866_s17 = smov [#allocation8]  }
   0x7   :  { %s41_s16 = sshll.u32 %s7865_s15, 4  ;;  %s63_s18 = sshll.u32 %s7866_s17, 4  ;;  %s42_s16 = int_to_ptr.vmem [resolvable:$true] %s41_s16  ;;  %s64_s18 = int_to_ptr.vmem [resolvable:$true] %s63_s18 }
   0x8   :  { %s7703_s21 = scalar_lea.hbm %s9901_s2, 32 }
   0x9   :  { %p7704_p0 = scmp.ne.s32.totalorder %s9901_s2, %s7703_s21  ;;  %p7707_p1 = scmp.lt.u32.totalorder %s7703_s21, %s9901_s2 }
   0xb   :  { %p7709_p2 = pnand %p7707_p1, %p7704_p0 }
   0xd   :  { %7712 = shalt.err (!%p7709_p2)
}
   0xe   :  { %s7713_s25 = scalar_lea.vmem %s42_s16, 32  ;;  %p7718_p4 = scmp.lt.s32.totalorder %s42_s16, %s42_s16 }
   0xf   :  { %p7714_p3 = scmp.ne.s32.totalorder %s42_s16, %s7713_s25  ;;  %p7719_p5 = scmp.lt.s32.totalorder %s7713_s25, %s7713_s25 }
  0x11   :  { %p7720_p6 = por %p7719_p5, %p7718_p4 }
  0x13   :  { %p7721_p7 = pnand %p7720_p6, %p7714_p3 }
  0x15   :  { %7724 = shalt.err (!%p7721_p7)
}
  0x16   :  { %44 = dma.hbm_to_vmem [thread:$0]  %s9901_s2, 32, %s42_s16, [#allocation6]  }
  0x17   :  { %s7725_s30 = scalar_lea.hbm %s9904_s5, 3072 }
  0x18   :  { %p7726_p8 = scmp.ne.s32.totalorder %s9904_s5, %s7725_s30  ;;  %p7729_p9 = scmp.lt.u32.totalorder %s7725_s30, %s9904_s5 }
  0x1a   :  { %p7731_p10 = pnand %p7729_p9, %p7726_p8 }
  0x1c   :  { %7734 = shalt.err (!%p7731_p10)
}
  0x1d   :  { %s7735_s15 = scalar_lea.vmem %s64_s18, 3072  ;;  %p7740_p12 = scmp.lt.s32.totalorder %s64_s18, %s64_s18 }
  0x1e   :  { %p7736_p11 = scmp.ne.s32.totalorder %s64_s18, %s7735_s15  ;;  %p7741_p13 = scmp.lt.s32.totalorder %s7735_s15, %s7735_s15 }
  0x20   :  { %p7742_p0 = por %p7741_p13, %p7740_p12 }
  0x22   :  { %p7743_p1 = pnand %p7742_p0, %p7736_p11 }
  0x24   :  { %7746 = shalt.err (!%p7743_p1)
}
  0x25   :  { %66 = dma.hbm_to_vmem [thread:$0]  %s9904_s5, 3072, %s64_s18, [#allocation9]  }
  0x26   :  { %s7867_s17 = smov [#allocation11]   ;;  %s7747_s22 = scalar_lea.hbm %s9906_s7, 36864 }
  0x27   :  { %s82_s19 = sshll.u32 %s7867_s17, 4  ;;  %p7748_p2 = scmp.ne.s32.totalorder %s9906_s7, %s7747_s22  ;;  %s83_s19 = int_to_ptr.vmem [resolvable:$true] %s82_s19 }
  0x28   :  { %p7751_p3 = scmp.lt.u32.totalorder %s7747_s22, %s9906_s7 }
  0x2a   :  { %p7753_p4 = pnand %p7751_p3, %p7748_p2 }
  0x2c   :  { %7756 = shalt.err (!%p7753_p4)
}
  0x2d   :  { %s7757_s26 = scalar_lea.vmem %s83_s19, 36864  ;;  %p7762_p6 = scmp.lt.s32.totalorder %s83_s19, %s83_s19 }
  0x2e   :  { %p7758_p5 = scmp.ne.s32.totalorder %s83_s19, %s7757_s26  ;;  %p7763_p7 = scmp.lt.s32.totalorder %s7757_s26, %s7757_s26 }
  0x30   :  { %p7764_p8 = por %p7763_p7, %p7762_p6 }
  0x32   :  { %p7765_p9 = pnand %p7764_p8, %p7758_p5 }
  0x34   :  { %7768 = shalt.err (!%p7765_p9)
}
  0x35   :  { %s7868_s5 = smov 768   ;;  %s7869_s18 = smov 48  }
  0x36   :  { %88 = dma.hbm_to_vmem [thread:$0]  %s9906_s7, 36864, %s83_s19, [#allocation12], %s7868_s5, %s7868_s5, %s7869_s18  }
  0x37   :  { %s7870_s29 = smov [#allocation3]   ;;  %s7769_s13 = scalar_lea.hbm %s9900_s1, 1024 }
  0x38   :  { %s28_s30 = sshll.u32 %s7870_s29, 4  ;;  %p7770_p10 = scmp.ne.s32.totalorder %s9900_s1, %s7769_s13  ;;  %s29_s30 = int_to_ptr.vmem [resolvable:$true] %s28_s30 }
  0x39   :  { %p7773_p11 = scmp.lt.u32.totalorder %s7769_s13, %s9900_s1 }
  0x3b   :  { %p7775_p12 = pnand %p7773_p11, %p7770_p10 }
  0x3d   :  { %7778 = shalt.err (!%p7775_p12)
}
  0x3e   :  { %s7779_s17 = scalar_lea.vmem %s29_s30, 1024  ;;  %p7784_p0 = scmp.lt.s32.totalorder %s29_s30, %s29_s30 }
  0x3f   :  { %p7780_p13 = scmp.ne.s32.totalorder %s29_s30, %s7779_s17  ;;  %p7785_p1 = scmp.lt.s32.totalorder %s7779_s17, %s7779_s17 }
  0x41   :  { %p7786_p2 = por %p7785_p1, %p7784_p0 }
  0x43   :  { %p7787_p3 = pnand %p7786_p2, %p7780_p13 }
  0x45   :  { %7790 = shalt.err (!%p7787_p3)
}
  0x46   :  { %s7871_s7 = smov 256   ;;  %s7872_s19 = smov 16  }
  0x47   :  { %34 = dma.hbm_to_vmem [thread:$0]  %s9900_s1, 1024, %s29_s30, [#allocation4], %s7871_s7, %s7871_s7, %s7872_s19  }
  0x48   :  { %s7873_s22 = smov [#allocation7]   ;;  %s7874_s9 = smov [#allocation10]  }
  0x49   :  { %s53_s23 = sshll.u32 %s7873_s22, 4  ;;  %s73_s24 = sshll.u32 %s7874_s9, 4  ;;  %s54_s23 = int_to_ptr.vmem [resolvable:$true] %s53_s23  ;;  %s74_s24 = int_to_ptr.vmem [resolvable:$true] %s73_s24 }
  0x4a   :  { %s7791_s5 = scalar_lea.hbm %s9903_s4, 16 }
  0x4b   :  { %p7792_p4 = scmp.ne.s32.totalorder %s9903_s4, %s7791_s5  ;;  %p7795_p5 = scmp.lt.u32.totalorder %s7791_s5, %s9903_s4 }
  0x4d   :  { %p7797_p6 = pnand %p7795_p5, %p7792_p4 }
  0x4f   :  { %7800 = shalt.err (!%p7797_p6)
}
  0x50   :  { %s7801_s1 = scalar_lea.vmem %s54_s23, 16  ;;  %s7805_s30 = scalar_lea.vmem %s54_s23, 32 }
  0x51   :  { %p7802_p7 = scmp.ne.s32.totalorder %s54_s23, %s7801_s1  ;;  %p7806_p8 = scmp.lt.s32.totalorder %s54_s23, %s54_s23 }
  0x52   :  { %p7807_p9 = scmp.lt.s32.totalorder %s7805_s30, %s7801_s1 }
  0x54   :  { %p7808_p10 = por %p7807_p9, %p7806_p8 }
  0x56   :  { %p7809_p11 = pnand %p7808_p10, %p7802_p7 }
  0x58   :  { %7812 = shalt.err (!%p7809_p11)
}
  0x59   :  { %56 = dma.hbm_to_vmem [thread:$0]  %s9903_s4, 16, %s54_s23, [#allocation6]  }
  0x5a   :  { %s7813_s15 = scalar_lea.hbm %s9905_s6, 768 }
  0x5b   :  { %p7814_p12 = scmp.ne.s32.totalorder %s9905_s6, %s7813_s15  ;;  %p7817_p13 = scmp.lt.u32.totalorder %s7813_s15, %s9905_s6 }
  0x5d   :  { %p7819_p0 = pnand %p7817_p13, %p7814_p12 }
  0x5f   :  { %7822 = shalt.err (!%p7819_p0)
}
  0x60   :  { %s7823_s19 = scalar_lea.vmem %s74_s24, 768  ;;  %p7828_p2 = scmp.lt.s32.totalorder %s74_s24, %s74_s24 }
  0x61   :  { %p7824_p1 = scmp.ne.s32.totalorder %s74_s24, %s7823_s19  ;;  %p7829_p3 = scmp.lt.s32.totalorder %s7823_s19, %s7823_s19 }
  0x63   :  { %p7830_p4 = por %p7829_p3, %p7828_p2 }
  0x65   :  { %p7831_p5 = pnand %p7830_p4, %p7824_p1 }
  0x67   :  { %7834 = shalt.err (!%p7831_p5)
}
  0x68   :  { %76 = dma.hbm_to_vmem [thread:$0]  %s9905_s6, 768, %s74_s24, [#allocation9]  }
  0x69   :  { %s7875_s21 = smov [#allocation13]   ;;  %s7835_s25 = scalar_lea.hbm %s9907_s8, 48 }
  0x6a   :  { %s95_s22 = sshll.u32 %s7875_s21, 4  ;;  %p7836_p6 = scmp.ne.s32.totalorder %s9907_s8, %s7835_s25  ;;  %s96_s22 = int_to_ptr.vmem [resolvable:$true] %s95_s22 }
  0x6b   :  { %p7839_p7 = scmp.lt.u32.totalorder %s7835_s25, %s9907_s8 }
  0x6d   :  { %p7841_p8 = pnand %p7839_p7, %p7836_p6 }
  0x6f   :  { %7844 = shalt.err (!%p7841_p8)
}
  0x70   :  { %s7845_s28 = scalar_lea.vmem %s96_s22, 48  ;;  %s7849_s6 = scalar_lea.vmem %s96_s22, 64 }
  0x71   :  { %p7846_p9 = scmp.ne.s32.totalorder %s96_s22, %s7845_s28  ;;  %p7850_p10 = scmp.lt.s32.totalorder %s96_s22, %s96_s22 }
  0x72   :  { %p7851_p11 = scmp.lt.s32.totalorder %s7849_s6, %s7845_s28 }
  0x74   :  { %p7852_p12 = por %p7851_p11, %p7850_p10 }
  0x76   :  { %p7853_p13 = pnand %p7852_p12, %p7846_p9 }
  0x78   :  { %7856 = shalt.err (!%p7853_p13)
}
  0x79   :  { %98 = dma.hbm_to_vmem [thread:$0]  %s9907_s8, 48, %s96_s22, [#allocation12]  }
  0x7a   :  { %7857 = dma.done.wait [#allocation4], 1024  }
  0x7b   :  { %7858 = vsyncadd [#allocation4], 4294966272 }
  0x7c   :  { %7859 = dma.done.wait [#allocation6], 48  }
  0x7d   :  { %7860 = vsyncadd [#allocation6], 4294967248 }
  0x7e   :  { %7861 = dma.done.wait [#allocation9], 3840  }
  0x7f   :  { %7862 = vsyncadd [#allocation9], 4294963456 }
  0x80   :  { %7863 = dma.done.wait [#allocation12], 36912  }
  0x81   :  { %7864 = vsyncadd [#allocation12], 4294930384  ;;  %v7876_v1 = vmov 0.0   ;;  %v7877_v2 = vmov 0.0|0.0   ;;  %v125_v3 = vld [vmem:[#allocation3 + $0x8] sm:$0xff]  ;;  %v127_v4 = vld [vmem:[#allocation3 + $0x18] sm:$0xff]  ;;  %v134_v40 = vlaneseq }
  0x82   :  { %212 = vmatprep.mubr.f32.mxu0 %v7876_v1  ;;  %6310 = vmatprep.subr.bf16.mxu1 %v7877_v2  ;;  %v124_v5 = vld [vmem:[#allocation3] sm:$0xff]  ;;  %v6302_v6 = vpack.c.bf16 %v127_v4, %v125_v3  ;;  %v126_v7 = vld [vmem:[#allocation3 + $0x10] sm:$0xff]  ;;  %v129_v8 = vld [vmem:[#allocation3 + $0x28] sm:$0xff]  ;;  %vm144_vm0 = vcmask 261120   ;;  %vm7878_vm1 = vmmov 0   ;;  %vm715_vm2 = vcmask 1043456  }
  0x83   :  { %v131_v9 = vld [vmem:[#allocation3 + $0x38] sm:$0xff]  ;;  %v6304_v10 = vpack.c.bf16 %v126_v7, %v124_v5  ;;  %v128_v12 = vld [vmem:[#allocation3 + $0x20] sm:$0xff]  ;;  %v130_v13 = vld [vmem:[#allocation3 + $0x30] sm:$0xff]  ;;  %6299 = vmatprep.mubr.msk.f32.mxu1 %vm7878_vm1, %v7876_v1  ;;  %v8075_v41 = vshrl.u32 %v134_v40, 7  ;;  %v9910_v61 = vmov 0   ;;  %vm711_vm3 = vcmask 64512  }
  0x84   :  { %v6306_v11 = vpack.c.bf16 %v131_v9, %v129_v8  ;;  %6303 = vmatprep.subr.bf16.mxu0 %v6302_v6  ;;  %v220_v14 = vld [vmem:[%s9902_s3] sm:$0xff]  ;;  %v221_v15 = vld [vmem:[%s9902_s3 + $0x8] sm:$0xff]  ;;  %v222_v16 = vld [vmem:[%s9902_s3 + $0x10] sm:$0xff]  ;;  %v6308_v17 = vpack.c.bf16 %v130_v13, %v128_v12  ;;  %vm5833_vm4 = vcmask 1041408   ;;  %vm5853_vm5 = vcmask 1024  }
  0x85   :  { %6305 = vmatpush1.bf16.msra.mxu0 %v6304_v10  ;;  %v6311_v18 = vpack.c.bf16 %v221_v15, %v220_v14  ;;  %v223_v19 = vld [vmem:[%s9902_s3 + $0x18] sm:$0xff]  ;;  %v123_v21 = vld [vmem:[%s9899_s0] sm:$0x3]  ;;  %v225_v23 = vld [vmem:[%s9902_s3 + $0x28] sm:$0xff]  ;;  %v8078_v42 = vsub.s32 0, %v8075_v41  ;;  %v8081_v44 = vsub.s32 1, %v8075_v41 }
  0x86   :  { %6307 = vmatprep.subr.bf16.mxu0 %v6306_v11  ;;  %v6314_v20 = vpack.c.bf16 %v223_v19, %v222_v16  ;;  %v224_v22 = vld [vmem:[%s9902_s3 + $0x20] sm:$0xff]  ;;  %v226_v24 = vld [vmem:[%s9902_s3 + $0x30] sm:$0xff]  ;;  %v227_v25 = vld [vmem:[%s9902_s3 + $0x38] sm:$0xff] }
  0x87   :  { %6312 = vmatpush3.bf16.msra.mxu1 %v6311_v18  ;;  %v6317_v26 = vpack.c.bf16 %v225_v23, %v224_v22  ;;  %v228_v27 = vld [vmem:[%s9902_s3 + $0x40] sm:$0xff]  ;;  %v229_v28 = vld [vmem:[%s9902_s3 + $0x48] sm:$0xff]  ;;  %v6320_v29 = vpack.c.bf16 %v227_v25, %v226_v24  ;;  %v230_v30 = vld [vmem:[%s9902_s3 + $0x50] sm:$0xff]  ;;  %10164 = vst [vmem:[#allocation18_spill] sm:$0xff] %v8078_v42 }
  0x88   :  { %6313 = vmatprep.subr.bf16.mxu1 %v7877_v2  ;;  %v231_v31 = vld [vmem:[%s9902_s3 + $0x58] sm:$0xff]  ;;  %v6323_v32 = vpack.c.bf16 %v229_v28, %v228_v27  ;;  %v232_v33 = vld [vmem:[%s9902_s3 + $0x60] sm:$0xff]  ;;  %v233_v34 = vld [vmem:[%s9902_s3 + $0x68] sm:$0xff] }
  0x89   :  { %6309 = vmatpush1.bf16.msra.mxu0 %v6308_v17  ;;  %v6326_v35 = vpack.c.bf16 %v231_v31, %v230_v30  ;;  %v6329_v36 = vpack.c.bf16 %v233_v34, %v232_v33  ;;  %v234_v37 = vld [vmem:[%s9902_s3 + $0x70] sm:$0xff]  ;;  %v235_v38 = vld [vmem:[%s9902_s3 + $0x78] sm:$0xff]  ;;  %v132_v43 = vld [vmem:[#allocation5] sm:$0x3] }
  0x8a   :  { %v6332_v39 = vpack.c.bf16 %v235_v38, %v234_v37  ;;  %v137_v45 = vrot.slane %v132_v43, %v8078_v42  ;;  %v141_v46 = vrot.slane %v132_v43, %v8081_v44  ;;  %v315_v52 = vld [vmem:[#allocation8] sm:$0xff]  ;;  %v316_v60 = vld [vmem:[#allocation8 + $0x8] sm:$0xff]  ;;  %v321_v63 = vld [vmem:[#allocation8 + $0x30] sm:$0xff] }
  0x8b   :  { %6315 = vmatpush3.bf16.msra.mxu1 %v6314_v20  ;;  %v319_v53 = vld [vmem:[#allocation8 + $0x20] sm:$0xff]  ;;  %v5866_v54 = vcombine.high %v315_v52, %v315_v52  ;;  %v5865_v55 = vcombine.low %v315_v52, %v315_v52  ;;  %v5868_v62 = vcombine.high %v316_v60, %v316_v60  ;;  %v5878_v0 = vcombine.high %v321_v63, %v321_v63  ;;  %v5864_v1 = vld [vmem:[#allocation7] ss:$0 sm:$0xff]  ;;  %v317_v7 = vld [vmem:[#allocation8 + $0x10] sm:$0xff] }
  0x8c   :  { %5863 = vmatmul.mubr.msk.f32.vlgmr.msra.gmra.mrb[0].mxu0 %vm144_vm0, %v123_v21  ;;  %6316 = vmatprep.subr.bf16.mxu1 %v7877_v2  ;;  %v5874_v56 = vcombine.high %v319_v53, %v319_v53  ;;  %v5873_v57 = vcombine.low %v319_v53, %v319_v53  ;;  %v5867_v5 = vcombine.low %v316_v60, %v316_v60  ;;  %v323_v9 = vld [vmem:[#allocation8 + $0x40] sm:$0xff]  ;;  %v318_v17 = vld [vmem:[#allocation8 + $0x18] sm:$0xff]  ;;  %v325_v18 = vld [vmem:[#allocation8 + $0x50] sm:$0xff] }
  0x8d   :  { %5913 = vmatprep.subr.msk.bf16.mxu0 %vm715_vm2, %v5866_v54  ;;  %v717_v58 = vsel %vm715_vm2, %v5865_v55, 0  ;;  %892 = vmatprep.mubr.bf16.mxu0 %v9910_v61  ;;  %v5877_v6 = vcombine.low %v321_v63, %v321_v63  ;;  %v5870_v13 = vcombine.high %v317_v7, %v317_v7  ;;  %v5882_v14 = vcombine.high %v323_v9, %v323_v9  ;;  %v320_v25 = vld [vmem:[#allocation8 + $0x28] sm:$0xff]  ;;  %v322_v33 = vld [vmem:[#allocation8 + $0x38] sm:$0xff]  ;;  %v329_v34 = vld [vmem:[#allocation8 + $0x70] sm:$0xff] }
  0x8e   :  { %v741_v59 = vsel %vm715_vm2, %v5873_v57, 0  ;;  %861 = vmatpush1.bf16.msra.mxu0 %v717_v58  ;;  %v723_v11 = vsel %vm715_vm2, %v5867_v5, 0  ;;  %v5869_v15 = vcombine.low %v317_v7, %v317_v7  ;;  %v5881_v16 = vcombine.low %v323_v9, %v323_v9  ;;  %v324_v43 = vld [vmem:[#allocation8 + $0x48] sm:$0xff]  ;;  %v326_v52 = vld [vmem:[#allocation8 + $0x58] sm:$0xff]  ;;  %v333_v53 = vld [vmem:[#allocation8 + $0x90] sm:$0xff] }
  0x8f   :  { %6318 = vmatpush3.bf16.msra.mxu1 %v6317_v26  ;;  %5915 = vmatprep.subr.msk.bf16.mxu0 %vm715_vm2, %v5868_v62  ;;  %v753_v12 = vsel %vm715_vm2, %v5877_v6, 0  ;;  %v5872_v21 = vcombine.high %v318_v17, %v318_v17  ;;  %v5886_v22 = vcombine.high %v325_v18, %v325_v18  ;;  %v5871_v23 = vcombine.low %v318_v17, %v318_v17  ;;  %v327_v26 = vld [vmem:[#allocation8 + $0x60] sm:$0xff]  ;;  %v328_v60 = vld [vmem:[#allocation8 + $0x68] sm:$0xff]  ;;  %v330_v5 = vld [vmem:[#allocation8 + $0x78] sm:$0xff] }
  0x90   :  { %6319 = vmatprep.subr.bf16.mxu1 %v7877_v2  ;;  %v729_v19 = vsel %vm715_vm2, %v5869_v15, 0  ;;  %v765_v20 = vsel %vm715_vm2, %v5881_v16, 0  ;;  %v5885_v24 = vcombine.low %v325_v18, %v325_v18  ;;  %v5890_v30 = vcombine.high %v327_v26, %v327_v26  ;;  %v335_v62 = vld [vmem:[#allocation8 + $0xa0] sm:$0xff]  ;;  %v337_v6 = vld [vmem:[#allocation8 + $0xb0] sm:$0xff] }
  0x91   :  { %v735_v27 = vsel %vm715_vm2, %v5871_v23, 0  ;;  %v5875_v31 = vcombine.low %v320_v25, %v320_v25  ;;  %v5880_v37 = vcombine.high %v322_v33, %v322_v33  ;;  %v5894_v38 = vcombine.high %v329_v34, %v329_v34  ;;  %v6618_v18 = vld [vmem:[#allocation11 + $0x4] ss:$48 sps:$4 sm:$0xff]  }
  0x92   :  { %v777_v28 = vsel %vm715_vm2, %v5885_v24, 0  ;;  %v5893_v40 = vcombine.low %v329_v34, %v329_v34  ;;  %v5902_v57 = vcombine.high %v333_v53, %v333_v53  ;;  %v5887_v58 = vcombine.low %v326_v52, %v326_v52  ;;  %v6622_v23 = vld [vmem:[#allocation11 + $0x64] ss:$48 sps:$4 sm:$0xff]  }
  0x93   :  { %6321 = vmatpush3.bf16.msra.mxu1 %v6320_v29  ;;  %v5876_v29 = vcombine.high %v320_v25, %v320_v25  ;;  %v5896_v9 = vcombine.high %v330_v5, %v330_v5  ;;  %v6624_v25 = vld [vmem:[#allocation11 + $0x60] ss:$48 sps:$4 sm:$0xff]   ;;  %v6634_v34 = vld [vmem:[#allocation11 + $0x184] ss:$48 sps:$4 sm:$0xff]  }
  0x94   :  { %6322 = vmatprep.subr.bf16.mxu1 %v7877_v2  ;;  %v783_v63 = vsel %vm715_vm2, %v5887_v58, 0  ;;  %v6660_v58 = vld [vmem:[#allocation11 + $0x660] ss:$48 sps:$4 sm:$0xff]  }
  0x97   :  { %6324 = vmatpush3.bf16.msra.mxu1 %v6323_v32  ;;  %v5889_v32 = vcombine.low %v327_v26, %v327_v26  ;;  %v6626_v26 = vld [vmem:[#allocation11 + $0xc4] ss:$48 sps:$4 sm:$0xff]  }
  0x98   :  { %6325 = vmatprep.subr.bf16.mxu1 %v7877_v2 }
  0x9b   :  { %6327 = vmatpush3.bf16.msra.mxu1 %v6326_v35  ;;  %v747_v35 = vsel %vm715_vm2, %v5875_v31, 0  ;;  %v6630_v31 = vld [vmem:[#allocation11 + $0x124] ss:$48 sps:$4 sm:$0xff]  }
  0x9c   :  { %6328 = vmatprep.subr.bf16.mxu1 %v7877_v2 }
  0x9f   :  { %6330 = vmatpush3.bf16.msra.mxu1 %v6329_v36  ;;  %v789_v36 = vsel %vm715_vm2, %v5889_v32, 0 }
  0xa0   :  { %6331 = vmatprep.subr.bf16.mxu1 %v7877_v2 }
  0xa3   :  { %6333 = vmatpush3.bf16.msra.mxu1 %v6332_v39  ;;  %v5879_v39 = vcombine.low %v322_v33, %v322_v33  ;;  %v6632_v33 = vld [vmem:[#allocation11 + $0x120] ss:$48 sps:$4 sm:$0xff]  }
  0xa4   :  { %5921 = vmatprep.subr.msk.bf16.mxu1 %vm715_vm2, %v5874_v56  ;;  %v5888_v56 = vcombine.high %v326_v52, %v326_v52  ;;  %v6649_v52 = vld [vmem:[#allocation11 + $0x304] ss:$48 sps:$4 sm:$0xff]  }
 0x15f   :  { %v214_v47 = vpop.f32.mrb[0].mxu0 }
 0x160   :  { %v215_v48 = vadd.f32 %v214_v47, %v137_v45  ;;  %v216_v49 = vpop.f32.mrb[1].mxu0  ;;  %v331_v45 = vld [vmem:[#allocation8 + $0x80] sm:$0xff]  ;;  %v801_v47 = vsel %vm715_vm2, %v5893_v40, 0 }
 0x161   :  { %v217_v50 = vadd.f32 %v216_v49, %v141_v46  ;;  %v759_v46 = vsel %vm715_vm2, %v5879_v39, 0  ;;  %v5898_v49 = vcombine.high %v331_v45, %v331_v45  ;;  %v6638_v39 = vld [vmem:[#allocation11 + $0x1e4] ss:$48 sps:$4 sm:$0xff]  }
 0x163   :  { %v219_v51 = vmax.f32 %v215_v48, %v217_v50  ;;  %v5884_v48 = vcombine.high %v324_v43, %v324_v43  ;;  %v5883_v50 = vcombine.low %v324_v43, %v324_v43  ;;  %v6640_v43 = vld [vmem:[#allocation11 + $0x1e0] ss:$48 sps:$4 sm:$0xff]  }
 0x165   :  { %6300 = vmatmul.mubr.f32.vlgmr.msra.gmra.mrb[0].mxu1 %v219_v51  ;;  %v5897_v51 = vcombine.low %v331_v45, %v331_v45  ;;  %v771_v54 = vsel %vm715_vm2, %v5883_v50, 0  ;;  %v6642_v45 = vld [vmem:[#allocation11 + $0x244] ss:$48 sps:$4 sm:$0xff]  }
 0x166   :  { %1025 = vmatpush1.bf16.msra.mxu1 %v741_v59  ;;  %1056 = vmatprep.mubr.bf16.mxu1 %v9910_v61  ;;  %v5901_v59 = vcombine.low %v333_v53, %v333_v53  ;;  %v6651_v50 = vld [vmem:[#allocation11 + $0x604] ss:$48 sps:$4 sm:$0xff]   ;;  %v6653_v53 = vld [vmem:[#allocation11 + $0x300] ss:$48 sps:$4 sm:$0xff]  }
 0x167   :  { %5925 = vmatprep.subr.msk.bf16.mxu1 %vm715_vm2, %v5878_v0  ;;  %v813_v55 = vsel %vm715_vm2, %v5897_v51, 0  ;;  %v6648_v51 = vld [vmem:[#allocation11 + $0x2a0] ss:$48 sps:$4 sm:$0xff]  }
 0x168   :  { %v825_v0 = vsel %vm715_vm2, %v5901_v59, 0  ;;  %v6661_v59 = vld [vmem:[#allocation11 + $0x3c4] ss:$48 sps:$4 sm:$0xff]  }
 0x238   :  { %v309_v2 = vpop.f32.mrb[0].mxu1 }
 0x239   :  { %v310_v3 = vadd.f32 %v5864_v1, %v309_v2  ;;  %v6301_v4 = vpop.f32.mrb[1].mxu1  ;;  %v5892_v1 = vcombine.high %v328_v60, %v328_v60  ;;  %v5906_v2 = vcombine.high %v335_v62, %v335_v62 }
 0x23a   :  { %v5905_v4 = vcombine.low %v335_v62, %v335_v62  ;;  %v6665_v62 = vld [vmem:[#allocation11 + $0x3c0] ss:$48 sps:$4 sm:$0xff]  }
 0x23b   :  { %v313_v8 = vmax.f32 %v310_v3, 0.0  ;;  %v5891_v3 = vcombine.low %v328_v60, %v328_v60  ;;  %v6663_v60 = vld [vmem:[#allocation11 + $0x6c4] ss:$48 sps:$4 sm:$0xff]  }
 0x23d   :  { %v8093_v10 = vpack.c.bf16 %v313_v8, %v313_v8  ;;  %v795_v7 = vsel %vm715_vm2, %v5891_v3, 0  ;;  %v837_v8 = vsel %vm715_vm2, %v5905_v4, 0  ;;  %v6673_v3 = vld [vmem:[#allocation11 + $0x484] ss:$48 sps:$4 sm:$0xff]  }
 0x23e   :  { %v6675_v4 = vld [vmem:[#allocation11 + $0x784] ss:$48 sps:$4 sm:$0xff]  }
 0x23f   :  { %5914 = vmatmul.mubr.msk.bf16.vlgmr.msra.gmra.mrb[4].mxu0 %vm711_vm3, %v8093_v10  ;;  %5922 = vmatmul.mubr.msk.bf16.vlgmr.msra.gmra.mrb[4].mxu1 %vm711_vm3, %v8093_v10 }
 0x240   :  { %902 = vmatpush1.bf16.msra.mxu0 %v723_v11  ;;  %1107 = vmatpush1.bf16.msra.mxu1 %v753_v12  ;;  %v5910_v11 = vcombine.high %v337_v6, %v337_v6  ;;  %v5895_v12 = vcombine.low %v330_v5, %v330_v5  ;;  %v6677_v5 = vld [vmem:[#allocation11 + $0x480] ss:$48 sps:$4 sm:$0xff]  }
 0x241   :  { %933 = vmatprep.mubr.bf16.mxu0 %v9910_v61  ;;  %5917 = vmatprep.subr.msk.bf16.mxu0 %vm715_vm2, %v5870_v13  ;;  %v5909_v13 = vcombine.low %v337_v6, %v337_v6  ;;  %v6678_v6 = vld [vmem:[#allocation11 + $0x780] ss:$48 sps:$4 sm:$0xff]  }
 0x242   :  { %1138 = vmatprep.mubr.bf16.mxu1 %v9910_v61  ;;  %5929 = vmatprep.subr.msk.bf16.mxu1 %vm715_vm2, %v5882_v14  ;;  %v332_v14 = vld [vmem:[#allocation8 + $0x88] sm:$0xff]  ;;  %v807_v15 = vsel %vm715_vm2, %v5895_v12, 0  ;;  %v6685_v12 = vld [vmem:[#allocation11 + $0x544] ss:$48 sps:$4 sm:$0xff]  }
 0x243   :  { %v849_v16 = vsel %vm715_vm2, %v5909_v13, 0  ;;  %v5900_v17 = vcombine.high %v332_v14, %v332_v14  ;;  %v6687_v13 = vld [vmem:[#allocation11 + $0x844] ss:$48 sps:$4 sm:$0xff]  }
 0x247   :  { %5916 = vmatmul.mubr.msk.bf16.vlgmr.msra.gmra.mrb[8].mxu0 %vm711_vm3, %v8093_v10  ;;  %5926 = vmatmul.mubr.msk.bf16.vlgmr.msra.gmra.mrb[8].mxu1 %vm711_vm3, %v8093_v10 }
 0x248   :  { %943 = vmatpush1.bf16.msra.mxu0 %v729_v19  ;;  %1189 = vmatpush1.bf16.msra.mxu1 %v765_v20  ;;  %v5899_v19 = vcombine.low %v332_v14, %v332_v14  ;;  %v334_v20 = vld [vmem:[#allocation8 + $0x98] sm:$0xff]  ;;  %v6689_v14 = vld [vmem:[#allocation11 + $0x540] ss:$48 sps:$4 sm:$0xff]  }
 0x249   :  { %974 = vmatprep.mubr.bf16.mxu0 %v9910_v61  ;;  %5919 = vmatprep.subr.msk.bf16.mxu0 %vm715_vm2, %v5872_v21  ;;  %v6621_v21 = vld [vmem:[#allocation11] ss:$48 sps:$4 sm:$0xff]   ;;  %v5904_v24 = vcombine.high %v334_v20, %v334_v20 }
 0x24a   :  { %1220 = vmatprep.mubr.bf16.mxu1 %v9910_v61  ;;  %5933 = vmatprep.subr.msk.bf16.mxu1 %vm715_vm2, %v5886_v22  ;;  %v819_v22 = vsel %vm715_vm2, %v5899_v19, 0  ;;  %v6696_v19 = vld [vmem:[#allocation11 + $0x8a0] ss:$48 sps:$4 sm:$0xff]  }
 0x24f   :  { %5918 = vmatmul.mubr.msk.bf16.vlgmr.msra.gmra.mrb[12].mxu0 %vm711_vm3, %v8093_v10  ;;  %5930 = vmatmul.mubr.msk.bf16.vlgmr.msra.gmra.mrb[12].mxu1 %vm711_vm3, %v8093_v10 }
 0x250   :  { %984 = vmatpush1.bf16.msra.mxu0 %v735_v27  ;;  %1271 = vmatpush1.bf16.msra.mxu1 %v777_v28  ;;  %v5903_v27 = vcombine.low %v334_v20, %v334_v20  ;;  %v336_v28 = vld [vmem:[#allocation8 + $0xa8] sm:$0xff] }
 0x251   :  { %1015 = vmatprep.mubr.bf16.mxu0 %v9910_v61  ;;  %5923 = vmatprep.subr.msk.bf16.mxu0 %vm715_vm2, %v5876_v29  ;;  %v6629_v29 = vld [vmem:[#allocation11 + $0xc0] ss:$48 sps:$4 sm:$0xff]   ;;  %v5908_v32 = vcombine.high %v336_v28, %v336_v28  ;;  %v6697_v20 = vld [vmem:[#allocation11 + $0xc] ss:$48 sps:$4 sm:$0xff]  }
 0x252   :  { %1302 = vmatprep.mubr.bf16.mxu1 %v9910_v61  ;;  %5937 = vmatprep.subr.msk.bf16.mxu1 %vm715_vm2, %v5890_v30  ;;  %v831_v30 = vsel %vm715_vm2, %v5903_v27, 0  ;;  %v6708_v27 = vld [vmem:[#allocation11 + $0x668] ss:$48 sps:$4 sm:$0xff]  }
 0x257   :  { %5920 = vmatmul.mubr.msk.bf16.vlgmr.msra.gmra.mrb[16].mxu0 %vm711_vm3, %v8093_v10  ;;  %5934 = vmatmul.mubr.msk.bf16.vlgmr.msra.gmra.mrb[16].mxu1 %vm711_vm3, %v8093_v10 }
 0x258   :  { %1066 = vmatpush1.bf16.msra.mxu0 %v747_v35  ;;  %1353 = vmatpush1.bf16.msra.mxu1 %v789_v36  ;;  %v5907_v35 = vcombine.low %v336_v28, %v336_v28  ;;  %v338_v36 = vld [vmem:[#allocation8 + $0xb8] sm:$0xff] }
 0x259   :  { %1097 = vmatprep.mubr.bf16.mxu0 %v9910_v61  ;;  %5927 = vmatprep.subr.msk.bf16.mxu0 %vm715_vm2, %v5880_v37  ;;  %v6637_v37 = vld [vmem:[#allocation11 + $0x180] ss:$48 sps:$4 sm:$0xff]   ;;  %v5912_v40 = vcombine.high %v338_v36, %v338_v36  ;;  %v6709_v28 = vld [vmem:[#allocation11 + $0xcc] ss:$48 sps:$4 sm:$0xff]  }
 0x25a   :  { %1384 = vmatprep.mubr.bf16.mxu1 %v9910_v61  ;;  %5941 = vmatprep.subr.msk.bf16.mxu1 %vm715_vm2, %v5894_v38  ;;  %v843_v38 = vsel %vm715_vm2, %v5907_v35, 0  ;;  %v6720_v35 = vld [vmem:[#allocation11 + $0x728] ss:$48 sps:$4 sm:$0xff]  }
 0x25f   :  { %5924 = vmatmul.mubr.msk.bf16.vlgmr.msra.gmra.mrb[20].mxu0 %vm711_vm3, %v8093_v10  ;;  %5938 = vmatmul.mubr.msk.bf16.vlgmr.msra.gmra.mrb[20].mxu1 %vm711_vm3, %v8093_v10 }
 0x260   :  { %1148 = vmatpush1.bf16.msra.mxu0 %v759_v46  ;;  %1435 = vmatpush1.bf16.msra.mxu1 %v801_v47  ;;  %v5911_v46 = vcombine.low %v338_v36, %v338_v36  ;;  %v6645_v47 = vld [vmem:[#allocation11 + $0x240] ss:$48 sps:$4 sm:$0xff]   ;;  %v6721_v36 = vld [vmem:[#allocation11 + $0x18c] ss:$48 sps:$4 sm:$0xff]  }
 0x261   :  { %1179 = vmatprep.mubr.bf16.mxu0 %v9910_v61  ;;  %5931 = vmatprep.subr.msk.bf16.mxu0 %vm715_vm2, %v5884_v48 }
 0x262   :  { %1466 = vmatprep.mubr.bf16.mxu1 %v9910_v61  ;;  %5945 = vmatprep.subr.msk.bf16.mxu1 %vm715_vm2, %v5898_v49  ;;  %v855_v48 = vsel %vm715_vm2, %v5911_v46, 0  ;;  %v6646_v49 = vld [vmem:[#allocation11 + $0x2a4] ss:$48 sps:$4 sm:$0xff]   ;;  %v6732_v46 = vld [vmem:[#allocation11 + $0x7e8] ss:$48 sps:$4 sm:$0xff]  }
 0x267   :  { %5928 = vmatmul.mubr.msk.bf16.vlgmr.msra.gmra.mrb[24].mxu0 %vm711_vm3, %v8093_v10  ;;  %5942 = vmatmul.mubr.msk.bf16.vlgmr.msra.gmra.mrb[24].mxu1 %vm711_vm3, %v8093_v10 }
 0x268   :  { %1230 = vmatpush1.bf16.msra.mxu0 %v771_v54  ;;  %1517 = vmatpush1.bf16.msra.mxu1 %v813_v55  ;;  %v6654_v54 = vld [vmem:[#allocation11 + $0x600] ss:$48 sps:$4 sm:$0xff]   ;;  %v6655_v55 = vld [vmem:[#allocation11 + $0x364] ss:$48 sps:$4 sm:$0xff]  }
 0x269   :  { %1261 = vmatprep.mubr.bf16.mxu0 %v9910_v61  ;;  %5935 = vmatprep.subr.msk.bf16.mxu0 %vm715_vm2, %v5888_v56  ;;  %v6657_v56 = vld [vmem:[#allocation11 + $0x664] ss:$48 sps:$4 sm:$0xff]  }
 0x26a   :  { %1548 = vmatprep.mubr.bf16.mxu1 %v9910_v61  ;;  %5949 = vmatprep.subr.msk.bf16.mxu1 %vm715_vm2, %v5902_v57  ;;  %v6659_v57 = vld [vmem:[#allocation11 + $0x360] ss:$48 sps:$4 sm:$0xff]  }
 0x26f   :  { %5932 = vmatmul.mubr.msk.bf16.vlgmr.msra.gmra.mrb[28].mxu0 %vm711_vm3, %v8093_v10  ;;  %5946 = vmatmul.mubr.msk.bf16.vlgmr.msra.gmra.mrb[28].mxu1 %vm711_vm3, %v8093_v10 }
 0x270   :  { %1312 = vmatpush1.bf16.msra.mxu0 %v783_v63  ;;  %1599 = vmatpush1.bf16.msra.mxu1 %v825_v0  ;;  %v6666_v63 = vld [vmem:[#allocation11 + $0x6c0] ss:$48 sps:$4 sm:$0xff]   ;;  %v6667_v0 = vld [vmem:[#allocation11 + $0x424] ss:$48 sps:$4 sm:$0xff]  }
 0x271   :  { %1343 = vmatprep.mubr.bf16.mxu0 %v9910_v61  ;;  %5939 = vmatprep.subr.msk.bf16.mxu0 %vm715_vm2, %v5892_v1  ;;  %v6669_v1 = vld [vmem:[#allocation11 + $0x724] ss:$48 sps:$4 sm:$0xff]  }
 0x272   :  { %1630 = vmatprep.mubr.bf16.mxu1 %v9910_v61  ;;  %5953 = vmatprep.subr.msk.bf16.mxu1 %vm715_vm2, %v5906_v2  ;;  %v6672_v2 = vld [vmem:[#allocation11 + $0x720] ss:$48 sps:$4 sm:$0xff]  }
 0x277   :  { %5936 = vmatmul.mubr.msk.bf16.vlgmr.msra.gmra.mrb[32].mxu0 %vm711_vm3, %v8093_v10  ;;  %5950 = vmatmul.mubr.msk.bf16.vlgmr.msra.gmra.mrb[32].mxu1 %vm711_vm3, %v8093_v10 }
 0x278   :  { %1394 = vmatpush1.bf16.msra.mxu0 %v795_v7  ;;  %1681 = vmatpush1.bf16.msra.mxu1 %v837_v8  ;;  %v6679_v7 = vld [vmem:[#allocation11 + $0x4e4] ss:$48 sps:$4 sm:$0xff]  }
 0x279   :  { %1425 = vmatprep.mubr.bf16.mxu0 %v9910_v61  ;;  %5943 = vmatprep.subr.msk.bf16.mxu0 %vm715_vm2, %v5896_v9  ;;  %v6681_v8 = vld [vmem:[#allocation11 + $0x7e4] ss:$48 sps:$4 sm:$0xff]   ;;  %v6683_v9 = vld [vmem:[#allocation11 + $0x4e0] ss:$48 sps:$4 sm:$0xff]  }
 0x27a   :  { %1712 = vmatprep.mubr.bf16.mxu1 %v9910_v61  ;;  %5957 = vmatprep.subr.msk.bf16.mxu1 %vm715_vm2, %v5910_v11  ;;  %v6684_v11 = vld [vmem:[#allocation11 + $0x7e0] ss:$48 sps:$4 sm:$0xff]  }
 0x27f   :  { %5940 = vmatmul.mubr.msk.bf16.vlgmr.msra.gmra.mrb[36].mxu0 %vm711_vm3, %v8093_v10  ;;  %5954 = vmatmul.mubr.msk.bf16.vlgmr.msra.gmra.mrb[36].mxu1 %vm711_vm3, %v8093_v10 }
 0x280   :  { %1476 = vmatpush1.bf16.msra.mxu0 %v807_v15  ;;  %1763 = vmatpush1.bf16.msra.mxu1 %v849_v16  ;;  %v6690_v15 = vld [vmem:[#allocation11 + $0x840] ss:$48 sps:$4 sm:$0xff]   ;;  %v6691_v16 = vld [vmem:[#allocation11 + $0x5a4] ss:$48 sps:$4 sm:$0xff]  }
 0x281   :  { %1507 = vmatprep.mubr.bf16.mxu0 %v9910_v61  ;;  %5947 = vmatprep.subr.msk.bf16.mxu0 %vm715_vm2, %v5900_v17  ;;  %v6693_v17 = vld [vmem:[#allocation11 + $0x8a4] ss:$48 sps:$4 sm:$0xff]  }
 0x282   :  { %1794 = vmatprep.mubr.bf16.mxu1 %v9910_v61  ;;  %3572 = vmatprep.subr.bf16.mxu1 %v6618_v18  ;;  %v6695_v18 = vld [vmem:[#allocation11 + $0x5a0] ss:$48 sps:$4 sm:$0xff]  }
 0x287   :  { %5944 = vmatmul.mubr.msk.bf16.vlgmr.msra.gmra.mrb[40].mxu0 %vm711_vm3, %v8093_v10  ;;  %5958 = vmatmul.mubr.msk.bf16.vlgmr.msra.gmra.mrb[40].mxu1 %vm711_vm3, %v8093_v10 }
 0x288   :  { %1558 = vmatpush1.bf16.msra.mxu0 %v819_v22  ;;  %3573 = vmatpush1.bf16.msra.mxu1 %v6621_v21  ;;  %v6699_v21 = vld [vmem:[#allocation11 + $0x60c] ss:$48 sps:$4 sm:$0xff]   ;;  %v6701_v22 = vld [vmem:[#allocation11 + $0x8] ss:$48 sps:$4 sm:$0xff]  }
 0x289   :  { %3574 = vmatprep.subr.bf16.mxu1 %v6622_v23  ;;  %1589 = vmatprep.mubr.bf16.mxu0 %v9910_v61  ;;  %v6702_v23 = vld [vmem:[#allocation11 + $0x608] ss:$48 sps:$4 sm:$0xff]  }
 0x28a   :  { %5951 = vmatprep.subr.msk.bf16.mxu0 %vm715_vm2, %v5904_v24  ;;  %3604 = vmatprep.mubr.bf16.mxu1 %v9910_v61  ;;  %v6703_v24 = vld [vmem:[#allocation11 + $0x6c] ss:$48 sps:$4 sm:$0xff]  }
 0x28c   :  { %3575 = vmatpush1.bf16.msra.mxu1 %v6624_v25  ;;  %v6705_v25 = vld [vmem:[#allocation11 + $0x66c] ss:$48 sps:$4 sm:$0xff]  }
 0x28d   :  { %3576 = vmatprep.subr.bf16.mxu1 %v6626_v26  ;;  %v6707_v26 = vld [vmem:[#allocation11 + $0x68] ss:$48 sps:$4 sm:$0xff]  }
 0x28f   :  { %5948 = vmatmul.mubr.msk.bf16.vlgmr.msra.gmra.mrb[44].mxu0 %vm711_vm3, %v8093_v10 }
 0x290   :  { %1640 = vmatpush1.bf16.msra.mxu0 %v831_v30  ;;  %3577 = vmatpush1.bf16.msra.mxu1 %v6629_v29  ;;  %v6711_v29 = vld [vmem:[#allocation11 + $0x6cc] ss:$48 sps:$4 sm:$0xff]   ;;  %v6713_v30 = vld [vmem:[#allocation11 + $0xc8] ss:$48 sps:$4 sm:$0xff]  }
 0x291   :  { %3578 = vmatprep.subr.bf16.mxu1 %v6630_v31  ;;  %1671 = vmatprep.mubr.bf16.mxu0 %v9910_v61  ;;  %v6714_v31 = vld [vmem:[#allocation11 + $0x6c8] ss:$48 sps:$4 sm:$0xff]  }
 0x292   :  { %5955 = vmatprep.subr.msk.bf16.mxu0 %vm715_vm2, %v5908_v32  ;;  %v6715_v32 = vld [vmem:[#allocation11 + $0x12c] ss:$48 sps:$4 sm:$0xff]  }
 0x294   :  { %3579 = vmatpush1.bf16.msra.mxu1 %v6632_v33  ;;  %v6717_v33 = vld [vmem:[#allocation11 + $0x72c] ss:$48 sps:$4 sm:$0xff]  }
 0x295   :  { %3580 = vmatprep.subr.bf16.mxu1 %v6634_v34  ;;  %v6719_v34 = vld [vmem:[#allocation11 + $0x128] ss:$48 sps:$4 sm:$0xff]  }
 0x297   :  { %5952 = vmatmul.mubr.msk.bf16.vlgmr.msra.gmra.mrb[48].mxu0 %vm711_vm3, %v8093_v10 }
 0x298   :  { %1722 = vmatpush1.bf16.msra.mxu0 %v843_v38  ;;  %3581 = vmatpush1.bf16.msra.mxu1 %v6637_v37  ;;  %v6723_v37 = vld [vmem:[#allocation11 + $0x78c] ss:$48 sps:$4 sm:$0xff]   ;;  %v6725_v38 = vld [vmem:[#allocation11 + $0x188] ss:$48 sps:$4 sm:$0xff]  }
 0x299   :  { %3582 = vmatprep.subr.bf16.mxu1 %v6638_v39  ;;  %1753 = vmatprep.mubr.bf16.mxu0 %v9910_v61  ;;  %v6726_v39 = vld [vmem:[#allocation11 + $0x788] ss:$48 sps:$4 sm:$0xff]  }
 0x29a   :  { %5959 = vmatprep.subr.msk.bf16.mxu0 %vm715_vm2, %v5912_v40  ;;  %v6727_v40 = vld [vmem:[#allocation11 + $0x1ec] ss:$48 sps:$4 sm:$0xff]  }
 0x29c   :  { %3583 = vmatpush1.bf16.msra.mxu1 %v6640_v43  ;;  %v6729_v43 = vld [vmem:[#allocation11 + $0x7ec] ss:$48 sps:$4 sm:$0xff]  }
 0x29d   :  { %3584 = vmatprep.subr.bf16.mxu1 %v6642_v45  ;;  %v6731_v45 = vld [vmem:[#allocation11 + $0x1e8] ss:$48 sps:$4 sm:$0xff]  }
 0x29f   :  { %5956 = vmatmul.mubr.msk.bf16.vlgmr.msra.gmra.mrb[52].mxu0 %vm711_vm3, %v8093_v10 }
 0x2a0   :  { %1804 = vmatpush1.bf16.msra.mxu0 %v855_v48  ;;  %3585 = vmatpush1.bf16.msra.mxu1 %v6645_v47  ;;  %v6733_v47 = vld [vmem:[#allocation11 + $0x24c] ss:$48 sps:$4 sm:$0xff]  }
 0x2a1   :  { %3586 = vmatprep.subr.bf16.mxu1 %v6646_v49  ;;  %1835 = vmatprep.mubr.bf16.mxu0 %v9910_v61  ;;  %v6735_v48 = vld [vmem:[#allocation11 + $0x84c] ss:$48 sps:$4 sm:$0xff]   ;;  %v6737_v49 = vld [vmem:[#allocation11 + $0x248] ss:$48 sps:$4 sm:$0xff]  }
 0x2a2   :  { %3613 = vmatprep.subr.bf16.mxu0 %v6651_v50  ;;  %v6738_v50 = vld [vmem:[#allocation11 + $0x848] ss:$48 sps:$4 sm:$0xff]  }
 0x2a4   :  { %3587 = vmatpush1.bf16.msra.mxu1 %v6648_v51  ;;  %v6739_v51 = vld [vmem:[#allocation11 + $0x2ac] ss:$48 sps:$4 sm:$0xff]  }
 0x2a5   :  { %3588 = vmatprep.subr.bf16.mxu1 %v6649_v52  ;;  %v6741_v52 = vld [vmem:[#allocation11 + $0x8ac] ss:$48 sps:$4 sm:$0xff]  }
 0x2a7   :  { %5960 = vmatmul.mubr.msk.bf16.vlgmr.msra.gmra.mrb[56].mxu0 %vm711_vm3, %v8093_v10  ;;  %v6671_v10 = vld [vmem:[#allocation11 + $0x420] ss:$48 sps:$4 sm:$0xff]  }
 0x2a8   :  { %3589 = vmatpush1.bf16.msra.mxu1 %v6653_v53  ;;  %3614 = vmatpush1.bf16.msra.mxu0 %v6654_v54  ;;  %v6743_v53 = vld [vmem:[#allocation11 + $0x2a8] ss:$48 sps:$4 sm:$0xff]  }
 0x2a9   :  { %3590 = vmatprep.subr.bf16.mxu1 %v6655_v55  ;;  %3615 = vmatprep.subr.bf16.mxu0 %v6657_v56  ;;  %v6744_v54 = vld [vmem:[#allocation11 + $0x8a8] ss:$48 sps:$4 sm:$0xff]   ;;  %v6745_v55 = vld [vmem:[#allocation11 + $0x30c] ss:$48 sps:$4 sm:$0xff]   ;;  %v6747_v56 = vld [vmem:[#allocation11 + $0x614] ss:$48 sps:$4 sm:$0xff]  }
 0x2aa   :  { %3645 = vmatprep.mubr.bf16.mxu0 %v9910_v61 }
 0x2ac   :  { %3591 = vmatpush1.bf16.msra.mxu1 %v6659_v57  ;;  %3616 = vmatpush1.bf16.msra.mxu0 %v6660_v58  ;;  %v6749_v57 = vld [vmem:[#allocation11 + $0x308] ss:$48 sps:$4 sm:$0xff]   ;;  %v6750_v58 = vld [vmem:[#allocation11 + $0x610] ss:$48 sps:$4 sm:$0xff]  }
 0x2ad   :  { %3592 = vmatprep.subr.bf16.mxu1 %v6661_v59  ;;  %3617 = vmatprep.subr.bf16.mxu0 %v6663_v60  ;;  %v6751_v59 = vld [vmem:[#allocation11 + $0x36c] ss:$48 sps:$4 sm:$0xff]   ;;  %v6753_v60 = vld [vmem:[#allocation11 + $0x674] ss:$48 sps:$4 sm:$0xff]  }
 0x2b0   :  { %3593 = vmatpush1.bf16.msra.mxu1 %v6665_v62  ;;  %3618 = vmatpush1.bf16.msra.mxu0 %v6666_v63  ;;  %v6755_v62 = vld [vmem:[#allocation11 + $0x368] ss:$48 sps:$4 sm:$0xff]   ;;  %v6756_v63 = vld [vmem:[#allocation11 + $0x670] ss:$48 sps:$4 sm:$0xff]  }
 0x2b1   :  { %3594 = vmatprep.subr.bf16.mxu1 %v6667_v0  ;;  %3619 = vmatprep.subr.bf16.mxu0 %v6669_v1  ;;  %v6757_v0 = vld [vmem:[#allocation11 + $0x3cc] ss:$48 sps:$4 sm:$0xff]   ;;  %v6759_v1 = vld [vmem:[#allocation11 + $0x6d4] ss:$48 sps:$4 sm:$0xff]  }
 0x2b4   :  { %3595 = vmatpush1.bf16.msra.mxu1 %v6671_v10  ;;  %3620 = vmatpush1.bf16.msra.mxu0 %v6672_v2  ;;  %v6761_v10 = vld [vmem:[#allocation11 + $0x3c8] ss:$48 sps:$4 sm:$0xff]   ;;  %v6762_v2 = vld [vmem:[#allocation11 + $0x6d0] ss:$48 sps:$4 sm:$0xff]  }
 0x2b5   :  { %3596 = vmatprep.subr.bf16.mxu1 %v6673_v3  ;;  %3621 = vmatprep.subr.bf16.mxu0 %v6675_v4  ;;  %v6763_v3 = vld [vmem:[#allocation11 + $0x42c] ss:$48 sps:$4 sm:$0xff]   ;;  %v6765_v4 = vld [vmem:[#allocation11 + $0x734] ss:$48 sps:$4 sm:$0xff]  }
 0x2b8   :  { %3597 = vmatpush1.bf16.msra.mxu1 %v6677_v5  ;;  %3622 = vmatpush1.bf16.msra.mxu0 %v6678_v6  ;;  %v6767_v5 = vld [vmem:[#allocation11 + $0x428] ss:$48 sps:$4 sm:$0xff]   ;;  %v6768_v6 = vld [vmem:[#allocation11 + $0x730] ss:$48 sps:$4 sm:$0xff]  }
 0x2b9   :  { %3598 = vmatprep.subr.bf16.mxu1 %v6679_v7  ;;  %3623 = vmatprep.subr.bf16.mxu0 %v6681_v8  ;;  %v8215_v7 = vld [vmem:[#allocation11 + $0x48c] ss:$48 sps:$4 sm:$0xff]   ;;  %v6771_v8 = vld [vmem:[#allocation11 + $0x794] ss:$48 sps:$4 sm:$0xff]  }
 0x2bc   :  { %3599 = vmatpush1.bf16.msra.mxu1 %v6683_v9  ;;  %3624 = vmatpush1.bf16.msra.mxu0 %v6684_v11  ;;  %v8217_v9 = vld [vmem:[#allocation11 + $0x488] ss:$48 sps:$4 sm:$0xff]   ;;  %v6774_v11 = vld [vmem:[#allocation11 + $0x790] ss:$48 sps:$4 sm:$0xff]  }
 0x2bd   :  { %3600 = vmatprep.subr.bf16.mxu1 %v6685_v12  ;;  %3625 = vmatprep.subr.bf16.mxu0 %v6687_v13  ;;  %v8220_v12 = vld [vmem:[#allocation11 + $0x4ec] ss:$48 sps:$4 sm:$0xff]   ;;  %v6777_v13 = vld [vmem:[#allocation11 + $0x7f4] ss:$48 sps:$4 sm:$0xff]  }
 0x2c0   :  { %3601 = vmatpush1.bf16.msra.mxu1 %v6689_v14  ;;  %3626 = vmatpush1.bf16.msra.mxu0 %v6690_v15  ;;  %v8223_v14 = vld [vmem:[#allocation11 + $0x4e8] ss:$48 sps:$4 sm:$0xff]   ;;  %v6780_v15 = vld [vmem:[#allocation11 + $0x7f0] ss:$48 sps:$4 sm:$0xff]  }
 0x2c1   :  { %3602 = vmatprep.subr.bf16.mxu1 %v6691_v16  ;;  %3627 = vmatprep.subr.bf16.mxu0 %v6693_v17  ;;  %v8226_v16 = vld [vmem:[#allocation11 + $0x54c] ss:$48 sps:$4 sm:$0xff]   ;;  %v6783_v17 = vld [vmem:[#allocation11 + $0x854] ss:$48 sps:$4 sm:$0xff]  }
 0x2c4   :  { %3603 = vmatpush1.bf16.msra.mxu1 %v6695_v18  ;;  %3628 = vmatpush1.bf16.msra.mxu0 %v6696_v19  ;;  %v8229_v18 = vld [vmem:[#allocation11 + $0x548] ss:$48 sps:$4 sm:$0xff]   ;;  %v6786_v19 = vld [vmem:[#allocation11 + $0x850] ss:$48 sps:$4 sm:$0xff]  }
 0x2c5   :  { %3654 = vmatprep.subr.bf16.mxu1 %v6697_v20  ;;  %3695 = vmatprep.subr.bf16.mxu0 %v6699_v21  ;;  %v8232_v20 = vld [vmem:[#allocation11 + $0x5ac] ss:$48 sps:$4 sm:$0xff]   ;;  %v6789_v21 = vld [vmem:[#allocation11 + $0x8b4] ss:$48 sps:$4 sm:$0xff]  }
 0x2c7   :  { %3605 = vmatmul.mubr.bf16.vlgmr.msra.gmra.mrb[44].mxu1 %v9910_v61  ;;  %3646 = vmatmul.mubr.bf16.vlgmr.msra.gmra.mrb[60].mxu0 %v9910_v61 }
 0x2c8   :  { %3655 = vmatpush1.bf16.msra.mxu1 %v6701_v22  ;;  %3696 = vmatpush1.bf16.msra.mxu0 %v6702_v23  ;;  %v8235_v22 = vld [vmem:[#allocation11 + $0x5a8] ss:$48 sps:$4 sm:$0xff]   ;;  %v6792_v23 = vld [vmem:[#allocation11 + $0x8b0] ss:$48 sps:$4 sm:$0xff]  }
 0x2c9   :  { %3656 = vmatprep.subr.bf16.mxu1 %v6703_v24  ;;  %3697 = vmatprep.subr.bf16.mxu0 %v6705_v25  ;;  %v6793_v24 = vld [vmem:[#allocation11 + $0x14] ss:$48 sps:$4 sm:$0xff]   ;;  %v6795_v25 = vld [vmem:[#allocation11 + $0x1c] ss:$48 sps:$4 sm:$0xff]  }
 0x2ca   :  { %3727 = vmatprep.mubr.bf16.mxu0 %v9910_v61  ;;  %3686 = vmatprep.mubr.bf16.mxu1 %v9910_v61 }
 0x2cc   :  { %3657 = vmatpush1.bf16.msra.mxu1 %v6707_v26  ;;  %3698 = vmatpush1.bf16.msra.mxu0 %v6708_v27  ;;  %v6797_v26 = vld [vmem:[#allocation11 + $0x10] ss:$48 sps:$4 sm:$0xff]   ;;  %v6798_v27 = vld [vmem:[#allocation11 + $0x18] ss:$48 sps:$4 sm:$0xff]  }
 0x2cd   :  { %3658 = vmatprep.subr.bf16.mxu1 %v6709_v28  ;;  %3699 = vmatprep.subr.bf16.mxu0 %v6711_v29  ;;  %v6799_v28 = vld [vmem:[#allocation11 + $0x74] ss:$48 sps:$4 sm:$0xff]   ;;  %v6801_v29 = vld [vmem:[#allocation11 + $0x7c] ss:$48 sps:$4 sm:$0xff]  }
 0x2d0   :  { %3659 = vmatpush1.bf16.msra.mxu1 %v6713_v30  ;;  %3700 = vmatpush1.bf16.msra.mxu0 %v6714_v31  ;;  %v6803_v30 = vld [vmem:[#allocation11 + $0x70] ss:$48 sps:$4 sm:$0xff]   ;;  %v6804_v31 = vld [vmem:[#allocation11 + $0x78] ss:$48 sps:$4 sm:$0xff]  }
 0x2d1   :  { %3660 = vmatprep.subr.bf16.mxu1 %v6715_v32  ;;  %3701 = vmatprep.subr.bf16.mxu0 %v6717_v33  ;;  %v6805_v32 = vld [vmem:[#allocation11 + $0xd4] ss:$48 sps:$4 sm:$0xff]   ;;  %v6807_v33 = vld [vmem:[#allocation11 + $0xdc] ss:$48 sps:$4 sm:$0xff]  }
 0x2d4   :  { %3661 = vmatpush1.bf16.msra.mxu1 %v6719_v34  ;;  %3702 = vmatpush1.bf16.msra.mxu0 %v6720_v35  ;;  %v6809_v34 = vld [vmem:[#allocation11 + $0xd0] ss:$48 sps:$4 sm:$0xff]   ;;  %v6810_v35 = vld [vmem:[#allocation11 + $0xd8] ss:$48 sps:$4 sm:$0xff]  }
 0x2d5   :  { %3662 = vmatprep.subr.bf16.mxu1 %v6721_v36  ;;  %3703 = vmatprep.subr.bf16.mxu0 %v6723_v37  ;;  %v6811_v36 = vld [vmem:[#allocation11 + $0x134] ss:$48 sps:$4 sm:$0xff]   ;;  %v6813_v37 = vld [vmem:[#allocation11 + $0x13c] ss:$48 sps:$4 sm:$0xff]  }
 0x2d8   :  { %3663 = vmatpush1.bf16.msra.mxu1 %v6725_v38  ;;  %3704 = vmatpush1.bf16.msra.mxu0 %v6726_v39  ;;  %v6815_v38 = vld [vmem:[#allocation11 + $0x130] ss:$48 sps:$4 sm:$0xff]   ;;  %v6816_v39 = vld [vmem:[#allocation11 + $0x138] ss:$48 sps:$4 sm:$0xff]  }
 0x2d9   :  { %3664 = vmatprep.subr.bf16.mxu1 %v6727_v40  ;;  %3705 = vmatprep.subr.bf16.mxu0 %v6729_v43  ;;  %v6817_v40 = vld [vmem:[#allocation11 + $0x194] ss:$48 sps:$4 sm:$0xff]   ;;  %v6819_v43 = vld [vmem:[#allocation11 + $0x19c] ss:$48 sps:$4 sm:$0xff]  }
 0x2dc   :  { %3665 = vmatpush1.bf16.msra.mxu1 %v6731_v45  ;;  %3706 = vmatpush1.bf16.msra.mxu0 %v6732_v46 }
 0x2dd   :  { %3666 = vmatprep.subr.bf16.mxu1 %v6733_v47  ;;  %3707 = vmatprep.subr.bf16.mxu0 %v6735_v48  ;;  %v6821_v48 = vld [vmem:[#allocation11 + $0x190] ss:$48 sps:$4 sm:$0xff]  }
 0x2e0   :  { %3667 = vmatpush1.bf16.msra.mxu1 %v6737_v49  ;;  %3708 = vmatpush1.bf16.msra.mxu0 %v6738_v50  ;;  %v6822_v49 = vld [vmem:[#allocation11 + $0x198] ss:$48 sps:$4 sm:$0xff]  }
 0x2e1   :  { %3668 = vmatprep.subr.bf16.mxu1 %v6739_v51  ;;  %3709 = vmatprep.subr.bf16.mxu0 %v6741_v52  ;;  %v6823_v51 = vld [vmem:[#allocation11 + $0x1f4] ss:$48 sps:$4 sm:$0xff]   ;;  %v6825_v52 = vld [vmem:[#allocation11 + $0x1fc] ss:$48 sps:$4 sm:$0xff]  }
 0x2e4   :  { %3669 = vmatpush1.bf16.msra.mxu1 %v6743_v53  ;;  %3710 = vmatpush1.bf16.msra.mxu0 %v6744_v54  ;;  %v6827_v53 = vld [vmem:[#allocation11 + $0x1f0] ss:$48 sps:$4 sm:$0xff]   ;;  %v6828_v54 = vld [vmem:[#allocation11 + $0x1f8] ss:$48 sps:$4 sm:$0xff]  }
 0x2e5   :  { %3670 = vmatprep.subr.bf16.mxu1 %v6745_v55  ;;  %3777 = vmatprep.subr.bf16.mxu0 %v6747_v56  ;;  %v6829_v55 = vld [vmem:[#allocation11 + $0x254] ss:$48 sps:$4 sm:$0xff]   ;;  %v6831_v56 = vld [vmem:[#allocation11 + $0x25c] ss:$48 sps:$4 sm:$0xff]  }
 0x2e7   :  { %3728 = vmatmul.mubr.bf16.vlgmr.msra.gmra.mrb[64].mxu0 %v9910_v61 }
 0x2e8   :  { %3671 = vmatpush1.bf16.msra.mxu1 %v6749_v57  ;;  %3778 = vmatpush1.bf16.msra.mxu0 %v6750_v58 }
 0x2e9   :  { %3672 = vmatprep.subr.bf16.mxu1 %v6751_v59  ;;  %3779 = vmatprep.subr.bf16.mxu0 %v6753_v60  ;;  %v6833_v60 = vld [vmem:[#allocation11 + $0x250] ss:$48 sps:$4 sm:$0xff]  }
 0x2ea   :  { %3809 = vmatprep.mubr.bf16.mxu0 %v9910_v61 }
 0x2ec   :  { %3673 = vmatpush1.bf16.msra.mxu1 %v6755_v62  ;;  %3780 = vmatpush1.bf16.msra.mxu0 %v6756_v63  ;;  %v6834_v62 = vld [vmem:[#allocation11 + $0x258] ss:$48 sps:$4 sm:$0xff]  }
 0x2ed   :  { %3674 = vmatprep.subr.bf16.mxu1 %v6757_v0  ;;  %3781 = vmatprep.subr.bf16.mxu0 %v6759_v1  ;;  %v6835_v0 = vld [vmem:[#allocation11 + $0x2b4] ss:$48 sps:$4 sm:$0xff]   ;;  %v6837_v1 = vld [vmem:[#allocation11 + $0x2bc] ss:$48 sps:$4 sm:$0xff]  }
 0x2f0   :  { %3675 = vmatpush1.bf16.msra.mxu1 %v6761_v10  ;;  %3782 = vmatpush1.bf16.msra.mxu0 %v6762_v2  ;;  %v6839_v10 = vld [vmem:[#allocation11 + $0x2b0] ss:$48 sps:$4 sm:$0xff]   ;;  %v6840_v2 = vld [vmem:[#allocation11 + $0x2b8] ss:$48 sps:$4 sm:$0xff]  }
 0x2f1   :  { %3676 = vmatprep.subr.bf16.mxu1 %v6763_v3  ;;  %3783 = vmatprep.subr.bf16.mxu0 %v6765_v4  ;;  %v6841_v3 = vld [vmem:[#allocation11 + $0x314] ss:$48 sps:$4 sm:$0xff]   ;;  %v6843_v4 = vld [vmem:[#allocation11 + $0x31c] ss:$48 sps:$4 sm:$0xff]  }
 0x2f4   :  { %3677 = vmatpush1.bf16.msra.mxu1 %v6767_v5  ;;  %3784 = vmatpush1.bf16.msra.mxu0 %v6768_v6 }
 0x2f5   :  { %3678 = vmatprep.subr.bf16.mxu1 %v8215_v7  ;;  %3785 = vmatprep.subr.bf16.mxu0 %v6771_v8 }
 0x2f8   :  { %3679 = vmatpush1.bf16.msra.mxu1 %v8217_v9  ;;  %3786 = vmatpush1.bf16.msra.mxu0 %v6774_v11  ;;  %v6845_v11 = vld [vmem:[#allocation11 + $0x310] ss:$48 sps:$4 sm:$0xff]  }
 0x2f9   :  { %3680 = vmatprep.subr.bf16.mxu1 %v8220_v12  ;;  %3787 = vmatprep.subr.bf16.mxu0 %v6777_v13  ;;  %v6846_v13 = vld [vmem:[#allocation11 + $0x318] ss:$48 sps:$4 sm:$0xff]  }
 0x2fc   :  { %3681 = vmatpush1.bf16.msra.mxu1 %v8223_v14  ;;  %3788 = vmatpush1.bf16.msra.mxu0 %v6780_v15 }
 0x2fd   :  { %3682 = vmatprep.subr.bf16.mxu1 %v8226_v16  ;;  %3789 = vmatprep.subr.bf16.mxu0 %v6783_v17  ;;  %v6847_v17 = vld [vmem:[#allocation11 + $0x374] ss:$48 sps:$4 sm:$0xff]  }
 0x300   :  { %3683 = vmatpush1.bf16.msra.mxu1 %v8229_v18  ;;  %3790 = vmatpush1.bf16.msra.mxu0 %v6786_v19  ;;  %v6849_v19 = vld [vmem:[#allocation11 + $0x37c] ss:$48 sps:$4 sm:$0xff]  }
 0x301   :  { %3684 = vmatprep.subr.bf16.mxu1 %v8232_v20  ;;  %3791 = vmatprep.subr.bf16.mxu0 %v6789_v21  ;;  %v6851_v21 = vld [vmem:[#allocation11 + $0x370] ss:$48 sps:$4 sm:$0xff]  }
 0x304   :  { %3685 = vmatpush1.bf16.msra.mxu1 %v8235_v22  ;;  %3792 = vmatpush1.bf16.msra.mxu0 %v6792_v23  ;;  %v6852_v23 = vld [vmem:[#allocation11 + $0x378] ss:$48 sps:$4 sm:$0xff]  }
 0x305   :  { %3736 = vmatprep.subr.bf16.mxu1 %v6793_v24  ;;  %3818 = vmatprep.subr.bf16.mxu0 %v6795_v25  ;;  %v6853_v24 = vld [vmem:[#allocation11 + $0x3d4] ss:$48 sps:$4 sm:$0xff]   ;;  %v6855_v25 = vld [vmem:[#allocation11 + $0x3dc] ss:$48 sps:$4 sm:$0xff]  }
 0x307   :  { %3687 = vmatmul.mubr.bf16.vlgmr.msra.gmra.mrb[48].mxu1 %v9910_v61  ;;  %3810 = vmatmul.mubr.bf16.vlgmr.msra.gmra.mrb[68].mxu0 %v9910_v61 }
 0x308   :  { %3737 = vmatpush1.bf16.msra.mxu1 %v6797_v26  ;;  %3819 = vmatpush1.bf16.msra.mxu0 %v6798_v27  ;;  %v6857_v26 = vld [vmem:[#allocation11 + $0x3d0] ss:$48 sps:$4 sm:$0xff]   ;;  %v6858_v27 = vld [vmem:[#allocation11 + $0x3d8] ss:$48 sps:$4 sm:$0xff]  }
 0x309   :  { %3738 = vmatprep.subr.bf16.mxu1 %v6799_v28  ;;  %3820 = vmatprep.subr.bf16.mxu0 %v6801_v29  ;;  %v6859_v28 = vld [vmem:[#allocation11 + $0x434] ss:$48 sps:$4 sm:$0xff]   ;;  %v6861_v29 = vld [vmem:[#allocation11 + $0x43c] ss:$48 sps:$4 sm:$0xff]  }
 0x30a   :  { %3768 = vmatprep.mubr.bf16.mxu1 %v9910_v61  ;;  %3850 = vmatprep.mubr.bf16.mxu0 %v9910_v61 }
 0x30c   :  { %3739 = vmatpush1.bf16.msra.mxu1 %v6803_v30  ;;  %3821 = vmatpush1.bf16.msra.mxu0 %v6804_v31  ;;  %v6863_v30 = vld [vmem:[#allocation11 + $0x430] ss:$48 sps:$4 sm:$0xff]   ;;  %v6864_v31 = vld [vmem:[#allocation11 + $0x438] ss:$48 sps:$4 sm:$0xff]  }
 0x30d   :  { %3740 = vmatprep.subr.bf16.mxu1 %v6805_v32  ;;  %3822 = vmatprep.subr.bf16.mxu0 %v6807_v33  ;;  %v6865_v32 = vld [vmem:[#allocation11 + $0x494] ss:$48 sps:$4 sm:$0xff]   ;;  %v6867_v33 = vld [vmem:[#allocation11 + $0x49c] ss:$48 sps:$4 sm:$0xff]  }
 0x310   :  { %3741 = vmatpush1.bf16.msra.mxu1 %v6809_v34  ;;  %3823 = vmatpush1.bf16.msra.mxu0 %v6810_v35  ;;  %v6869_v34 = vld [vmem:[#allocation11 + $0x490] ss:$48 sps:$4 sm:$0xff]   ;;  %v6870_v35 = vld [vmem:[#allocation11 + $0x498] ss:$48 sps:$4 sm:$0xff]  }
 0x311   :  { %3742 = vmatprep.subr.bf16.mxu1 %v6811_v36  ;;  %3824 = vmatprep.subr.bf16.mxu0 %v6813_v37  ;;  %v6871_v36 = vld [vmem:[#allocation11 + $0x4f4] ss:$48 sps:$4 sm:$0xff]   ;;  %v6873_v37 = vld [vmem:[#allocation11 + $0x4fc] ss:$48 sps:$4 sm:$0xff]  }
 0x312   :  { %v8243_v45 = vpop.f32.mrb[4].mxu0 }
 0x313   :  { %v8245_v46 = vpop.f32.mrb[5].mxu0 }
 0x314   :  { %3743 = vmatpush1.bf16.msra.mxu1 %v6815_v38  ;;  %3825 = vmatpush1.bf16.msra.mxu0 %v6816_v39  ;;  %v898_v47 = vpop.f32.mrb[6].mxu0  ;;  %v6875_v38 = vld [vmem:[#allocation11 + $0x4f0] ss:$48 sps:$4 sm:$0xff]   ;;  %v6876_v39 = vld [vmem:[#allocation11 + $0x4f8] ss:$48 sps:$4 sm:$0xff]  }
 0x315   :  { %v899_v50 = vpop.f32.mrb[7].mxu0  ;;  %3744 = vmatprep.subr.bf16.mxu1 %v6817_v40  ;;  %3826 = vmatprep.subr.bf16.mxu0 %v6819_v43  ;;  %v6877_v40 = vld [vmem:[#allocation11 + $0x554] ss:$48 sps:$4 sm:$0xff]   ;;  %v6879_v43 = vld [vmem:[#allocation11 + $0x55c] ss:$48 sps:$4 sm:$0xff]  }
 0x316   :  { %v6881_v47 = vld [vmem:[#allocation11 + $0x550] ss:$48 sps:$4 sm:$0xff]   ;;  %v6885_v50 = vld [vmem:[#allocation11 + $0x5bc] ss:$48 sps:$4 sm:$0xff]  }
 0x318   :  { %3745 = vmatpush1.bf16.msra.mxu1 %v6821_v48  ;;  %3827 = vmatpush1.bf16.msra.mxu0 %v6822_v49  ;;  %v6882_v48 = vld [vmem:[#allocation11 + $0x558] ss:$48 sps:$4 sm:$0xff]   ;;  %v6883_v49 = vld [vmem:[#allocation11 + $0x5b4] ss:$48 sps:$4 sm:$0xff]  }
 0x319   :  { %3746 = vmatprep.subr.bf16.mxu1 %v6823_v51  ;;  %3828 = vmatprep.subr.bf16.mxu0 %v6825_v52  ;;  %v6887_v51 = vld [vmem:[#allocation11 + $0x5b0] ss:$48 sps:$4 sm:$0xff]   ;;  %v6888_v52 = vld [vmem:[#allocation11 + $0x5b8] ss:$48 sps:$4 sm:$0xff]  }
 0x31a   :  { %v8247_v57 = vpop.f32.mrb[8].mxu0 }
 0x31b   :  { %v8249_v58 = vpop.f32.mrb[9].mxu0 }
 0x31c   :  { %3747 = vmatpush1.bf16.msra.mxu1 %v6827_v53  ;;  %3829 = vmatpush1.bf16.msra.mxu0 %v6828_v54  ;;  %v939_v59 = vpop.f32.mrb[10].mxu0  ;;  %v6889_v53 = vld [vmem:[#allocation11 + $0x61c] ss:$48 sps:$4 sm:$0xff]   ;;  %v6891_v54 = vld [vmem:[#allocation11 + $0x24] ss:$48 sps:$4 sm:$0xff]  }
 0x31d   :  { %v940_v63 = vpop.f32.mrb[11].mxu0  ;;  %3748 = vmatprep.subr.bf16.mxu1 %v6829_v55  ;;  %3830 = vmatprep.subr.bf16.mxu0 %v6831_v56  ;;  %v6893_v55 = vld [vmem:[#allocation11 + $0x618] ss:$48 sps:$4 sm:$0xff]   ;;  %v6894_v56 = vld [vmem:[#allocation11 + $0x20] ss:$48 sps:$4 sm:$0xff]  }
 0x31e   :  { %v6895_v59 = vld [vmem:[#allocation11 + $0x67c] ss:$48 sps:$4 sm:$0xff]   ;;  %v6900_v63 = vld [vmem:[#allocation11 + $0x80] ss:$48 sps:$4 sm:$0xff]  }
 0x320   :  { %3749 = vmatpush1.bf16.msra.mxu1 %v6833_v60  ;;  %3831 = vmatpush1.bf16.msra.mxu0 %v6834_v62  ;;  %v6897_v60 = vld [vmem:[#allocation11 + $0x84] ss:$48 sps:$4 sm:$0xff]   ;;  %v6899_v62 = vld [vmem:[#allocation11 + $0x678] ss:$48 sps:$4 sm:$0xff]  }
 0x321   :  { %3750 = vmatprep.subr.bf16.mxu1 %v6835_v0  ;;  %3832 = vmatprep.subr.bf16.mxu0 %v6837_v1  ;;  %v6901_v0 = vld [vmem:[#allocation11 + $0x6dc] ss:$48 sps:$4 sm:$0xff]   ;;  %v6903_v1 = vld [vmem:[#allocation11 + $0xe4] ss:$48 sps:$4 sm:$0xff]  }
 0x322   :  { %v8251_v5 = vpop.f32.mrb[12].mxu0 }
 0x323   :  { %v8253_v6 = vpop.f32.mrb[13].mxu0 }
 0x324   :  { %3751 = vmatpush1.bf16.msra.mxu1 %v6839_v10  ;;  %3833 = vmatpush1.bf16.msra.mxu0 %v6840_v2  ;;  %v980_v8 = vpop.f32.mrb[14].mxu0  ;;  %v6905_v10 = vld [vmem:[#allocation11 + $0x6d8] ss:$48 sps:$4 sm:$0xff]   ;;  %v6906_v2 = vld [vmem:[#allocation11 + $0xe0] ss:$48 sps:$4 sm:$0xff]  }
 0x325   :  { %v981_v15 = vpop.f32.mrb[15].mxu0  ;;  %3752 = vmatprep.subr.bf16.mxu1 %v6841_v3  ;;  %3834 = vmatprep.subr.bf16.mxu0 %v6843_v4  ;;  %v6907_v3 = vld [vmem:[#allocation11 + $0x73c] ss:$48 sps:$4 sm:$0xff]   ;;  %v6909_v4 = vld [vmem:[#allocation11 + $0x144] ss:$48 sps:$4 sm:$0xff]  }
 0x326   :  { %v6911_v8 = vld [vmem:[#allocation11 + $0x738] ss:$48 sps:$4 sm:$0xff]   ;;  %v6915_v15 = vld [vmem:[#allocation11 + $0x1a4] ss:$48 sps:$4 sm:$0xff]  }
 0x328   :  { %3753 = vmatpush1.bf16.msra.mxu1 %v6845_v11  ;;  %3835 = vmatpush1.bf16.msra.mxu0 %v6846_v13  ;;  %v6912_v11 = vld [vmem:[#allocation11 + $0x140] ss:$48 sps:$4 sm:$0xff]   ;;  %v6913_v13 = vld [vmem:[#allocation11 + $0x79c] ss:$48 sps:$4 sm:$0xff]  }
 0x329   :  { %3754 = vmatprep.subr.bf16.mxu1 %v6847_v17  ;;  %3836 = vmatprep.subr.bf16.mxu0 %v6849_v19  ;;  %v6917_v17 = vld [vmem:[#allocation11 + $0x798] ss:$48 sps:$4 sm:$0xff]   ;;  %v6918_v19 = vld [vmem:[#allocation11 + $0x1a0] ss:$48 sps:$4 sm:$0xff]  }
 0x32c   :  { %3755 = vmatpush1.bf16.msra.mxu1 %v6851_v21  ;;  %3837 = vmatpush1.bf16.msra.mxu0 %v6852_v23  ;;  %v6919_v21 = vld [vmem:[#allocation11 + $0x7fc] ss:$48 sps:$4 sm:$0xff]   ;;  %v6921_v23 = vld [vmem:[#allocation11 + $0x204] ss:$48 sps:$4 sm:$0xff]  }
 0x32d   :  { %3756 = vmatprep.subr.bf16.mxu1 %v6853_v24  ;;  %3838 = vmatprep.subr.bf16.mxu0 %v6855_v25  ;;  %v6923_v24 = vld [vmem:[#allocation11 + $0x7f8] ss:$48 sps:$4 sm:$0xff]   ;;  %v6924_v25 = vld [vmem:[#allocation11 + $0x200] ss:$48 sps:$4 sm:$0xff]  }
 0x330   :  { %3757 = vmatpush1.bf16.msra.mxu1 %v6857_v26  ;;  %3839 = vmatpush1.bf16.msra.mxu0 %v6858_v27  ;;  %v6925_v26 = vld [vmem:[#allocation11 + $0x85c] ss:$48 sps:$4 sm:$0xff]   ;;  %v6927_v27 = vld [vmem:[#allocation11 + $0x264] ss:$48 sps:$4 sm:$0xff]  }
 0x331   :  { %3758 = vmatprep.subr.bf16.mxu1 %v6859_v28  ;;  %3840 = vmatprep.subr.bf16.mxu0 %v6861_v29  ;;  %v6929_v28 = vld [vmem:[#allocation11 + $0x858] ss:$48 sps:$4 sm:$0xff]   ;;  %v6930_v29 = vld [vmem:[#allocation11 + $0x260] ss:$48 sps:$4 sm:$0xff]  }
 0x334   :  { %3759 = vmatpush1.bf16.msra.mxu1 %v6863_v30  ;;  %3841 = vmatpush1.bf16.msra.mxu0 %v6864_v31  ;;  %v6931_v30 = vld [vmem:[#allocation11 + $0x8bc] ss:$48 sps:$4 sm:$0xff]   ;;  %v6933_v31 = vld [vmem:[#allocation11 + $0x2c4] ss:$48 sps:$4 sm:$0xff]  }
 0x335   :  { %3760 = vmatprep.subr.bf16.mxu1 %v6865_v32  ;;  %3842 = vmatprep.subr.bf16.mxu0 %v6867_v33  ;;  %v6935_v32 = vld [vmem:[#allocation11 + $0x8b8] ss:$48 sps:$4 sm:$0xff]   ;;  %v6936_v33 = vld [vmem:[#allocation11 + $0x2c0] ss:$48 sps:$4 sm:$0xff]  }
 0x338   :  { %3761 = vmatpush1.bf16.msra.mxu1 %v6869_v34  ;;  %3843 = vmatpush1.bf16.msra.mxu0 %v6870_v35  ;;  %v6937_v34 = vld [vmem:[#allocation11 + $0x324] ss:$48 sps:$4 sm:$0xff]   ;;  %v6939_v35 = vld [vmem:[#allocation11 + $0x2c] ss:$48 sps:$4 sm:$0xff]  }
 0x339   :  { %3762 = vmatprep.subr.bf16.mxu1 %v6871_v36  ;;  %3844 = vmatprep.subr.bf16.mxu0 %v6873_v37  ;;  %v6941_v36 = vld [vmem:[#allocation11 + $0x320] ss:$48 sps:$4 sm:$0xff]   ;;  %v6942_v37 = vld [vmem:[#allocation11 + $0x28] ss:$48 sps:$4 sm:$0xff]  }
 0x33c   :  { %3763 = vmatpush1.bf16.msra.mxu1 %v6875_v38  ;;  %3845 = vmatpush1.bf16.msra.mxu0 %v6876_v39  ;;  %v6943_v38 = vld [vmem:[#allocation11 + $0x384] ss:$48 sps:$4 sm:$0xff]   ;;  %v6945_v39 = vld [vmem:[#allocation11 + $0x8c] ss:$48 sps:$4 sm:$0xff]  }
 0x33d   :  { %3764 = vmatprep.subr.bf16.mxu1 %v6877_v40  ;;  %3846 = vmatprep.subr.bf16.mxu0 %v6879_v43  ;;  %v6947_v40 = vld [vmem:[#allocation11 + $0x380] ss:$48 sps:$4 sm:$0xff]   ;;  %v6948_v43 = vld [vmem:[#allocation11 + $0x88] ss:$48 sps:$4 sm:$0xff]  }
 0x340   :  { %3765 = vmatpush1.bf16.msra.mxu1 %v6881_v47  ;;  %3847 = vmatpush1.bf16.msra.mxu0 %v6882_v48  ;;  %v6949_v47 = vld [vmem:[#allocation11 + $0x3e4] ss:$48 sps:$4 sm:$0xff]   ;;  %v6951_v48 = vld [vmem:[#allocation11 + $0xec] ss:$48 sps:$4 sm:$0xff]  }
 0x341   :  { %3766 = vmatprep.subr.bf16.mxu1 %v6883_v49  ;;  %3848 = vmatprep.subr.bf16.mxu0 %v6885_v50  ;;  %v6953_v49 = vld [vmem:[#allocation11 + $0x3e0] ss:$48 sps:$4 sm:$0xff]   ;;  %v6954_v50 = vld [vmem:[#allocation11 + $0xe8] ss:$48 sps:$4 sm:$0xff]  }
 0x344   :  { %3767 = vmatpush1.bf16.msra.mxu1 %v6887_v51  ;;  %3849 = vmatpush1.bf16.msra.mxu0 %v6888_v52  ;;  %v6955_v51 = vld [vmem:[#allocation11 + $0x444] ss:$48 sps:$4 sm:$0xff]   ;;  %v6957_v52 = vld [vmem:[#allocation11 + $0x14c] ss:$48 sps:$4 sm:$0xff]  }
 0x345   :  { %3859 = vmatprep.subr.bf16.mxu0 %v6889_v53  ;;  %3900 = vmatprep.subr.bf16.mxu1 %v6891_v54  ;;  %v6959_v53 = vld [vmem:[#allocation11 + $0x440] ss:$48 sps:$4 sm:$0xff]   ;;  %v6960_v54 = vld [vmem:[#allocation11 + $0x148] ss:$48 sps:$4 sm:$0xff]  }
 0x347   :  { %3769 = vmatmul.mubr.bf16.vlgmr.msra.gmra.mrb[52].mxu1 %v9910_v61  ;;  %3851 = vmatmul.mubr.bf16.vlgmr.msra.gmra.mrb[16].mxu0 %v9910_v61 }
 0x348   :  { %3860 = vmatpush1.bf16.msra.mxu0 %v6893_v55  ;;  %3901 = vmatpush1.bf16.msra.mxu1 %v6894_v56  ;;  %v6961_v55 = vld [vmem:[#allocation11 + $0x4a4] ss:$48 sps:$4 sm:$0xff]   ;;  %v6963_v56 = vld [vmem:[#allocation11 + $0x1ac] ss:$48 sps:$4 sm:$0xff]  }
 0x349   :  { %3861 = vmatprep.subr.bf16.mxu0 %v6895_v59  ;;  %3902 = vmatprep.subr.bf16.mxu1 %v6897_v60  ;;  %v6965_v59 = vld [vmem:[#allocation11 + $0x4a0] ss:$48 sps:$4 sm:$0xff]   ;;  %v6966_v60 = vld [vmem:[#allocation11 + $0x1a8] ss:$48 sps:$4 sm:$0xff]  }
 0x34a   :  { %3891 = vmatprep.mubr.bf16.mxu0 %v9910_v61  ;;  %3932 = vmatprep.mubr.bf16.mxu1 %v9910_v61 }
 0x34c   :  { %3862 = vmatpush1.bf16.msra.mxu0 %v6899_v62  ;;  %3903 = vmatpush1.bf16.msra.mxu1 %v6900_v63  ;;  %v6967_v62 = vld [vmem:[#allocation11 + $0x504] ss:$48 sps:$4 sm:$0xff]   ;;  %v8261_v63 = vld [vmem:[#allocation11 + $0x20c] ss:$48 sps:$4 sm:$0xff]  }
 0x34d   :  { %3863 = vmatprep.subr.bf16.mxu0 %v6901_v0  ;;  %3904 = vmatprep.subr.bf16.mxu1 %v6903_v1  ;;  %v6971_v0 = vld [vmem:[#allocation11 + $0x500] ss:$48 sps:$4 sm:$0xff]   ;;  %v8263_v1 = vld [vmem:[#allocation11 + $0x208] ss:$48 sps:$4 sm:$0xff]  }
 0x350   :  { %3864 = vmatpush1.bf16.msra.mxu0 %v6905_v10  ;;  %3905 = vmatpush1.bf16.msra.mxu1 %v6906_v2  ;;  %v6973_v10 = vld [vmem:[#allocation11 + $0x564] ss:$48 sps:$4 sm:$0xff]   ;;  %v8266_v2 = vld [vmem:[#allocation11 + $0x26c] ss:$48 sps:$4 sm:$0xff]  }
 0x351   :  { %3865 = vmatprep.subr.bf16.mxu0 %v6907_v3  ;;  %3906 = vmatprep.subr.bf16.mxu1 %v6909_v4  ;;  %v6977_v3 = vld [vmem:[#allocation11 + $0x560] ss:$48 sps:$4 sm:$0xff]   ;;  %v8269_v4 = vld [vmem:[#allocation11 + $0x268] ss:$48 sps:$4 sm:$0xff]  }
 0x354   :  { %3866 = vmatpush1.bf16.msra.mxu0 %v6911_v8  ;;  %3907 = vmatpush1.bf16.msra.mxu1 %v6912_v11  ;;  %v6979_v8 = vld [vmem:[#allocation11 + $0x5c4] ss:$48 sps:$4 sm:$0xff]   ;;  %v8272_v11 = vld [vmem:[#allocation11 + $0x2cc] ss:$48 sps:$4 sm:$0xff]  }
 0x355   :  { %3867 = vmatprep.subr.bf16.mxu0 %v6913_v13  ;;  %3908 = vmatprep.subr.bf16.mxu1 %v6915_v15  ;;  %v6983_v13 = vld [vmem:[#allocation11 + $0x5c0] ss:$48 sps:$4 sm:$0xff]   ;;  %v8275_v15 = vld [vmem:[#allocation11 + $0x2c8] ss:$48 sps:$4 sm:$0xff]  }
 0x358   :  { %3868 = vmatpush1.bf16.msra.mxu0 %v6917_v17  ;;  %3909 = vmatpush1.bf16.msra.mxu1 %v6918_v19  ;;  %v6985_v17 = vld [vmem:[#allocation11 + $0x624] ss:$48 sps:$4 sm:$0xff]   ;;  %v8278_v19 = vld [vmem:[#allocation11 + $0x32c] ss:$48 sps:$4 sm:$0xff]  }
 0x359   :  { %3869 = vmatprep.subr.bf16.mxu0 %v6919_v21  ;;  %3910 = vmatprep.subr.bf16.mxu1 %v6921_v23  ;;  %v6989_v21 = vld [vmem:[#allocation11 + $0x620] ss:$48 sps:$4 sm:$0xff]   ;;  %v8281_v23 = vld [vmem:[#allocation11 + $0x328] ss:$48 sps:$4 sm:$0xff]  }
 0x35c   :  { %3870 = vmatpush1.bf16.msra.mxu0 %v6923_v24  ;;  %3911 = vmatpush1.bf16.msra.mxu1 %v6924_v25  ;;  %v6991_v24 = vld [vmem:[#allocation11 + $0x684] ss:$48 sps:$4 sm:$0xff]   ;;  %v8284_v25 = vld [vmem:[#allocation11 + $0x38c] ss:$48 sps:$4 sm:$0xff]  }
 0x35d   :  { %3871 = vmatprep.subr.bf16.mxu0 %v6925_v26  ;;  %3912 = vmatprep.subr.bf16.mxu1 %v6927_v27  ;;  %v6995_v26 = vld [vmem:[#allocation11 + $0x680] ss:$48 sps:$4 sm:$0xff]   ;;  %v8288_v27 = vld [vmem:[#allocation11 + $0x388] ss:$48 sps:$4 sm:$0xff]  }
 0x360   :  { %3872 = vmatpush1.bf16.msra.mxu0 %v6929_v28  ;;  %3913 = vmatpush1.bf16.msra.mxu1 %v6930_v29  ;;  %v6997_v28 = vld [vmem:[#allocation11 + $0x6e4] ss:$48 sps:$4 sm:$0xff]   ;;  %v8291_v29 = vld [vmem:[#allocation11 + $0x3ec] ss:$48 sps:$4 sm:$0xff]  }
 0x361   :  { %3873 = vmatprep.subr.bf16.mxu0 %v6931_v30  ;;  %3914 = vmatprep.subr.bf16.mxu1 %v6933_v31  ;;  %v7001_v30 = vld [vmem:[#allocation11 + $0x6e0] ss:$48 sps:$4 sm:$0xff]   ;;  %v8295_v31 = vld [vmem:[#allocation11 + $0x3e8] ss:$48 sps:$4 sm:$0xff]  }
 0x364   :  { %3874 = vmatpush1.bf16.msra.mxu0 %v6935_v32  ;;  %3915 = vmatpush1.bf16.msra.mxu1 %v6936_v33  ;;  %v7003_v32 = vld [vmem:[#allocation11 + $0x744] ss:$48 sps:$4 sm:$0xff]   ;;  %v8298_v33 = vld [vmem:[#allocation11 + $0x44c] ss:$48 sps:$4 sm:$0xff]  }
 0x365   :  { %3916 = vmatprep.subr.bf16.mxu1 %v6937_v34  ;;  %3982 = vmatprep.subr.bf16.mxu0 %v6939_v35  ;;  %v7007_v34 = vld [vmem:[#allocation11 + $0x740] ss:$48 sps:$4 sm:$0xff]   ;;  %v8301_v35 = vld [vmem:[#allocation11 + $0x448] ss:$48 sps:$4 sm:$0xff]  }
 0x367   :  { %3892 = vmatmul.mubr.bf16.vlgmr.msra.gmra.mrb[16].mxu0 %v9910_v61 }
 0x368   :  { %3917 = vmatpush1.bf16.msra.mxu1 %v6941_v36  ;;  %3983 = vmatpush1.bf16.msra.mxu0 %v6942_v37  ;;  %v7009_v36 = vld [vmem:[#allocation11 + $0x7a4] ss:$48 sps:$4 sm:$0xff]   ;;  %v8304_v37 = vld [vmem:[#allocation11 + $0x4ac] ss:$48 sps:$4 sm:$0xff]  }
 0x369   :  { %3918 = vmatprep.subr.bf16.mxu1 %v6943_v38  ;;  %3984 = vmatprep.subr.bf16.mxu0 %v6945_v39  ;;  %v8306_v38 = vld [vmem:[#allocation10] sm:$0xff] }
 0x36a   :  { %4014 = vmatprep.mubr.bf16.mxu0 %v9910_v61  ;;  %v7013_v39 = vld [vmem:[#allocation11 + $0x7a0] ss:$48 sps:$4 sm:$0xff]  }
 0x36c   :  { %3919 = vmatpush1.bf16.msra.mxu1 %v6947_v40  ;;  %3985 = vmatpush1.bf16.msra.mxu0 %v6948_v43  ;;  %v8309_v40 = vld [vmem:[#allocation11 + $0x4a8] ss:$48 sps:$4 sm:$0xff]   ;;  %v354_v43 = vrot.slane %v8306_v38, %v8078_v42 }
 0x36d   :  { %3920 = vmatprep.subr.bf16.mxu1 %v6949_v47  ;;  %3986 = vmatprep.subr.bf16.mxu0 %v6951_v48  ;;  %v8314_v47 = vld [vmem:[#allocation11 + $0x804] ss:$48 sps:$4 sm:$0xff]   ;;  %v8316_v48 = vld [vmem:[#allocation11 + $0x50c] ss:$48 sps:$4 sm:$0xff]  }
 0x36e   :  { %10165 = vst [vmem:[#allocation19_spill] sm:$0xff] %v8314_v47 }
 0x370   :  { %3921 = vmatpush1.bf16.msra.mxu1 %v6953_v49  ;;  %3987 = vmatpush1.bf16.msra.mxu0 %v6954_v50  ;;  %v358_v49 = vrot.slane %v8306_v38, %v8081_v44  ;;  %v8321_v50 = vld [vmem:[#allocation11 + $0x800] ss:$48 sps:$4 sm:$0xff]  }
 0x371   :  { %3922 = vmatprep.subr.bf16.mxu1 %v6955_v51  ;;  %3988 = vmatprep.subr.bf16.mxu0 %v6957_v52  ;;  %10166 = vst [vmem:[#allocation20_spill] sm:$0xff] %v8321_v50  ;;  %v8323_v51 = vld [vmem:[#allocation11 + $0x508] ss:$48 sps:$4 sm:$0xff]   ;;  %v895_v52 = vadd.f32 %v8243_v45, %v354_v43  ;;  %v8335_v45 = vld [vmem:[#allocation11 + $0x860] ss:$48 sps:$4 sm:$0xff]  }
 0x372   :  { %10168 = vst [vmem:[#allocation22_spill] sm:$0xff] %v8335_v45  ;;  %v8366_v43 = vld [vmem:[#allocation11 + $0x4] ss:$48 sps:$4 sm:$0xff]  }
 0x373   :  { %10171 = vst [vmem:[#allocation25_spill] sm:$0xff] %v8366_v43 }
 0x374   :  { %3923 = vmatpush1.bf16.msra.mxu1 %v6959_v53  ;;  %3989 = vmatpush1.bf16.msra.mxu0 %v6960_v54  ;;  %v8328_v53 = vld [vmem:[#allocation11 + $0x864] ss:$48 sps:$4 sm:$0xff]   ;;  %v8330_v54 = vld [vmem:[#allocation11 + $0x56c] ss:$48 sps:$4 sm:$0xff]  }
 0x375   :  { %3924 = vmatprep.subr.bf16.mxu1 %v6961_v55  ;;  %3990 = vmatprep.subr.bf16.mxu0 %v6963_v56  ;;  %10167 = vst [vmem:[#allocation21_spill] sm:$0xff] %v8328_v53  ;;  %v897_v55 = vadd.f32 %v8245_v46, %v358_v49  ;;  %v8343_v46 = vld [vmem:[#allocation11 + $0x8c4] ss:$48 sps:$4 sm:$0xff]   ;;  %v8372_v49 = vld [vmem:[#allocation11 + $0x688] ss:$48 sps:$4 sm:$0xff]  }
 0x376   :  { %10169 = vst [vmem:[#allocation23_spill] sm:$0xff] %v8343_v46 }
 0x378   :  { %3925 = vmatpush1.bf16.msra.mxu1 %v6965_v59  ;;  %3991 = vmatpush1.bf16.msra.mxu0 %v6966_v60 }
 0x379   :  { %3926 = vmatprep.subr.bf16.mxu1 %v6967_v62  ;;  %3992 = vmatprep.subr.bf16.mxu0 %v8261_v63 }
 0x37c   :  { %3927 = vmatpush1.bf16.msra.mxu1 %v6971_v0  ;;  %3993 = vmatpush1.bf16.msra.mxu0 %v8263_v1 }
 0x37d   :  { %3928 = vmatprep.subr.bf16.mxu1 %v6973_v10  ;;  %3994 = vmatprep.subr.bf16.mxu0 %v8266_v2 }
 0x380   :  { %3929 = vmatpush1.bf16.msra.mxu1 %v6977_v3  ;;  %3995 = vmatpush1.bf16.msra.mxu0 %v8269_v4 }
 0x381   :  { %3930 = vmatprep.subr.bf16.mxu1 %v6979_v8  ;;  %3996 = vmatprep.subr.bf16.mxu0 %v8272_v11  ;;  %v8337_v8 = vld [vmem:[#allocation11 + $0x568] ss:$48 sps:$4 sm:$0xff]  }
 0x384   :  { %3931 = vmatpush1.bf16.msra.mxu1 %v6983_v13  ;;  %3997 = vmatpush1.bf16.msra.mxu0 %v8275_v15 }
 0x385   :  { %3941 = vmatprep.subr.bf16.mxu1 %v6985_v17  ;;  %3998 = vmatprep.subr.bf16.mxu0 %v8278_v19 }
 0x387   :  { %3933 = vmatmul.mubr.bf16.vlgmr.msra.gmra.mrb[4].mxu1 %v9910_v61 }
 0x388   :  { %3942 = vmatpush1.bf16.msra.mxu1 %v6989_v21  ;;  %3999 = vmatpush1.bf16.msra.mxu0 %v8281_v23 }
 0x389   :  { %3943 = vmatprep.subr.bf16.mxu1 %v6991_v24  ;;  %4000 = vmatprep.subr.bf16.mxu0 %v8284_v25  ;;  %v8345_v24 = vld [vmem:[#allocation11 + $0x5cc] ss:$48 sps:$4 sm:$0xff]  }
 0x38a   :  { %3973 = vmatprep.mubr.bf16.mxu1 %v9910_v61 }
 0x38c   :  { %3944 = vmatpush1.bf16.msra.mxu1 %v6995_v26  ;;  %4001 = vmatpush1.bf16.msra.mxu0 %v8288_v27 }
 0x38d   :  { %3945 = vmatprep.subr.bf16.mxu1 %v6997_v28  ;;  %4002 = vmatprep.subr.bf16.mxu0 %v8291_v29 }
 0x390   :  { %3946 = vmatpush1.bf16.msra.mxu1 %v7001_v30  ;;  %4003 = vmatpush1.bf16.msra.mxu0 %v8295_v31  ;;  %v8351_v30 = vld [vmem:[#allocation11 + $0x8c0] ss:$48 sps:$4 sm:$0xff]  }
 0x391   :  { %3947 = vmatprep.subr.bf16.mxu1 %v7003_v32  ;;  %4004 = vmatprep.subr.bf16.mxu0 %v8298_v33  ;;  %10170 = vst [vmem:[#allocation24_spill] sm:$0xff] %v8351_v30  ;;  %v8353_v32 = vld [vmem:[#allocation11 + $0x5c8] ss:$48 sps:$4 sm:$0xff]  }
 0x394   :  { %3948 = vmatpush1.bf16.msra.mxu1 %v7007_v34  ;;  %4005 = vmatpush1.bf16.msra.mxu0 %v8301_v35  ;;  %v8357_v34 = vld [vmem:[#allocation11 + $0x62c] ss:$48 sps:$4 sm:$0xff]  }
 0x395   :  { %3949 = vmatprep.subr.bf16.mxu1 %v7009_v36  ;;  %4006 = vmatprep.subr.bf16.mxu0 %v8304_v37  ;;  %v8361_v36 = vld [vmem:[#allocation11 + $0x628] ss:$48 sps:$4 sm:$0xff]  }
 0x398   :  { %3950 = vmatpush1.bf16.msra.mxu1 %v7013_v39  ;;  %4007 = vmatpush1.bf16.msra.mxu0 %v8309_v40  ;;  %v8364_v39 = vld [vmem:[#allocation11 + $0x68c] ss:$48 sps:$4 sm:$0xff]  }
 0x399   :  { %3951 = vmatprep.subr.bf16.mxu1 %v8314_v47  ;;  %4008 = vmatprep.subr.bf16.mxu0 %v8316_v48 }
 0x39a   :  { %v3606_v56 = vpop.f32.mrb[44].mxu1  ;;  %v3647_v59 = vpop.f32.mrb[60].mxu0 }
 0x39b   :  { %v6335_v60 = vadd.f32 %v3606_v56, %v895_v52  ;;  %v3608_v62 = vpop.f32.mrb[45].mxu1  ;;  %v3649_v0 = vpop.f32.mrb[61].mxu0  ;;  %v8376_v52 = vld [vmem:[#allocation11 + $0x6ec] ss:$48 sps:$4 sm:$0xff]   ;;  %v8381_v56 = vld [vmem:[#allocation11 + $0x64] ss:$48 sps:$4 sm:$0xff]  }
 0x39c   :  { %v6338_v10 = vadd.f32 %v3608_v62, %v897_v55  ;;  %v3651_v3 = vpop.f32.mrb[62].mxu0  ;;  %3952 = vmatpush1.bf16.msra.mxu1 %v8321_v50  ;;  %4009 = vmatpush1.bf16.msra.mxu0 %v8323_v51  ;;  %v3610_v13 = vpop.f32.mrb[46].mxu1  ;;  %v8378_v55 = vld [vmem:[#allocation11] ss:$48 sps:$4 sm:$0xff]   ;;  %10173 = vst [vmem:[#allocation27_spill] sm:$0xff] %v8381_v56 }
 0x39d   :  { %v8339_v17 = vadd.f32 %v6335_v60, %v3647_v59  ;;  %v3652_v21 = vpop.f32.mrb[63].mxu0  ;;  %3953 = vmatprep.subr.bf16.mxu1 %v8328_v53  ;;  %4010 = vmatprep.subr.bf16.mxu0 %v8330_v54  ;;  %v3611_v26 = vpop.f32.mrb[47].mxu1  ;;  %10172 = vst [vmem:[#allocation26_spill] sm:$0xff] %v8378_v55  ;;  %v8385_v59 = vld [vmem:[#allocation11 + $0x6e8] ss:$48 sps:$4 sm:$0xff]  }
 0x39e   :  { %v8347_v28 = vadd.f32 %v6338_v10, %v3649_v0  ;;  %10174 = vst [vmem:[#allocation28_spill] sm:$0xff] %v8385_v59  ;;  %v8388_v60 = vld [vmem:[#allocation11 + $0x74c] ss:$48 sps:$4 sm:$0xff]   ;;  %v8390_v62 = vld [vmem:[#allocation11 + $0x60] ss:$48 sps:$4 sm:$0xff]  }
 0x39f   :  { %10175 = vst [vmem:[#allocation29_spill] sm:$0xff] %v8388_v60  ;;  %10176 = vst [vmem:[#allocation30_spill] sm:$0xff] %v8390_v62  ;;  %v8393_v0 = vld [vmem:[#allocation11 + $0xc4] ss:$48 sps:$4 sm:$0xff]   ;;  %v8397_v10 = vld [vmem:[#allocation11 + $0x748] ss:$48 sps:$4 sm:$0xff]  }
 0x3a0   :  { %3954 = vmatpush1.bf16.msra.mxu1 %v8335_v45  ;;  %4011 = vmatpush1.bf16.msra.mxu0 %v8337_v8  ;;  %10177 = vst [vmem:[#allocation31_spill] sm:$0xff] %v8393_v0  ;;  %10178 = vst [vmem:[#allocation32_spill] sm:$0xff] %v8397_v10  ;;  %v8400_v3 = vld [vmem:[#allocation11 + $0x7ac] ss:$48 sps:$4 sm:$0xff]   ;;  %v8402_v13 = vld [vmem:[#allocation11 + $0xc0] ss:$48 sps:$4 sm:$0xff]  }
 0x3a1   :  { %3955 = vmatprep.subr.bf16.mxu1 %v8343_v46  ;;  %4012 = vmatprep.subr.bf16.mxu0 %v8345_v24  ;;  %10179 = vst [vmem:[#allocation33_spill] sm:$0xff] %v8400_v3  ;;  %10180 = vst [vmem:[#allocation34_spill] sm:$0xff] %v8402_v13  ;;  %v8405_v21 = vld [vmem:[#allocation11 + $0x124] ss:$48 sps:$4 sm:$0xff]   ;;  %v8409_v26 = vld [vmem:[#allocation11 + $0x7a8] ss:$48 sps:$4 sm:$0xff]  }
 0x3a2   :  { %10181 = vst [vmem:[#allocation35_spill] sm:$0xff] %v8405_v21  ;;  %10182 = vst [vmem:[#allocation36_spill] sm:$0xff] %v8409_v26  ;;  %v8440_v45 = vld [vmem:[#allocation11 + $0x8cc] ss:$48 sps:$4 sm:$0xff]   ;;  %v8442_v53 = vld [vmem:[#allocation11 + $0x1e0] ss:$48 sps:$4 sm:$0xff]  }
 0x3a3   :  { %10191 = vst [vmem:[#allocation45_spill] sm:$0xff] %v8440_v45  ;;  %10192 = vst [vmem:[#allocation46_spill] sm:$0xff] %v8442_v53  ;;  %v8524_v50 = vld [vmem:[#allocation11 + $0x484] ss:$48 sps:$4 sm:$0xff]  }
 0x3a4   :  { %3956 = vmatpush1.bf16.msra.mxu1 %v8351_v30  ;;  %4013 = vmatpush1.bf16.msra.mxu0 %v8353_v32  ;;  %v8437_v30 = vld [vmem:[#allocation11 + $0x868] ss:$48 sps:$4 sm:$0xff]   ;;  %10218 = vst [vmem:[#allocation71_spill] sm:$0xff] %v8524_v50 }
 0x3a5   :  { %4023 = vmatprep.subr.bf16.mxu0 %v8357_v34  ;;  %4133 = vmatprep.subr.bf16.mxu1 %v8366_v43  ;;  %v8431_v43 = vld [vmem:[#allocation11 + $0x1e4] ss:$48 sps:$4 sm:$0xff]   ;;  %10190 = vst [vmem:[#allocation44_spill] sm:$0xff] %v8437_v30 }
 0x3a6   :  { %10189 = vst [vmem:[#allocation43_spill] sm:$0xff] %v8431_v43 }
 0x3a7   :  { %3974 = vmatmul.mubr.bf16.vlgmr.msra.gmra.mrb[4].mxu1 %v9910_v61  ;;  %4015 = vmatmul.mubr.bf16.vlgmr.msra.gmra.mrb[20].mxu0 %v9910_v61 }
 0x3a8   :  { %4024 = vmatpush1.bf16.msra.mxu0 %v8361_v36  ;;  %4055 = vmatprep.mubr.bf16.mxu0 %v9910_v61  ;;  %v8412_v61 = vld [vmem:[#allocation11 + $0x80c] ss:$48 sps:$4 sm:$0xff]  }
 0x3a9   :  { %4025 = vmatprep.subr.bf16.mxu0 %v8364_v39  ;;  %4134 = vmatpush1.bf16.msra.mxu1 %v8378_v55  ;;  %10183 = vst [vmem:[#allocation37_spill] sm:$0xff] %v8412_v61 }
 0x3aa   :  { %4135 = vmatprep.subr.bf16.mxu1 %v8381_v56  ;;  %v8426_v56 = vld [vmem:[#allocation11 + $0x180] ss:$48 sps:$4 sm:$0xff]  }
 0x3ab   :  { %10188 = vst [vmem:[#allocation42_spill] sm:$0xff] %v8426_v56 }
 0x3ac   :  { %4026 = vmatpush1.bf16.msra.mxu0 %v8372_v49 }
 0x3ad   :  { %4027 = vmatprep.subr.bf16.mxu0 %v8376_v52  ;;  %4136 = vmatpush1.bf16.msra.mxu1 %v8390_v62  ;;  %v8417_v62 = vld [vmem:[#allocation11 + $0x184] ss:$48 sps:$4 sm:$0xff]  }
 0x3ae   :  { %4137 = vmatprep.subr.bf16.mxu1 %v8393_v0  ;;  %v8414_v0 = vld [vmem:[#allocation11 + $0x120] ss:$48 sps:$4 sm:$0xff]   ;;  %10185 = vst [vmem:[#allocation39_spill] sm:$0xff] %v8417_v62 }
 0x3af   :  { %10184 = vst [vmem:[#allocation38_spill] sm:$0xff] %v8414_v0 }
 0x3b0   :  { %4028 = vmatpush1.bf16.msra.mxu0 %v8385_v59  ;;  %v8551_v59 = vld [vmem:[#allocation11 + $0x24c] ss:$48 sps:$4 sm:$0xff]  }
 0x3b1   :  { %4029 = vmatprep.subr.bf16.mxu0 %v8388_v60  ;;  %4138 = vmatpush1.bf16.msra.mxu1 %v8402_v13  ;;  %v8421_v13 = vld [vmem:[#allocation11 + $0x808] ss:$48 sps:$4 sm:$0xff]  }
 0x3b2   :  { %4139 = vmatprep.subr.bf16.mxu1 %v8405_v21  ;;  %10186 = vst [vmem:[#allocation40_spill] sm:$0xff] %v8421_v13  ;;  %v8424_v21 = vld [vmem:[#allocation11 + $0x86c] ss:$48 sps:$4 sm:$0xff]   ;;  %v8545_v60 = vld [vmem:[#allocation11 + $0x1e8] ss:$48 sps:$4 sm:$0xff]  }
 0x3b3   :  { %10187 = vst [vmem:[#allocation41_spill] sm:$0xff] %v8424_v21 }
 0x3b4   :  { %4030 = vmatpush1.bf16.msra.mxu0 %v8397_v10 }
 0x3b5   :  { %4031 = vmatprep.subr.bf16.mxu0 %v8400_v3  ;;  %4140 = vmatpush1.bf16.msra.mxu1 %v8414_v0 }
 0x3b6   :  { %4141 = vmatprep.subr.bf16.mxu1 %v8417_v62 }
 0x3b8   :  { %4032 = vmatpush1.bf16.msra.mxu0 %v8409_v26 }
 0x3b9   :  { %4033 = vmatprep.subr.bf16.mxu0 %v8412_v61  ;;  %4142 = vmatpush1.bf16.msra.mxu1 %v8426_v56  ;;  %v8445_v56 = vld [vmem:[#allocation11 + $0x244] ss:$48 sps:$4 sm:$0xff]   ;;  %v8531_v61 = vld [vmem:[#allocation11 + $0x1ec] ss:$48 sps:$4 sm:$0xff]  }
 0x3ba   :  { %v8429_v55 = vpop.f32.mrb[64].mxu0  ;;  %4143 = vmatprep.subr.bf16.mxu1 %v8431_v43  ;;  %10193 = vst [vmem:[#allocation47_spill] sm:$0xff] %v8445_v56  ;;  %v8452_v43 = vld [vmem:[#allocation11 + $0x240] ss:$48 sps:$4 sm:$0xff]   ;;  %10220 = vst [vmem:[#allocation73_spill] sm:$0xff] %v8531_v61 }
 0x3bb   :  { %v8434_v0 = vpop.f32.mrb[65].mxu0  ;;  %10195 = vst [vmem:[#allocation49_spill] sm:$0xff] %v8452_v43 }
 0x3bc   :  { %v3733_v62 = vpop.f32.mrb[66].mxu0  ;;  %4034 = vmatpush1.bf16.msra.mxu0 %v8421_v13  ;;  %v8516_v13 = vld [vmem:[#allocation11 + $0x18c] ss:$48 sps:$4 sm:$0xff]  }
 0x3bd   :  { %v3734_v46 = vpop.f32.mrb[67].mxu0  ;;  %4035 = vmatprep.subr.bf16.mxu0 %v8424_v21  ;;  %4144 = vmatpush1.bf16.msra.mxu1 %v8442_v53  ;;  %v8449_v62 = vld [vmem:[#allocation11 + $0x8c8] ss:$48 sps:$4 sm:$0xff]   ;;  %v8459_v53 = vld [vmem:[#allocation11 + $0xc] ss:$48 sps:$4 sm:$0xff]   ;;  %10216 = vst [vmem:[#allocation69_spill] sm:$0xff] %v8516_v13 }
 0x3be   :  { %4145 = vmatprep.subr.bf16.mxu1 %v8445_v56  ;;  %10194 = vst [vmem:[#allocation48_spill] sm:$0xff] %v8449_v62  ;;  %v8455_v46 = vld [vmem:[#allocation11 + $0x2a4] ss:$48 sps:$4 sm:$0xff]   ;;  %10197 = vst [vmem:[#allocation51_spill] sm:$0xff] %v8459_v53  ;;  %v8462_v56 = vld [vmem:[#allocation11 + $0x2a0] ss:$48 sps:$4 sm:$0xff]  }
 0x3bf   :  { %10196 = vst [vmem:[#allocation50_spill] sm:$0xff] %v8455_v46  ;;  %10198 = vst [vmem:[#allocation52_spill] sm:$0xff] %v8462_v56  ;;  %v8508_v21 = vld [vmem:[#allocation11 + $0x424] ss:$48 sps:$4 sm:$0xff]  }
 0x3c0   :  { %4036 = vmatpush1.bf16.msra.mxu0 %v8437_v30  ;;  %v8465_v30 = vld [vmem:[#allocation11 + $0x304] ss:$48 sps:$4 sm:$0xff]   ;;  %10214 = vst [vmem:[#allocation67_spill] sm:$0xff] %v8508_v21 }
 0x3c1   :  { %4037 = vmatprep.subr.bf16.mxu0 %v8440_v45  ;;  %4146 = vmatpush1.bf16.msra.mxu1 %v8452_v43  ;;  %10199 = vst [vmem:[#allocation53_spill] sm:$0xff] %v8465_v30  ;;  %v10200_v45 = vmov 0   ;;  %v8469_v43 = vld [vmem:[#allocation11 + $0x8] ss:$48 sps:$4 sm:$0xff]  }
 0x3c2   :  { %4147 = vmatprep.subr.bf16.mxu1 %v8455_v46  ;;  %10201 = vst [vmem:[#allocation54_spill] sm:$0xff] %v8469_v43  ;;  %v8472_v46 = vld [vmem:[#allocation11 + $0x6c] ss:$48 sps:$4 sm:$0xff]  }
 0x3c3   :  { %10202 = vst [vmem:[#allocation55_spill] sm:$0xff] %v8472_v46 }
 0x3c4   :  { %4038 = vmatpush1.bf16.msra.mxu0 %v8449_v62  ;;  %v8475_v62 = vld [vmem:[#allocation11 + $0x300] ss:$48 sps:$4 sm:$0xff]  }
 0x3c5   :  { %4215 = vmatprep.subr.bf16.mxu0 %v8459_v53  ;;  %4148 = vmatpush1.bf16.msra.mxu1 %v8462_v56  ;;  %10203 = vst [vmem:[#allocation56_spill] sm:$0xff] %v8475_v62  ;;  %v8478_v53 = vld [vmem:[#allocation11 + $0x364] ss:$48 sps:$4 sm:$0xff]   ;;  %v8481_v56 = vld [vmem:[#allocation11 + $0x68] ss:$48 sps:$4 sm:$0xff]  }
 0x3c6   :  { %4149 = vmatprep.subr.bf16.mxu1 %v8465_v30  ;;  %10204 = vst [vmem:[#allocation57_spill] sm:$0xff] %v8478_v53  ;;  %10205 = vst [vmem:[#allocation58_spill] sm:$0xff] %v8481_v56  ;;  %v8484_v30 = vld [vmem:[#allocation11 + $0xcc] ss:$48 sps:$4 sm:$0xff]  }
 0x3c7   :  { %4056 = vmatmul.mubr.bf16.vlgmr.msra.gmra.mrb[20].mxu0 %v10200_v45  ;;  %10206 = vst [vmem:[#allocation59_spill] sm:$0xff] %v8484_v30 }
 0x3c8   :  { %4216 = vmatpush1.bf16.msra.mxu0 %v8469_v43  ;;  %v8487_v43 = vld [vmem:[#allocation11 + $0x360] ss:$48 sps:$4 sm:$0xff]  }
 0x3c9   :  { %4217 = vmatprep.subr.bf16.mxu0 %v8472_v46  ;;  %4150 = vmatpush1.bf16.msra.mxu1 %v8475_v62  ;;  %10207 = vst [vmem:[#allocation60_spill] sm:$0xff] %v8487_v43  ;;  %v8490_v46 = vld [vmem:[#allocation11 + $0x3c4] ss:$48 sps:$4 sm:$0xff]   ;;  %v8493_v62 = vld [vmem:[#allocation11 + $0xc8] ss:$48 sps:$4 sm:$0xff]  }
 0x3ca   :  { %4151 = vmatprep.subr.bf16.mxu1 %v8478_v53  ;;  %10208 = vst [vmem:[#allocation61_spill] sm:$0xff] %v8490_v46  ;;  %10209 = vst [vmem:[#allocation62_spill] sm:$0xff] %v8493_v62  ;;  %v8497_v53 = vsub.s32 2, %v8075_v41 }
 0x3cc   :  { %4218 = vmatpush1.bf16.msra.mxu0 %v8481_v56  ;;  %10210 = vst [vmem:[#allocation63_spill] sm:$0xff] %v8497_v53  ;;  %v8499_v56 = vld [vmem:[#allocation11 + $0x12c] ss:$48 sps:$4 sm:$0xff]  }
 0x3cd   :  { %4219 = vmatprep.subr.bf16.mxu0 %v8484_v30  ;;  %4152 = vmatpush1.bf16.msra.mxu1 %v8487_v43  ;;  %10211 = vst [vmem:[#allocation64_spill] sm:$0xff] %v8499_v56  ;;  %v8502_v30 = vld [vmem:[#allocation11 + $0x3c0] ss:$48 sps:$4 sm:$0xff]   ;;  %v8506_v43 = vsub.s32 3, %v8075_v41 }
 0x3ce   :  { %4153 = vmatprep.subr.bf16.mxu1 %v8490_v46  ;;  %10212 = vst [vmem:[#allocation65_spill] sm:$0xff] %v8502_v30  ;;  %v8511_v46 = vld [vmem:[#allocation11 + $0x128] ss:$48 sps:$4 sm:$0xff]  }
 0x3cf   :  { %10213 = vst [vmem:[#allocation66_spill] sm:$0xff] %v8506_v43  ;;  %10215 = vst [vmem:[#allocation68_spill] sm:$0xff] %v8511_v46 }
 0x3d0   :  { %4220 = vmatpush1.bf16.msra.mxu0 %v8493_v62  ;;  %v362_v62 = vrot.slane %v8306_v38, %v8497_v53 }
 0x3d1   :  { %4221 = vmatprep.subr.bf16.mxu0 %v8499_v56  ;;  %4154 = vmatpush1.bf16.msra.mxu1 %v8502_v30  ;;  %v8519_v56 = vld [vmem:[#allocation11 + $0x420] ss:$48 sps:$4 sm:$0xff]   ;;  %v366_v30 = vrot.slane %v8306_v38, %v8506_v43 }
 0x3d2   :  { %4155 = vmatprep.subr.bf16.mxu1 %v8508_v21  ;;  %10217 = vst [vmem:[#allocation70_spill] sm:$0xff] %v8519_v56  ;;  %v8527_v21 = vld [vmem:[#allocation11 + $0x188] ss:$48 sps:$4 sm:$0xff]  }
 0x3d3   :  { %10219 = vst [vmem:[#allocation72_spill] sm:$0xff] %v8527_v21 }
 0x3d4   :  { %4222 = vmatpush1.bf16.msra.mxu0 %v8511_v46  ;;  %v936_v46 = vadd.f32 %v8247_v57, %v362_v62 }
 0x3d5   :  { %4223 = vmatprep.subr.bf16.mxu0 %v8516_v13  ;;  %4156 = vmatpush1.bf16.msra.mxu1 %v8519_v56  ;;  %v8534_v13 = vld [vmem:[#allocation11 + $0x480] ss:$48 sps:$4 sm:$0xff]   ;;  %v938_v56 = vadd.f32 %v8249_v58, %v366_v30 }
 0x3d6   :  { %4157 = vmatprep.subr.bf16.mxu1 %v8524_v50  ;;  %10221 = vst [vmem:[#allocation74_spill] sm:$0xff] %v8534_v13  ;;  %v8540_v50 = vld [vmem:[#allocation11 + $0x4e4] ss:$48 sps:$4 sm:$0xff]  }
 0x3d7   :  { %10222 = vst [vmem:[#allocation75_spill] sm:$0xff] %v8540_v50 }
 0x3d8   :  { %4224 = vmatpush1.bf16.msra.mxu0 %v8527_v21 }
 0x3d9   :  { %4225 = vmatprep.subr.bf16.mxu0 %v8531_v61  ;;  %4158 = vmatpush1.bf16.msra.mxu1 %v8534_v13 }
 0x3da   :  { %v3688_v47 = vpop.f32.mrb[48].mxu1  ;;  %v8538_v26 = vpop.f32.mrb[68].mxu0  ;;  %4159 = vmatprep.subr.bf16.mxu1 %v8540_v50  ;;  %v8614_v50 = vld [vmem:[#allocation11 + $0x60c] ss:$48 sps:$4 sm:$0xff]  }
 0x3db   :  { %v6341_v21 = vadd.f32 %v3688_v47, %v936_v46  ;;  %v3690_v3 = vpop.f32.mrb[49].mxu1  ;;  %v8543_v57 = vpop.f32.mrb[69].mxu0  ;;  %v8554_v47 = vld [vmem:[#allocation11 + $0x4e0] ss:$48 sps:$4 sm:$0xff]   ;;  %10236 = vst [vmem:[#allocation89_spill] sm:$0xff] %v8614_v50 }
 0x3dc   :  { %v6344_v62 = vadd.f32 %v3690_v3, %v938_v56  ;;  %v3815_v10 = vpop.f32.mrb[70].mxu0  ;;  %v3692_v61 = vpop.f32.mrb[50].mxu1  ;;  %4226 = vmatpush1.bf16.msra.mxu0 %v8545_v60  ;;  %10223 = vst [vmem:[#allocation76_spill] sm:$0xff] %v8554_v47  ;;  %v8567_v3 = vld [vmem:[#allocation11 + $0x540] ss:$48 sps:$4 sm:$0xff]  }
 0x3dd   :  { %v8549_v58 = vadd.f32 %v6341_v21, %v8429_v55  ;;  %v3816_v30 = vpop.f32.mrb[71].mxu0  ;;  %v3693_v13 = vpop.f32.mrb[51].mxu1  ;;  %4227 = vmatprep.subr.bf16.mxu0 %v8551_v59  ;;  %4160 = vmatpush1.bf16.msra.mxu1 %v8554_v47  ;;  %v8558_v61 = vld [vmem:[#allocation11 + $0x544] ss:$48 sps:$4 sm:$0xff]   ;;  %v8561_v10 = vld [vmem:[#allocation11 + $0x248] ss:$48 sps:$4 sm:$0xff]  }
 0x3de   :  { %v6345_v56 = vadd.f32 %v6344_v62, %v8434_v0  ;;  %10224 = vst [vmem:[#allocation77_spill] sm:$0xff] %v8558_v61  ;;  %4161 = vmatprep.subr.bf16.mxu1 %v8558_v61  ;;  %v8564_v55 = vld [vmem:[#allocation11 + $0x2ac] ss:$48 sps:$4 sm:$0xff]   ;;  %10225 = vst [vmem:[#allocation78_spill] sm:$0xff] %v8567_v3  ;;  %v8570_v13 = vld [vmem:[#allocation11 + $0x5a4] ss:$48 sps:$4 sm:$0xff]  }
 0x3df   :  { %10226 = vst [vmem:[#allocation79_spill] sm:$0xff] %v8570_v13  ;;  %v8573_v0 = vld [vmem:[#allocation11 + $0x2a8] ss:$48 sps:$4 sm:$0xff]   ;;  %v8576_v21 = vld [vmem:[#allocation11 + $0x30c] ss:$48 sps:$4 sm:$0xff]  }
 0x3e0   :  { %4228 = vmatpush1.bf16.msra.mxu0 %v8561_v10  ;;  %v8579_v46 = vld [vmem:[#allocation11 + $0x5a0] ss:$48 sps:$4 sm:$0xff]   ;;  %v8582_v62 = vld [vmem:[#allocation11 + $0x604] ss:$48 sps:$4 sm:$0xff]   ;;  %v8585_v30 = vld [vmem:[#allocation11 + $0x308] ss:$48 sps:$4 sm:$0xff]  }
 0x3e1   :  { %4229 = vmatprep.subr.bf16.mxu0 %v8564_v55  ;;  %4162 = vmatpush1.bf16.msra.mxu1 %v8567_v3  ;;  %10227 = vst [vmem:[#allocation80_spill] sm:$0xff] %v8579_v46  ;;  %10228 = vst [vmem:[#allocation81_spill] sm:$0xff] %v8582_v62  ;;  %v8591_v3 = vld [vmem:[#allocation11 + $0x368] ss:$48 sps:$4 sm:$0xff]   ;;  %v8594_v61 = vld [vmem:[#allocation11 + $0x3cc] ss:$48 sps:$4 sm:$0xff]  }
 0x3e2   :  { %4163 = vmatprep.subr.bf16.mxu1 %v8570_v13  ;;  %10229 = vst [vmem:[#allocation82_spill] sm:$0xff] %v8585_v30  ;;  %v8588_v13 = vld [vmem:[#allocation11 + $0x36c] ss:$48 sps:$4 sm:$0xff]   ;;  %10231 = vst [vmem:[#allocation84_spill] sm:$0xff] %v8591_v3  ;;  %v8603_v47 = vld [vmem:[#allocation11 + $0x428] ss:$48 sps:$4 sm:$0xff]  }
 0x3e3   :  { %10230 = vst [vmem:[#allocation83_spill] sm:$0xff] %v8588_v13  ;;  %10232 = vst [vmem:[#allocation85_spill] sm:$0xff] %v8594_v61 }
 0x3e4   :  { %4230 = vmatpush1.bf16.msra.mxu0 %v8573_v0  ;;  %10235 = vst [vmem:[#allocation88_spill] sm:$0xff] %v8603_v47 }
 0x3e5   :  { %4231 = vmatprep.subr.bf16.mxu0 %v8576_v21  ;;  %4164 = vmatpush1.bf16.msra.mxu1 %v8579_v46  ;;  %v8597_v46 = vld [vmem:[#allocation11 + $0x3c8] ss:$48 sps:$4 sm:$0xff]  }
 0x3e6   :  { %4174 = vmatprep.subr.bf16.mxu1 %v8582_v62  ;;  %10233 = vst [vmem:[#allocation86_spill] sm:$0xff] %v8597_v46  ;;  %v8600_v62 = vld [vmem:[#allocation11 + $0x42c] ss:$48 sps:$4 sm:$0xff]  }
 0x3e7   :  { %10234 = vst [vmem:[#allocation87_spill] sm:$0xff] %v8600_v62 }
 0x3e8   :  { %4232 = vmatpush1.bf16.msra.mxu0 %v8585_v30 }
 0x3e9   :  { %4233 = vmatprep.subr.bf16.mxu0 %v8588_v13  ;;  %v4088_v13 = vmul.f32 0.5, %v6345_v56 }
 0x3eb   :  { %7057 = vtanh.f32 %v4088_v13 }
 0x3ec   :  { %4234 = vmatpush1.bf16.msra.mxu0 %v8591_v3 }
 0x3ed   :  { %4235 = vmatprep.subr.bf16.mxu0 %v8594_v61 }
 0x3f0   :  { %4236 = vmatpush1.bf16.msra.mxu0 %v8597_v46 }
 0x3f1   :  { %4237 = vmatprep.subr.bf16.mxu0 %v8600_v62 }
 0x3f4   :  { %4238 = vmatpush1.bf16.msra.mxu0 %v8603_v47 }
 0x3f5   :  { %4239 = vmatprep.subr.bf16.mxu0 %v8215_v7  ;;  %v8618_v7 = vsub.s32 4, %v8075_v41 }
 0x3f7   :  { %10237 = vst [vmem:[#allocation90_spill] sm:$0xff] %v8618_v7 }
 0x3f8   :  { %4240 = vmatpush1.bf16.msra.mxu0 %v8217_v9  ;;  %v8621_v9 = vsub.s32 5, %v8075_v41 }
 0x3f9   :  { %4241 = vmatprep.subr.bf16.mxu0 %v8220_v12  ;;  %v370_v12 = vrot.slane %v8306_v38, %v8618_v7  ;;  %v4076_v7 = vmul.f32 0.5, %v8339_v17 }
 0x3fa   :  { %10238 = vst [vmem:[#allocation91_spill] sm:$0xff] %v8621_v9 }
 0x3fc   :  { %4242 = vmatpush1.bf16.msra.mxu0 %v8223_v14  ;;  %v374_v14 = vrot.slane %v8306_v38, %v8621_v9  ;;  %v4077_v9 = vmul.f32 0.5, %v8347_v28 }
 0x3fd   :  { %4243 = vmatprep.subr.bf16.mxu0 %v8226_v16  ;;  %v977_v16 = vadd.f32 %v8251_v5, %v370_v12  ;;  %v8634_v5 = vsub.s32 6, %v8075_v41 }
 0x3ff   :  { %10239 = vst [vmem:[#allocation92_spill] sm:$0xff] %v8634_v5 }
 0x400   :  { %4244 = vmatpush1.bf16.msra.mxu0 %v8229_v18  ;;  %v979_v18 = vadd.f32 %v8253_v6, %v374_v14  ;;  %v8637_v6 = vsub.s32 7, %v8075_v41 }
 0x401   :  { %4245 = vmatprep.subr.bf16.mxu0 %v8232_v20 }
 0x402   :  { %10240 = vst [vmem:[#allocation93_spill] sm:$0xff] %v8637_v6 }
 0x404   :  { %4246 = vmatpush1.bf16.msra.mxu0 %v8235_v22 }
 0x405   :  { %4256 = vmatprep.subr.bf16.mxu0 %v8614_v50 }
 0x41a   :  { %v3770_v20 = vpop.f32.mrb[52].mxu1 }
 0x41b   :  { %v6347_v22 = vadd.f32 %v3770_v20, %v977_v16  ;;  %v3772_v47 = vpop.f32.mrb[53].mxu1 }
 0x41c   :  { %v6350_v50 = vadd.f32 %v3772_v47, %v979_v18  ;;  %v3774_v62 = vpop.f32.mrb[54].mxu1 }
 0x41d   :  { %v6348_v46 = vadd.f32 %v6347_v22, %v8538_v26  ;;  %v3775_v61 = vpop.f32.mrb[55].mxu1  ;;  %v378_v26 = vrot.slane %v8306_v38, %v8634_v5 }
 0x41e   :  { %v6351_v3 = vadd.f32 %v6350_v50, %v8543_v57  ;;  %v382_v50 = vrot.slane %v8306_v38, %v8637_v6  ;;  %v7058_v61 = vpop.eup %7057 }
 0x41f   :  { %v4089_v30 = vmul.f32 0.5, %v6348_v46 }
 0x421   :  { %7059 = vtanh.f32 %v4089_v30  ;;  %v4094_v30 = vadd.f32 1.0, %v7058_v61  ;;  %v4078_v61 = vmul.f32 0.5, %v8549_v58 }
 0x422   :  { %7061 = vtanh.f32 %v4076_v7 }
 0x423   :  { %7063 = vtanh.f32 %v4077_v9  ;;  %v4097_v14 = vmul.f32 0.5, %v4094_v30 }
 0x42b   :  { %v7060_v46 = vpop.eup %7059 }
 0x42c   :  { %v7062_v41 = vpop.eup %7061  ;;  %v4095_v7 = vadd.f32 1.0, %v7060_v46 }
 0x42d   :  { %v7064_v62 = vpop.eup %7063  ;;  %v4082_v9 = vadd.f32 1.0, %v7062_v41 }
 0x42e   :  { %v4083_v12 = vadd.f32 1.0, %v7064_v62  ;;  %v4098_v16 = vmul.f32 0.5, %v4095_v7 }
 0x42f   :  { %v4085_v18 = vmul.f32 0.5, %v4082_v9 }
 0x430   :  { %v4086_v20 = vmul.f32 0.5, %v4083_v12 }
 0x43a   :  { %v3893_v57 = vpop.f32.mrb[16].mxu0 }
 0x43b   :  { %v6352_v17 = vadd.f32 %v3893_v57, %v378_v26  ;;  %v3895_v47 = vpop.f32.mrb[17].mxu0  ;;  %v4115_v26 = vmul.f32 0.0, %v4097_v14  ;;  %v4116_v57 = vmul.f32 0.0, %v4098_v16 }
 0x43c   :  { %v6353_v28 = vadd.f32 %v3895_v47, %v382_v50  ;;  %v3897_v56 = vpop.f32.mrb[18].mxu0 }
 0x43d   :  { %7065 = vtanh.f32 %v6352_v17  ;;  %v3898_v13 = vpop.f32.mrb[19].mxu0 }
 0x43e   :  { %7067 = vtanh.f32 %v6353_v28  ;;  %v4090_v28 = vmul.f32 0.5, %v6351_v3  ;;  %v8648_v13 = vld [vmem:[#allocation10 + $0x8] sm:$0xff] }
 0x43f   :  { %v386_v46 = vrot.slane %v8648_v13, %v8078_v42 }
 0x440   :  { %7069 = vtanh.f32 %v4090_v28  ;;  %v394_v28 = vrot.slane %v8648_v13, %v8497_v53 }
 0x441   :  { %7071 = vtanh.f32 %v4078_v61 }
 0x447   :  { %v7066_v38 = vpop.eup %7065 }
 0x448   :  { %v7068_v22 = vpop.eup %7067  ;;  %v4118_v50 = vmul.f32 %v7066_v38, %v4085_v18 }
 0x449   :  { %v4119_v47 = vmul.f32 %v7068_v22, %v4086_v20 }
 0x44a   :  { %v8643_v17 = vadd.f32 %v4118_v50, %v4115_v26  ;;  %v7070_v9 = vpop.eup %7069  ;;  %v390_v50 = vrot.slane %v8648_v13, %v8081_v44 }
 0x44b   :  { %v8645_v56 = vadd.f32 %v4119_v47, %v4116_v57  ;;  %v7072_v14 = vpop.eup %7071  ;;  %v4096_v16 = vadd.f32 1.0, %v7070_v9 }
 0x44c   :  { %v4084_v18 = vadd.f32 1.0, %v7072_v14 }
 0x44d   :  { %v4099_v3 = vmul.f32 0.5, %v4096_v16 }
 0x44e   :  { %v4087_v38 = vmul.f32 0.5, %v4084_v18 }
 0x44f   :  { %v4117_v20 = vmul.f32 0.0, %v4099_v3 }
 0x47a   :  { %v3975_v41 = vpop.f32.mrb[4].mxu1 }
 0x47b   :  { %v6354_v62 = vadd.f32 %v3975_v41, %v386_v46  ;;  %v3977_v30 = vpop.f32.mrb[5].mxu1 }
 0x47c   :  { %v3979_v7 = vpop.f32.mrb[6].mxu1  ;;  %v6355_v57 = vadd.f32 %v3977_v30, %v390_v50 }
 0x47d   :  { %7073 = vtanh.f32 %v6354_v62  ;;  %v3980_v12 = vpop.f32.mrb[7].mxu1 }
 0x47e   :  { %v4103_v47 = vmul.f32 0.5, %v6355_v57 }
 0x480   :  { %7075 = vtanh.f32 %v4103_v47 }
 0x487   :  { %v7074_v58 = vpop.eup %7073 }
 0x488   :  { %v4120_v22 = vmul.f32 %v7074_v58, %v4087_v38  ;;  %v398_v58 = vrot.slane %v8648_v13, %v8506_v43 }
 0x48a   :  { %v8652_v26 = vadd.f32 %v4120_v22, %v4117_v20  ;;  %v7076_v12 = vpop.eup %7075 }
 0x48b   :  { %v4109_v14 = vadd.f32 1.0, %v7076_v12  ;;  %v8687_v12 = vld [vmem:[#allocation11 + $0x668] ss:$48 sps:$4 sm:$0xff]  }
 0x48d   :  { %v4112_v30 = vmul.f32 0.5, %v4109_v14  ;;  %v8690_v14 = vld [vmem:[#allocation11 + $0x6c4] ss:$48 sps:$4 sm:$0xff]  }
 0x49a   :  { %v4057_v61 = vpop.f32.mrb[20].mxu0 }
 0x49b   :  { %v6356_v46 = vadd.f32 %v4057_v61, %v394_v28  ;;  %v4059_v41 = vpop.f32.mrb[21].mxu0 }
 0x49c   :  { %v4061_v62 = vpop.f32.mrb[22].mxu0  ;;  %v6357_v47 = vadd.f32 %v4059_v41, %v398_v58  ;;  %v8676_v41 = vld [vmem:[#allocation11 + $0x664] ss:$48 sps:$4 sm:$0xff]   ;;  %v8708_v58 = vld [vmem:[#allocation11 + $0x720] ss:$48 sps:$4 sm:$0xff]  }
 0x49d   :  { %v4104_v7 = vmul.f32 0.5, %v6356_v46  ;;  %v4062_v9 = vpop.f32.mrb[23].mxu0  ;;  %v8670_v46 = vld [vmem:[#allocation11 + $0x600] ss:$48 sps:$4 sm:$0xff]   ;;  %v8673_v62 = vld [vmem:[#allocation11 + $0x608] ss:$48 sps:$4 sm:$0xff]  }
 0x49e   :  { %v4105_v61 = vmul.f32 0.5, %v6357_v47  ;;  %v8684_v9 = vld [vmem:[#allocation11 + $0x660] ss:$48 sps:$4 sm:$0xff]   ;;  %10244 = vst [vmem:[#allocation97_spill] sm:$0xff] %v8708_v58 }
 0x49f   :  { %7077 = vtanh.f32 %v4104_v7  ;;  %v8679_v7 = vld [vmem:[#allocation11 + $0x66c] ss:$48 sps:$4 sm:$0xff]  }
 0x4a0   :  { %7079 = vtanh.f32 %v8643_v17 }
 0x4a1   :  { %7081 = vtanh.f32 %v8645_v56 }
 0x4a2   :  { %7083 = vtanh.f32 %v4105_v61  ;;  %v8721_v61 = vld [vmem:[#allocation11 + $0x780] ss:$48 sps:$4 sm:$0xff]  }
 0x4a3   :  { %7085 = vtanh.f32 %v8652_v26  ;;  %10248 = vst [vmem:[#allocation101_spill] sm:$0xff] %v8721_v61 }
 0x4a9   :  { %v7078_v16 = vpop.eup %7077 }
 0x4aa   :  { %v4110_v18 = vadd.f32 1.0, %v7078_v16  ;;  %v7080_v3 = vpop.eup %7079  ;;  %v8693_v16 = vld [vmem:[#allocation11 + $0x6cc] ss:$48 sps:$4 sm:$0xff]  }
 0x4ab   :  { %v7082_v20 = vpop.eup %7081  ;;  %v4127_v22 = vmul.f32 %v7080_v3, %v4112_v30  ;;  %v8696_v30 = vld [vmem:[#allocation11 + $0x6c0] ss:$48 sps:$4 sm:$0xff]   ;;  %v8702_v3 = vld [vmem:[#allocation11 + $0x724] ss:$48 sps:$4 sm:$0xff]  }
 0x4ac   :  { %v4113_v38 = vmul.f32 0.5, %v4110_v18  ;;  %v8699_v18 = vld [vmem:[#allocation11 + $0x6c8] ss:$48 sps:$4 sm:$0xff]   ;;  %10242 = vst [vmem:[#allocation95_spill] sm:$0xff] %v8702_v3  ;;  %v7084_v47 = vpop.eup %7083 }
 0x4ad   :  { %v8664_v28 = vpack.c.bf16 %v4127_v22, %v4127_v22  ;;  %10241 = vst [vmem:[#allocation94_spill] sm:$0xff] %v8699_v18  ;;  %v8714_v22 = vld [vmem:[#allocation11 + $0x784] ss:$48 sps:$4 sm:$0xff]  }
 0x4ae   :  { %v4128_v50 = vmul.f32 %v7082_v20, %v4113_v38  ;;  %v8705_v38 = vld [vmem:[#allocation11 + $0x72c] ss:$48 sps:$4 sm:$0xff]   ;;  %v8711_v20 = vld [vmem:[#allocation11 + $0x728] ss:$48 sps:$4 sm:$0xff]   ;;  %10246 = vst [vmem:[#allocation99_spill] sm:$0xff] %v8714_v22 }
 0x4af   :  { %10243 = vst [vmem:[#allocation96_spill] sm:$0xff] %v8705_v38  ;;  %10245 = vst [vmem:[#allocation98_spill] sm:$0xff] %v8711_v20 }
 0x4b0   :  { %v8662_v57 = vpack.c.bf16 %v4128_v50, %v4128_v50  ;;  %v8717_v50 = vld [vmem:[#allocation11 + $0x78c] ss:$48 sps:$4 sm:$0xff]  }
 0x4b1   :  { %10247 = vst [vmem:[#allocation100_spill] sm:$0xff] %v8717_v50 }
 0x4b2   :  { %4165 = vmatprep.mubr.bf16.mxu1 %v8662_v57  ;;  %4247 = vmatprep.mubr.bf16.mxu0 %v8662_v57 }
 0x4b3   :  { %4166 = vmatmul.mubr.bf16.vlgmr.msra.gmra.mrb[8].mxu1 %v8664_v28  ;;  %4248 = vmatmul.mubr.bf16.vlgmr.msra.gmra.mrb[24].mxu0 %v8664_v28 }
 0x4b4   :  { %4175 = vmatpush1.bf16.msra.mxu1 %v8670_v46  ;;  %4257 = vmatpush1.bf16.msra.mxu0 %v8673_v62 }
 0x4b5   :  { %4176 = vmatprep.subr.bf16.mxu1 %v8676_v41  ;;  %4258 = vmatprep.subr.bf16.mxu0 %v8679_v7 }
 0x4b6   :  { %4206 = vmatprep.mubr.bf16.mxu1 %v10200_v45  ;;  %4288 = vmatprep.mubr.bf16.mxu0 %v10200_v45 }
 0x4b8   :  { %4177 = vmatpush1.bf16.msra.mxu1 %v8684_v9  ;;  %4259 = vmatpush1.bf16.msra.mxu0 %v8687_v12 }
 0x4b9   :  { %4178 = vmatprep.subr.bf16.mxu1 %v8690_v14  ;;  %4260 = vmatprep.subr.bf16.mxu0 %v8693_v16 }
 0x4bc   :  { %4179 = vmatpush1.bf16.msra.mxu1 %v8696_v30  ;;  %4261 = vmatpush1.bf16.msra.mxu0 %v8699_v18  ;;  %v8739_v18 = vld [vmem:[#allocation11 + $0x844] ss:$48 sps:$4 sm:$0xff]  }
 0x4bd   :  { %4180 = vmatprep.subr.bf16.mxu1 %v8702_v3  ;;  %4262 = vmatprep.subr.bf16.mxu0 %v8705_v38  ;;  %v8727_v38 = vld [vmem:[#allocation11 + $0x7e4] ss:$48 sps:$4 sm:$0xff]   ;;  %v8736_v3 = vld [vmem:[#allocation11 + $0x7e8] ss:$48 sps:$4 sm:$0xff]   ;;  %10254 = vst [vmem:[#allocation107_spill] sm:$0xff] %v8739_v18 }
 0x4be   :  { %10250 = vst [vmem:[#allocation103_spill] sm:$0xff] %v8727_v38  ;;  %10253 = vst [vmem:[#allocation106_spill] sm:$0xff] %v8736_v3 }
 0x4c0   :  { %4181 = vmatpush1.bf16.msra.mxu1 %v8708_v58  ;;  %4263 = vmatpush1.bf16.msra.mxu0 %v8711_v20  ;;  %v8724_v58 = vld [vmem:[#allocation11 + $0x788] ss:$48 sps:$4 sm:$0xff]   ;;  %v4111_v20 = vadd.f32 1.0, %v7084_v47  ;;  %v8742_v47 = vld [vmem:[#allocation11 + $0x84c] ss:$48 sps:$4 sm:$0xff]  }
 0x4c1   :  { %4182 = vmatprep.subr.bf16.mxu1 %v8714_v22  ;;  %4264 = vmatprep.subr.bf16.mxu0 %v8717_v50  ;;  %10249 = vst [vmem:[#allocation102_spill] sm:$0xff] %v8724_v58  ;;  %v8730_v22 = vld [vmem:[#allocation11 + $0x7ec] ss:$48 sps:$4 sm:$0xff]   ;;  %v8733_v50 = vld [vmem:[#allocation11 + $0x7e0] ss:$48 sps:$4 sm:$0xff]   ;;  %10255 = vst [vmem:[#allocation108_spill] sm:$0xff] %v8742_v47 }
 0x4c2   :  { %10251 = vst [vmem:[#allocation104_spill] sm:$0xff] %v8730_v22  ;;  %10252 = vst [vmem:[#allocation105_spill] sm:$0xff] %v8733_v50 }
 0x4c4   :  { %4183 = vmatpush1.bf16.msra.mxu1 %v8721_v61  ;;  %4265 = vmatpush1.bf16.msra.mxu0 %v8724_v58  ;;  %v4114_v61 = vmul.f32 0.5, %v4111_v20  ;;  %v8745_v58 = vld [vmem:[#allocation11 + $0x840] ss:$48 sps:$4 sm:$0xff]   ;;  %v8754_v20 = vld [vmem:[#allocation11 + $0x8ac] ss:$48 sps:$4 sm:$0xff]  }
 0x4c5   :  { %4184 = vmatprep.subr.bf16.mxu1 %v8727_v38  ;;  %4266 = vmatprep.subr.bf16.mxu0 %v8730_v22  ;;  %v7086_v38 = vpop.eup %7085  ;;  %10256 = vst [vmem:[#allocation109_spill] sm:$0xff] %v8745_v58  ;;  %v8748_v22 = vld [vmem:[#allocation11 + $0x848] ss:$48 sps:$4 sm:$0xff]  }
 0x4c6   :  { %10257 = vst [vmem:[#allocation110_spill] sm:$0xff] %v8748_v22 }
 0x4c8   :  { %4185 = vmatpush1.bf16.msra.mxu1 %v8733_v50  ;;  %4267 = vmatpush1.bf16.msra.mxu0 %v8736_v3  ;;  %v4129_v50 = vmul.f32 %v7086_v38, %v4114_v61  ;;  %v8751_v3 = vld [vmem:[#allocation11 + $0x8a4] ss:$48 sps:$4 sm:$0xff]   ;;  %v8768_v38 = vld [vmem:[#allocation11 + $0x1c] ss:$48 sps:$4 sm:$0xff]   ;;  %v8773_v61 = vld [vmem:[#allocation11 + $0x10] ss:$48 sps:$4 sm:$0xff]  }
 0x4c9   :  { %4186 = vmatprep.subr.bf16.mxu1 %v8739_v18  ;;  %4268 = vmatprep.subr.bf16.mxu0 %v8742_v47  ;;  %v8757_v18 = vld [vmem:[#allocation11 + $0x8a0] ss:$48 sps:$4 sm:$0xff]   ;;  %v8760_v47 = vld [vmem:[#allocation11 + $0x8a8] ss:$48 sps:$4 sm:$0xff]   ;;  %10261 = vst [vmem:[#allocation114_spill] sm:$0xff] %v8768_v38  ;;  %10262 = vst [vmem:[#allocation115_spill] sm:$0xff] %v8773_v61 }
 0x4ca   :  { %10258 = vst [vmem:[#allocation111_spill] sm:$0xff] %v8757_v18  ;;  %10259 = vst [vmem:[#allocation112_spill] sm:$0xff] %v8760_v47 }
 0x4cc   :  { %4187 = vmatpush1.bf16.msra.mxu1 %v8745_v58  ;;  %4269 = vmatpush1.bf16.msra.mxu0 %v8748_v22  ;;  %v8763_v58 = vpack.c.bf16 %v4129_v50, %v4129_v50  ;;  %v8765_v22 = vld [vmem:[#allocation11 + $0x14] ss:$48 sps:$4 sm:$0xff]   ;;  %v8777_v50 = vld [vmem:[#allocation11 + $0x18] ss:$48 sps:$4 sm:$0xff]  }
 0x4cd   :  { %4188 = vmatprep.subr.bf16.mxu1 %v8751_v3  ;;  %4270 = vmatprep.subr.bf16.mxu0 %v8754_v20  ;;  %10260 = vst [vmem:[#allocation113_spill] sm:$0xff] %v8765_v22  ;;  %10263 = vst [vmem:[#allocation116_spill] sm:$0xff] %v8777_v50 }
 0x4d0   :  { %4189 = vmatpush1.bf16.msra.mxu1 %v8757_v18  ;;  %4271 = vmatpush1.bf16.msra.mxu0 %v8760_v47  ;;  %v8787_v47 = vld [vmem:[#allocation11 + $0x70] ss:$48 sps:$4 sm:$0xff]   ;;  %v8793_v18 = vld [vmem:[#allocation11 + $0xd4] ss:$48 sps:$4 sm:$0xff]  }
 0x4d1   :  { %4297 = vmatprep.subr.bf16.mxu1 %v8765_v22  ;;  %4379 = vmatprep.subr.bf16.mxu0 %v8768_v38  ;;  %v8781_v22 = vld [vmem:[#allocation11 + $0x74] ss:$48 sps:$4 sm:$0xff]   ;;  %v8784_v38 = vld [vmem:[#allocation11 + $0x7c] ss:$48 sps:$4 sm:$0xff]   ;;  %10266 = vst [vmem:[#allocation119_spill] sm:$0xff] %v8787_v47  ;;  %10268 = vst [vmem:[#allocation121_spill] sm:$0xff] %v8793_v18 }
 0x4d2   :  { %10264 = vst [vmem:[#allocation117_spill] sm:$0xff] %v8781_v22  ;;  %10265 = vst [vmem:[#allocation118_spill] sm:$0xff] %v8784_v38 }
 0x4d3   :  { %4207 = vmatmul.mubr.bf16.vlgmr.msra.gmra.mrb[8].mxu1 %v8763_v58  ;;  %4289 = vmatmul.mubr.bf16.vlgmr.msra.gmra.mrb[24].mxu0 %v8763_v58 }
 0x4d4   :  { %4298 = vmatpush1.bf16.msra.mxu1 %v8773_v61  ;;  %4329 = vmatprep.mubr.bf16.mxu1 %v8662_v57  ;;  %v8790_v61 = vld [vmem:[#allocation11 + $0x78] ss:$48 sps:$4 sm:$0xff]  }
 0x4d5   :  { %4380 = vmatpush1.bf16.msra.mxu0 %v8777_v50  ;;  %4411 = vmatprep.mubr.bf16.mxu0 %v8662_v57  ;;  %10267 = vst [vmem:[#allocation120_spill] sm:$0xff] %v8790_v61  ;;  %v8796_v50 = vld [vmem:[#allocation11 + $0xdc] ss:$48 sps:$4 sm:$0xff]  }
 0x4d6   :  { %4299 = vmatprep.subr.bf16.mxu1 %v8781_v22  ;;  %4381 = vmatprep.subr.bf16.mxu0 %v8784_v38  ;;  %10269 = vst [vmem:[#allocation122_spill] sm:$0xff] %v8796_v50  ;;  %v8799_v22 = vld [vmem:[#allocation11 + $0xd0] ss:$48 sps:$4 sm:$0xff]   ;;  %v8802_v38 = vld [vmem:[#allocation11 + $0xd8] ss:$48 sps:$4 sm:$0xff]  }
 0x4d7   :  { %10270 = vst [vmem:[#allocation123_spill] sm:$0xff] %v8799_v22  ;;  %10271 = vst [vmem:[#allocation124_spill] sm:$0xff] %v8802_v38 }
 0x4d8   :  { %4300 = vmatpush1.bf16.msra.mxu1 %v8787_v47  ;;  %v8805_v47 = vld [vmem:[#allocation11 + $0x134] ss:$48 sps:$4 sm:$0xff]  }
 0x4d9   :  { %4382 = vmatpush1.bf16.msra.mxu0 %v8790_v61  ;;  %4301 = vmatprep.subr.bf16.mxu1 %v8793_v18  ;;  %10272 = vst [vmem:[#allocation125_spill] sm:$0xff] %v8805_v47  ;;  %v8808_v61 = vld [vmem:[#allocation11 + $0x13c] ss:$48 sps:$4 sm:$0xff]   ;;  %v8811_v18 = vld [vmem:[#allocation11 + $0x130] ss:$48 sps:$4 sm:$0xff]  }
 0x4da   :  { %4383 = vmatprep.subr.bf16.mxu0 %v8796_v50  ;;  %10273 = vst [vmem:[#allocation126_spill] sm:$0xff] %v8808_v61  ;;  %10274 = vst [vmem:[#allocation127_spill] sm:$0xff] %v8811_v18  ;;  %v8814_v50 = vld [vmem:[#allocation11 + $0x138] ss:$48 sps:$4 sm:$0xff]  }
 0x4db   :  { %10275 = vst [vmem:[#allocation128_spill] sm:$0xff] %v8814_v50 }
 0x4dc   :  { %4302 = vmatpush1.bf16.msra.mxu1 %v8799_v22  ;;  %v8817_v22 = vld [vmem:[#allocation11 + $0x194] ss:$48 sps:$4 sm:$0xff]  }
 0x4dd   :  { %4384 = vmatpush1.bf16.msra.mxu0 %v8802_v38  ;;  %4303 = vmatprep.subr.bf16.mxu1 %v8805_v47  ;;  %10276 = vst [vmem:[#allocation129_spill] sm:$0xff] %v8817_v22  ;;  %v8820_v38 = vld [vmem:[#allocation11 + $0x19c] ss:$48 sps:$4 sm:$0xff]   ;;  %v8823_v47 = vld [vmem:[#allocation11 + $0x190] ss:$48 sps:$4 sm:$0xff]  }
 0x4de   :  { %4385 = vmatprep.subr.bf16.mxu0 %v8808_v61  ;;  %10277 = vst [vmem:[#allocation130_spill] sm:$0xff] %v8820_v38  ;;  %10278 = vst [vmem:[#allocation131_spill] sm:$0xff] %v8823_v47  ;;  %v8826_v61 = vld [vmem:[#allocation11 + $0x198] ss:$48 sps:$4 sm:$0xff]  }
 0x4df   :  { %10279 = vst [vmem:[#allocation132_spill] sm:$0xff] %v8826_v61 }
 0x4e0   :  { %4304 = vmatpush1.bf16.msra.mxu1 %v8811_v18  ;;  %v8829_v18 = vld [vmem:[#allocation11 + $0x1f4] ss:$48 sps:$4 sm:$0xff]  }
 0x4e1   :  { %4386 = vmatpush1.bf16.msra.mxu0 %v8814_v50  ;;  %4305 = vmatprep.subr.bf16.mxu1 %v8817_v22  ;;  %10280 = vst [vmem:[#allocation133_spill] sm:$0xff] %v8829_v18  ;;  %v8832_v50 = vld [vmem:[#allocation11 + $0x1fc] ss:$48 sps:$4 sm:$0xff]   ;;  %v8835_v22 = vld [vmem:[#allocation11 + $0x1f0] ss:$48 sps:$4 sm:$0xff]  }
 0x4e2   :  { %4387 = vmatprep.subr.bf16.mxu0 %v8820_v38  ;;  %10281 = vst [vmem:[#allocation134_spill] sm:$0xff] %v8832_v50  ;;  %10282 = vst [vmem:[#allocation135_spill] sm:$0xff] %v8835_v22  ;;  %v8838_v38 = vld [vmem:[#allocation11 + $0x1f8] ss:$48 sps:$4 sm:$0xff]  }
 0x4e3   :  { %10283 = vst [vmem:[#allocation136_spill] sm:$0xff] %v8838_v38 }
 0x4e4   :  { %4306 = vmatpush1.bf16.msra.mxu1 %v8823_v47  ;;  %v8841_v47 = vld [vmem:[#allocation11 + $0x254] ss:$48 sps:$4 sm:$0xff]  }
 0x4e5   :  { %4388 = vmatpush1.bf16.msra.mxu0 %v8826_v61  ;;  %4307 = vmatprep.subr.bf16.mxu1 %v8829_v18  ;;  %10284 = vst [vmem:[#allocation137_spill] sm:$0xff] %v8841_v47  ;;  %v8844_v61 = vld [vmem:[#allocation11 + $0x25c] ss:$48 sps:$4 sm:$0xff]   ;;  %v8847_v18 = vld [vmem:[#allocation11 + $0x250] ss:$48 sps:$4 sm:$0xff]  }
 0x4e6   :  { %4389 = vmatprep.subr.bf16.mxu0 %v8832_v50  ;;  %10285 = vst [vmem:[#allocation138_spill] sm:$0xff] %v8844_v61  ;;  %10286 = vst [vmem:[#allocation139_spill] sm:$0xff] %v8847_v18  ;;  %v8850_v50 = vld [vmem:[#allocation11 + $0x258] ss:$48 sps:$4 sm:$0xff]  }
 0x4e7   :  { %10287 = vst [vmem:[#allocation140_spill] sm:$0xff] %v8850_v50 }
 0x4e8   :  { %4308 = vmatpush1.bf16.msra.mxu1 %v8835_v22  ;;  %v8853_v22 = vld [vmem:[#allocation11 + $0x2b4] ss:$48 sps:$4 sm:$0xff]  }
 0x4e9   :  { %4390 = vmatpush1.bf16.msra.mxu0 %v8838_v38  ;;  %4309 = vmatprep.subr.bf16.mxu1 %v8841_v47  ;;  %10288 = vst [vmem:[#allocation141_spill] sm:$0xff] %v8853_v22  ;;  %v8856_v38 = vld [vmem:[#allocation11 + $0x2bc] ss:$48 sps:$4 sm:$0xff]   ;;  %v8859_v47 = vld [vmem:[#allocation11 + $0x2b0] ss:$48 sps:$4 sm:$0xff]  }
 0x4ea   :  { %4391 = vmatprep.subr.bf16.mxu0 %v8844_v61  ;;  %10289 = vst [vmem:[#allocation142_spill] sm:$0xff] %v8856_v38  ;;  %10290 = vst [vmem:[#allocation143_spill] sm:$0xff] %v8859_v47  ;;  %v8862_v61 = vld [vmem:[#allocation11 + $0x2b8] ss:$48 sps:$4 sm:$0xff]  }
 0x4eb   :  { %10291 = vst [vmem:[#allocation144_spill] sm:$0xff] %v8862_v61 }
 0x4ec   :  { %4310 = vmatpush1.bf16.msra.mxu1 %v8847_v18  ;;  %v8865_v18 = vld [vmem:[#allocation11 + $0x314] ss:$48 sps:$4 sm:$0xff]  }
 0x4ed   :  { %4392 = vmatpush1.bf16.msra.mxu0 %v8850_v50  ;;  %4311 = vmatprep.subr.bf16.mxu1 %v8853_v22  ;;  %10292 = vst [vmem:[#allocation145_spill] sm:$0xff] %v8865_v18  ;;  %v8868_v50 = vld [vmem:[#allocation11 + $0x31c] ss:$48 sps:$4 sm:$0xff]   ;;  %v8871_v22 = vld [vmem:[#allocation11 + $0x310] ss:$48 sps:$4 sm:$0xff]  }
 0x4ee   :  { %4393 = vmatprep.subr.bf16.mxu0 %v8856_v38  ;;  %10293 = vst [vmem:[#allocation146_spill] sm:$0xff] %v8868_v50  ;;  %10294 = vst [vmem:[#allocation147_spill] sm:$0xff] %v8871_v22  ;;  %v8874_v38 = vld [vmem:[#allocation11 + $0x318] ss:$48 sps:$4 sm:$0xff]  }
 0x4ef   :  { %10295 = vst [vmem:[#allocation148_spill] sm:$0xff] %v8874_v38 }
 0x4f0   :  { %4312 = vmatpush1.bf16.msra.mxu1 %v8859_v47  ;;  %v8877_v47 = vld [vmem:[#allocation11 + $0x374] ss:$48 sps:$4 sm:$0xff]  }
 0x4f1   :  { %4394 = vmatpush1.bf16.msra.mxu0 %v8862_v61  ;;  %4313 = vmatprep.subr.bf16.mxu1 %v8865_v18  ;;  %10296 = vst [vmem:[#allocation149_spill] sm:$0xff] %v8877_v47  ;;  %v8880_v61 = vld [vmem:[#allocation11 + $0x37c] ss:$48 sps:$4 sm:$0xff]   ;;  %v8883_v18 = vld [vmem:[#allocation11 + $0x370] ss:$48 sps:$4 sm:$0xff]  }
 0x4f2   :  { %4395 = vmatprep.subr.bf16.mxu0 %v8868_v50  ;;  %10297 = vst [vmem:[#allocation150_spill] sm:$0xff] %v8880_v61  ;;  %10298 = vst [vmem:[#allocation151_spill] sm:$0xff] %v8883_v18  ;;  %v8886_v50 = vld [vmem:[#allocation11 + $0x378] ss:$48 sps:$4 sm:$0xff]  }
 0x4f3   :  { %10299 = vst [vmem:[#allocation152_spill] sm:$0xff] %v8886_v50 }
 0x4f4   :  { %4314 = vmatpush1.bf16.msra.mxu1 %v8871_v22  ;;  %v8889_v22 = vld [vmem:[#allocation11 + $0x3d4] ss:$48 sps:$4 sm:$0xff]  }
 0x4f5   :  { %4396 = vmatpush1.bf16.msra.mxu0 %v8874_v38  ;;  %4315 = vmatprep.subr.bf16.mxu1 %v8877_v47  ;;  %10300 = vst [vmem:[#allocation153_spill] sm:$0xff] %v8889_v22  ;;  %v8892_v38 = vld [vmem:[#allocation11 + $0x3dc] ss:$48 sps:$4 sm:$0xff]   ;;  %v8895_v47 = vld [vmem:[#allocation11 + $0x3d0] ss:$48 sps:$4 sm:$0xff]  }
 0x4f6   :  { %4397 = vmatprep.subr.bf16.mxu0 %v8880_v61  ;;  %10301 = vst [vmem:[#allocation154_spill] sm:$0xff] %v8892_v38  ;;  %10302 = vst [vmem:[#allocation155_spill] sm:$0xff] %v8895_v47  ;;  %v8898_v61 = vld [vmem:[#allocation11 + $0x3d8] ss:$48 sps:$4 sm:$0xff]  }
 0x4f7   :  { %10303 = vst [vmem:[#allocation156_spill] sm:$0xff] %v8898_v61 }
 0x4f8   :  { %4316 = vmatpush1.bf16.msra.mxu1 %v8883_v18  ;;  %v8901_v18 = vld [vmem:[#allocation11 + $0x434] ss:$48 sps:$4 sm:$0xff]  }
 0x4f9   :  { %4398 = vmatpush1.bf16.msra.mxu0 %v8886_v50  ;;  %4317 = vmatprep.subr.bf16.mxu1 %v8889_v22  ;;  %10304 = vst [vmem:[#allocation157_spill] sm:$0xff] %v8901_v18  ;;  %v8904_v50 = vld [vmem:[#allocation11 + $0x43c] ss:$48 sps:$4 sm:$0xff]   ;;  %v8907_v22 = vld [vmem:[#allocation11 + $0x430] ss:$48 sps:$4 sm:$0xff]  }
 0x4fa   :  { %4399 = vmatprep.subr.bf16.mxu0 %v8892_v38  ;;  %10305 = vst [vmem:[#allocation158_spill] sm:$0xff] %v8904_v50  ;;  %10306 = vst [vmem:[#allocation159_spill] sm:$0xff] %v8907_v22  ;;  %v8910_v38 = vld [vmem:[#allocation11 + $0x438] ss:$48 sps:$4 sm:$0xff]  }
 0x4fb   :  { %10307 = vst [vmem:[#allocation160_spill] sm:$0xff] %v8910_v38 }
 0x4fc   :  { %4318 = vmatpush1.bf16.msra.mxu1 %v8895_v47  ;;  %v8913_v47 = vld [vmem:[#allocation11 + $0x494] ss:$48 sps:$4 sm:$0xff]  }
 0x4fd   :  { %4400 = vmatpush1.bf16.msra.mxu0 %v8898_v61  ;;  %4319 = vmatprep.subr.bf16.mxu1 %v8901_v18  ;;  %10308 = vst [vmem:[#allocation161_spill] sm:$0xff] %v8913_v47  ;;  %v8916_v61 = vld [vmem:[#allocation11 + $0x49c] ss:$48 sps:$4 sm:$0xff]   ;;  %v8919_v18 = vld [vmem:[#allocation11 + $0x490] ss:$48 sps:$4 sm:$0xff]  }
 0x4fe   :  { %4401 = vmatprep.subr.bf16.mxu0 %v8904_v50  ;;  %10309 = vst [vmem:[#allocation162_spill] sm:$0xff] %v8916_v61  ;;  %10310 = vst [vmem:[#allocation163_spill] sm:$0xff] %v8919_v18  ;;  %v8922_v50 = vld [vmem:[#allocation11 + $0x498] ss:$48 sps:$4 sm:$0xff]  }
 0x4ff   :  { %10311 = vst [vmem:[#allocation164_spill] sm:$0xff] %v8922_v50 }
 0x500   :  { %4320 = vmatpush1.bf16.msra.mxu1 %v8907_v22  ;;  %v8925_v22 = vld [vmem:[#allocation11 + $0x4f4] ss:$48 sps:$4 sm:$0xff]  }
 0x501   :  { %4402 = vmatpush1.bf16.msra.mxu0 %v8910_v38  ;;  %4321 = vmatprep.subr.bf16.mxu1 %v8913_v47  ;;  %10312 = vst [vmem:[#allocation165_spill] sm:$0xff] %v8925_v22  ;;  %v8928_v38 = vld [vmem:[#allocation11 + $0x4fc] ss:$48 sps:$4 sm:$0xff]   ;;  %v8931_v47 = vld [vmem:[#allocation11 + $0x4f0] ss:$48 sps:$4 sm:$0xff]  }
 0x502   :  { %4403 = vmatprep.subr.bf16.mxu0 %v8916_v61  ;;  %10313 = vst [vmem:[#allocation166_spill] sm:$0xff] %v8928_v38  ;;  %10314 = vst [vmem:[#allocation167_spill] sm:$0xff] %v8931_v47  ;;  %v8934_v61 = vld [vmem:[#allocation11 + $0x4f8] ss:$48 sps:$4 sm:$0xff]  }
 0x503   :  { %10315 = vst [vmem:[#allocation168_spill] sm:$0xff] %v8934_v61 }
 0x504   :  { %4322 = vmatpush1.bf16.msra.mxu1 %v8919_v18  ;;  %v8937_v18 = vld [vmem:[#allocation11 + $0x554] ss:$48 sps:$4 sm:$0xff]  }
 0x505   :  { %4404 = vmatpush1.bf16.msra.mxu0 %v8922_v50  ;;  %4323 = vmatprep.subr.bf16.mxu1 %v8925_v22  ;;  %10316 = vst [vmem:[#allocation169_spill] sm:$0xff] %v8937_v18  ;;  %v8940_v50 = vld [vmem:[#allocation11 + $0x55c] ss:$48 sps:$4 sm:$0xff]   ;;  %v8943_v22 = vld [vmem:[#allocation11 + $0x550] ss:$48 sps:$4 sm:$0xff]  }
 0x506   :  { %4405 = vmatprep.subr.bf16.mxu0 %v8928_v38  ;;  %10317 = vst [vmem:[#allocation170_spill] sm:$0xff] %v8940_v50  ;;  %10318 = vst [vmem:[#allocation171_spill] sm:$0xff] %v8943_v22  ;;  %v8946_v38 = vld [vmem:[#allocation11 + $0x558] ss:$48 sps:$4 sm:$0xff]  }
 0x507   :  { %10319 = vst [vmem:[#allocation172_spill] sm:$0xff] %v8946_v38 }
 0x508   :  { %4324 = vmatpush1.bf16.msra.mxu1 %v8931_v47  ;;  %v8949_v47 = vld [vmem:[#allocation11 + $0x5b4] ss:$48 sps:$4 sm:$0xff]  }
 0x509   :  { %4406 = vmatpush1.bf16.msra.mxu0 %v8934_v61  ;;  %4325 = vmatprep.subr.bf16.mxu1 %v8937_v18  ;;  %10320 = vst [vmem:[#allocation173_spill] sm:$0xff] %v8949_v47  ;;  %v8952_v61 = vld [vmem:[#allocation11 + $0x5bc] ss:$48 sps:$4 sm:$0xff]   ;;  %v8955_v18 = vld [vmem:[#allocation11 + $0x5b0] ss:$48 sps:$4 sm:$0xff]  }
 0x50a   :  { %4407 = vmatprep.subr.bf16.mxu0 %v8940_v50  ;;  %10321 = vst [vmem:[#allocation174_spill] sm:$0xff] %v8952_v61  ;;  %10322 = vst [vmem:[#allocation175_spill] sm:$0xff] %v8955_v18  ;;  %v8958_v50 = vld [vmem:[#allocation11 + $0x5b8] ss:$48 sps:$4 sm:$0xff]  }
 0x50b   :  { %10323 = vst [vmem:[#allocation176_spill] sm:$0xff] %v8958_v50 }
 0x50c   :  { %4326 = vmatpush1.bf16.msra.mxu1 %v8943_v22  ;;  %v8961_v22 = vld [vmem:[#allocation11 + $0x614] ss:$48 sps:$4 sm:$0xff]  }
 0x50d   :  { %4408 = vmatpush1.bf16.msra.mxu0 %v8946_v38  ;;  %4327 = vmatprep.subr.bf16.mxu1 %v8949_v47  ;;  %10324 = vst [vmem:[#allocation177_spill] sm:$0xff] %v8961_v22  ;;  %v8964_v38 = vld [vmem:[#allocation11 + $0x61c] ss:$48 sps:$4 sm:$0xff]   ;;  %v8998_v47 = vld [vmem:[#allocation11 + $0x6d8] ss:$48 sps:$4 sm:$0xff]  }
 0x50e   :  { %4409 = vmatprep.subr.bf16.mxu0 %v8952_v61  ;;  %10325 = vst [vmem:[#allocation178_spill] sm:$0xff] %v8964_v38  ;;  %v8969_v61 = vld [vmem:[#allocation11 + $0x610] ss:$48 sps:$4 sm:$0xff]   ;;  %10335 = vst [vmem:[#allocation188_spill] sm:$0xff] %v8998_v47 }
 0x50f   :  { %10326 = vst [vmem:[#allocation179_spill] sm:$0xff] %v8969_v61 }
 0x510   :  { %4328 = vmatpush1.bf16.msra.mxu1 %v8955_v18  ;;  %v8972_v18 = vld [vmem:[#allocation11 + $0x618] ss:$48 sps:$4 sm:$0xff]  }
 0x511   :  { %4410 = vmatpush1.bf16.msra.mxu0 %v8958_v50  ;;  %4338 = vmatprep.subr.bf16.mxu1 %v8961_v22  ;;  %10327 = vst [vmem:[#allocation180_spill] sm:$0xff] %v8972_v18  ;;  %v8975_v50 = vld [vmem:[#allocation11 + $0x674] ss:$48 sps:$4 sm:$0xff]   ;;  %v8978_v22 = vld [vmem:[#allocation11 + $0x67c] ss:$48 sps:$4 sm:$0xff]  }
 0x512   :  { %4420 = vmatprep.subr.bf16.mxu0 %v8964_v38  ;;  %10328 = vst [vmem:[#allocation181_spill] sm:$0xff] %v8975_v50  ;;  %10329 = vst [vmem:[#allocation182_spill] sm:$0xff] %v8978_v22  ;;  %v8983_v38 = vld [vmem:[#allocation11 + $0x670] ss:$48 sps:$4 sm:$0xff]  }
 0x513   :  { %4330 = vmatmul.mubr.bf16.vlgmr.msra.gmra.mrb[12].mxu1 %v8664_v28  ;;  %10330 = vst [vmem:[#allocation183_spill] sm:$0xff] %v8983_v38 }
 0x514   :  { %4412 = vmatmul.mubr.bf16.vlgmr.msra.gmra.mrb[28].mxu0 %v8664_v28  ;;  %4339 = vmatpush1.bf16.msra.mxu1 %v8969_v61  ;;  %v8986_v61 = vld [vmem:[#allocation11 + $0x678] ss:$48 sps:$4 sm:$0xff]  }
 0x515   :  { %4421 = vmatpush1.bf16.msra.mxu0 %v8972_v18  ;;  %4340 = vmatprep.subr.bf16.mxu1 %v8975_v50  ;;  %10331 = vst [vmem:[#allocation184_spill] sm:$0xff] %v8986_v61  ;;  %v8989_v18 = vld [vmem:[#allocation11 + $0x6d4] ss:$48 sps:$4 sm:$0xff]   ;;  %v8992_v50 = vld [vmem:[#allocation11 + $0x6dc] ss:$48 sps:$4 sm:$0xff]  }
 0x516   :  { %4422 = vmatprep.subr.bf16.mxu0 %v8978_v22  ;;  %4370 = vmatprep.mubr.bf16.mxu1 %v10200_v45  ;;  %10332 = vst [vmem:[#allocation185_spill] sm:$0xff] %v8989_v18  ;;  %10333 = vst [vmem:[#allocation186_spill] sm:$0xff] %v8992_v50  ;;  %v8995_v22 = vld [vmem:[#allocation11 + $0x6d0] ss:$48 sps:$4 sm:$0xff]  }
 0x517   :  { %4452 = vmatprep.mubr.bf16.mxu0 %v10200_v45  ;;  %10334 = vst [vmem:[#allocation187_spill] sm:$0xff] %v8995_v22 }
 0x518   :  { %4341 = vmatpush1.bf16.msra.mxu1 %v8983_v38  ;;  %v9001_v38 = vld [vmem:[#allocation11 + $0x734] ss:$48 sps:$4 sm:$0xff]  }
 0x519   :  { %4423 = vmatpush1.bf16.msra.mxu0 %v8986_v61  ;;  %4342 = vmatprep.subr.bf16.mxu1 %v8989_v18  ;;  %10336 = vst [vmem:[#allocation189_spill] sm:$0xff] %v9001_v38  ;;  %v9004_v61 = vld [vmem:[#allocation11 + $0x73c] ss:$48 sps:$4 sm:$0xff]   ;;  %v9007_v18 = vld [vmem:[#allocation11 + $0x730] ss:$48 sps:$4 sm:$0xff]  }
 0x51a   :  { %4424 = vmatprep.subr.bf16.mxu0 %v8992_v50  ;;  %10337 = vst [vmem:[#allocation190_spill] sm:$0xff] %v9004_v61  ;;  %10338 = vst [vmem:[#allocation191_spill] sm:$0xff] %v9007_v18  ;;  %v9010_v50 = vld [vmem:[#allocation11 + $0x738] ss:$48 sps:$4 sm:$0xff]  }
 0x51b   :  { %10339 = vst [vmem:[#allocation192_spill] sm:$0xff] %v9010_v50 }
 0x51c   :  { %4343 = vmatpush1.bf16.msra.mxu1 %v8995_v22  ;;  %v9013_v22 = vld [vmem:[#allocation11 + $0x794] ss:$48 sps:$4 sm:$0xff]  }
 0x51d   :  { %4425 = vmatpush1.bf16.msra.mxu0 %v8998_v47  ;;  %4344 = vmatprep.subr.bf16.mxu1 %v9001_v38  ;;  %10340 = vst [vmem:[#allocation193_spill] sm:$0xff] %v9013_v22  ;;  %v9016_v47 = vld [vmem:[#allocation11 + $0x79c] ss:$48 sps:$4 sm:$0xff]   ;;  %v9019_v38 = vld [vmem:[#allocation11 + $0x790] ss:$48 sps:$4 sm:$0xff]  }
 0x51e   :  { %4426 = vmatprep.subr.bf16.mxu0 %v9004_v61  ;;  %10341 = vst [vmem:[#allocation194_spill] sm:$0xff] %v9016_v47  ;;  %10342 = vst [vmem:[#allocation195_spill] sm:$0xff] %v9019_v38  ;;  %v9022_v61 = vld [vmem:[#allocation11 + $0x798] ss:$48 sps:$4 sm:$0xff]  }
 0x51f   :  { %10343 = vst [vmem:[#allocation196_spill] sm:$0xff] %v9022_v61 }
 0x520   :  { %4345 = vmatpush1.bf16.msra.mxu1 %v9007_v18  ;;  %v9025_v18 = vld [vmem:[#allocation11 + $0x7f4] ss:$48 sps:$4 sm:$0xff]  }
 0x521   :  { %4427 = vmatpush1.bf16.msra.mxu0 %v9010_v50  ;;  %4346 = vmatprep.subr.bf16.mxu1 %v9013_v22  ;;  %10344 = vst [vmem:[#allocation197_spill] sm:$0xff] %v9025_v18  ;;  %v9028_v50 = vld [vmem:[#allocation11 + $0x7fc] ss:$48 sps:$4 sm:$0xff]   ;;  %v9031_v22 = vld [vmem:[#allocation11 + $0x7f0] ss:$48 sps:$4 sm:$0xff]  }
 0x522   :  { %4428 = vmatprep.subr.bf16.mxu0 %v9016_v47  ;;  %10345 = vst [vmem:[#allocation198_spill] sm:$0xff] %v9028_v50  ;;  %10346 = vst [vmem:[#allocation199_spill] sm:$0xff] %v9031_v22  ;;  %v9034_v47 = vld [vmem:[#allocation11 + $0x7f8] ss:$48 sps:$4 sm:$0xff]  }
 0x523   :  { %10347 = vst [vmem:[#allocation200_spill] sm:$0xff] %v9034_v47 }
 0x524   :  { %4347 = vmatpush1.bf16.msra.mxu1 %v9019_v38  ;;  %v9037_v38 = vld [vmem:[#allocation11 + $0x854] ss:$48 sps:$4 sm:$0xff]  }
 0x525   :  { %4429 = vmatpush1.bf16.msra.mxu0 %v9022_v61  ;;  %4348 = vmatprep.subr.bf16.mxu1 %v9025_v18  ;;  %10348 = vst [vmem:[#allocation201_spill] sm:$0xff] %v9037_v38  ;;  %v9040_v61 = vld [vmem:[#allocation11 + $0x85c] ss:$48 sps:$4 sm:$0xff]   ;;  %v9043_v18 = vld [vmem:[#allocation11 + $0x850] ss:$48 sps:$4 sm:$0xff]  }
 0x526   :  { %4430 = vmatprep.subr.bf16.mxu0 %v9028_v50  ;;  %10349 = vst [vmem:[#allocation202_spill] sm:$0xff] %v9040_v61  ;;  %10350 = vst [vmem:[#allocation203_spill] sm:$0xff] %v9043_v18  ;;  %v9046_v50 = vld [vmem:[#allocation11 + $0x858] ss:$48 sps:$4 sm:$0xff]  }
 0x527   :  { %10351 = vst [vmem:[#allocation204_spill] sm:$0xff] %v9046_v50 }
 0x528   :  { %4349 = vmatpush1.bf16.msra.mxu1 %v9031_v22  ;;  %v9049_v22 = vld [vmem:[#allocation11 + $0x8b4] ss:$48 sps:$4 sm:$0xff]  }
 0x529   :  { %4431 = vmatpush1.bf16.msra.mxu0 %v9034_v47  ;;  %4350 = vmatprep.subr.bf16.mxu1 %v9037_v38  ;;  %10352 = vst [vmem:[#allocation205_spill] sm:$0xff] %v9049_v22  ;;  %v9052_v47 = vld [vmem:[#allocation11 + $0x8bc] ss:$48 sps:$4 sm:$0xff]   ;;  %v9055_v38 = vld [vmem:[#allocation11 + $0x8b0] ss:$48 sps:$4 sm:$0xff]  }
 0x52a   :  { %4432 = vmatprep.subr.bf16.mxu0 %v9040_v61  ;;  %10353 = vst [vmem:[#allocation206_spill] sm:$0xff] %v9052_v47  ;;  %10354 = vst [vmem:[#allocation207_spill] sm:$0xff] %v9055_v38  ;;  %v9058_v61 = vld [vmem:[#allocation11 + $0x8b8] ss:$48 sps:$4 sm:$0xff]  }
 0x52b   :  { %10355 = vst [vmem:[#allocation208_spill] sm:$0xff] %v9058_v61 }
 0x52c   :  { %4351 = vmatpush1.bf16.msra.mxu1 %v9043_v18  ;;  %v9061_v18 = vld [vmem:[#allocation11 + $0x24] ss:$48 sps:$4 sm:$0xff]  }
 0x52d   :  { %4433 = vmatpush1.bf16.msra.mxu0 %v9046_v50  ;;  %4352 = vmatprep.subr.bf16.mxu1 %v9049_v22  ;;  %10356 = vst [vmem:[#allocation209_spill] sm:$0xff] %v9061_v18  ;;  %v9064_v50 = vld [vmem:[#allocation11 + $0x2c] ss:$48 sps:$4 sm:$0xff]   ;;  %v9089_v22 = vld [vmem:[#allocation11 + $0xe4] ss:$48 sps:$4 sm:$0xff]  }
 0x52e   :  { %4434 = vmatprep.subr.bf16.mxu0 %v9052_v47  ;;  %10357 = vst [vmem:[#allocation210_spill] sm:$0xff] %v9064_v50  ;;  %v9069_v47 = vld [vmem:[#allocation11 + $0x20] ss:$48 sps:$4 sm:$0xff]   ;;  %10363 = vst [vmem:[#allocation216_spill] sm:$0xff] %v9089_v22 }
 0x52f   :  { %10358 = vst [vmem:[#allocation211_spill] sm:$0xff] %v9069_v47 }
 0x530   :  { %4353 = vmatpush1.bf16.msra.mxu1 %v9055_v38  ;;  %v9073_v38 = vld [vmem:[#allocation11 + $0x28] ss:$48 sps:$4 sm:$0xff]  }
 0x531   :  { %4435 = vmatpush1.bf16.msra.mxu0 %v9058_v61  ;;  %4461 = vmatprep.subr.bf16.mxu1 %v9061_v18  ;;  %v9077_v18 = vld [vmem:[#allocation11 + $0x84] ss:$48 sps:$4 sm:$0xff]   ;;  %v9083_v61 = vld [vmem:[#allocation11 + $0x80] ss:$48 sps:$4 sm:$0xff]  }
 0x532   :  { %4543 = vmatprep.subr.bf16.mxu0 %v9064_v50  ;;  %10359 = vst [vmem:[#allocation212_spill] sm:$0xff] %v9077_v18  ;;  %v9080_v50 = vld [vmem:[#allocation11 + $0x8c] ss:$48 sps:$4 sm:$0xff]   ;;  %10361 = vst [vmem:[#allocation214_spill] sm:$0xff] %v9083_v61 }
 0x533   :  { %4371 = vmatmul.mubr.bf16.vlgmr.msra.gmra.mrb[12].mxu1 %v8763_v58  ;;  %10360 = vst [vmem:[#allocation213_spill] sm:$0xff] %v9080_v50 }
 0x534   :  { %4453 = vmatmul.mubr.bf16.vlgmr.msra.gmra.mrb[28].mxu0 %v8763_v58  ;;  %4462 = vmatpush1.bf16.msra.mxu1 %v9069_v47  ;;  %v9086_v47 = vld [vmem:[#allocation11 + $0x88] ss:$48 sps:$4 sm:$0xff]  }
 0x535   :  { %4493 = vmatprep.mubr.bf16.mxu1 %v8662_v57  ;;  %4544 = vmatpush1.bf16.msra.mxu0 %v9073_v38  ;;  %10362 = vst [vmem:[#allocation215_spill] sm:$0xff] %v9086_v47 }
 0x536   :  { %4575 = vmatprep.mubr.bf16.mxu0 %v8662_v57  ;;  %4463 = vmatprep.subr.bf16.mxu1 %v9077_v18  ;;  %v9092_v57 = vld [vmem:[#allocation11 + $0xec] ss:$48 sps:$4 sm:$0xff]   ;;  %v9095_v18 = vld [vmem:[#allocation11 + $0xe0] ss:$48 sps:$4 sm:$0xff]  }
 0x537   :  { %4545 = vmatprep.subr.bf16.mxu0 %v9080_v50  ;;  %10364 = vst [vmem:[#allocation217_spill] sm:$0xff] %v9092_v57  ;;  %10365 = vst [vmem:[#allocation218_spill] sm:$0xff] %v9095_v18  ;;  %v9098_v50 = vld [vmem:[#allocation11 + $0xe8] ss:$48 sps:$4 sm:$0xff]  }
 0x538   :  { %4464 = vmatpush1.bf16.msra.mxu1 %v9083_v61  ;;  %10366 = vst [vmem:[#allocation219_spill] sm:$0xff] %v9098_v50  ;;  %v9101_v61 = vld [vmem:[#allocation11 + $0x144] ss:$48 sps:$4 sm:$0xff]  }
 0x539   :  { %4546 = vmatpush1.bf16.msra.mxu0 %v9086_v47  ;;  %4465 = vmatprep.subr.bf16.mxu1 %v9089_v22  ;;  %10367 = vst [vmem:[#allocation220_spill] sm:$0xff] %v9101_v61  ;;  %v9104_v47 = vld [vmem:[#allocation11 + $0x14c] ss:$48 sps:$4 sm:$0xff]   ;;  %v9107_v22 = vld [vmem:[#allocation11 + $0x140] ss:$48 sps:$4 sm:$0xff]  }
 0x53a   :  { %4547 = vmatprep.subr.bf16.mxu0 %v9092_v57  ;;  %10368 = vst [vmem:[#allocation221_spill] sm:$0xff] %v9104_v47  ;;  %10369 = vst [vmem:[#allocation222_spill] sm:$0xff] %v9107_v22  ;;  %v9110_v57 = vld [vmem:[#allocation11 + $0x148] ss:$48 sps:$4 sm:$0xff]  }
 0x53b   :  { %10370 = vst [vmem:[#allocation223_spill] sm:$0xff] %v9110_v57 }
 0x53c   :  { %4466 = vmatpush1.bf16.msra.mxu1 %v9095_v18  ;;  %v9113_v18 = vld [vmem:[#allocation11 + $0x1a4] ss:$48 sps:$4 sm:$0xff]  }
 0x53d   :  { %4548 = vmatpush1.bf16.msra.mxu0 %v9098_v50  ;;  %4467 = vmatprep.subr.bf16.mxu1 %v9101_v61  ;;  %v9116_v50 = vld [vmem:[#allocation11 + $0x1ac] ss:$48 sps:$4 sm:$0xff]   ;;  %v9119_v61 = vld [vmem:[#allocation11 + $0x1a0] ss:$48 sps:$4 sm:$0xff]  }
 0x53e   :  { %4549 = vmatprep.subr.bf16.mxu0 %v9104_v47  ;;  %10371 = vst [vmem:[#allocation224_spill] sm:$0xff] %v9116_v50  ;;  %10372 = vst [vmem:[#allocation225_spill] sm:$0xff] %v9119_v61  ;;  %v9122_v47 = vld [vmem:[#allocation11 + $0x1a8] ss:$48 sps:$4 sm:$0xff]  }
 0x540   :  { %4468 = vmatpush1.bf16.msra.mxu1 %v9107_v22  ;;  %v9125_v22 = vld [vmem:[#allocation11 + $0x204] ss:$48 sps:$4 sm:$0xff]  }
 0x541   :  { %4550 = vmatpush1.bf16.msra.mxu0 %v9110_v57  ;;  %4469 = vmatprep.subr.bf16.mxu1 %v9113_v18  ;;  %10373 = vst [vmem:[#allocation226_spill] sm:$0xff] %v9125_v22  ;;  %v9129_v57 = vld [vmem:[#allocation11 + $0x200] ss:$48 sps:$4 sm:$0xff]  }
 0x542   :  { %4551 = vmatprep.subr.bf16.mxu0 %v9116_v50  ;;  %v9133_v50 = vld [vmem:[#allocation11 + $0x264] ss:$48 sps:$4 sm:$0xff]  }
 0x544   :  { %4470 = vmatpush1.bf16.msra.mxu1 %v9119_v61  ;;  %v9137_v61 = vld [vmem:[#allocation11 + $0x260] ss:$48 sps:$4 sm:$0xff]  }
 0x545   :  { %4552 = vmatpush1.bf16.msra.mxu0 %v9122_v47  ;;  %4471 = vmatprep.subr.bf16.mxu1 %v9125_v22  ;;  %v9141_v22 = vld [vmem:[#allocation11 + $0x2c4] ss:$48 sps:$4 sm:$0xff]  }
 0x546   :  { %4553 = vmatprep.subr.bf16.mxu0 %v8261_v63  ;;  %v9145_v63 = vld [vmem:[#allocation11 + $0x2c0] ss:$48 sps:$4 sm:$0xff]  }
 0x548   :  { %4472 = vmatpush1.bf16.msra.mxu1 %v9129_v57 }
 0x549   :  { %4554 = vmatpush1.bf16.msra.mxu0 %v8263_v1  ;;  %4473 = vmatprep.subr.bf16.mxu1 %v9133_v50  ;;  %v9149_v1 = vld [vmem:[#allocation11 + $0x324] ss:$48 sps:$4 sm:$0xff]  }
 0x54a   :  { %4555 = vmatprep.subr.bf16.mxu0 %v8266_v2  ;;  %v9153_v2 = vld [vmem:[#allocation11 + $0x320] ss:$48 sps:$4 sm:$0xff]  }
 0x54c   :  { %4474 = vmatpush1.bf16.msra.mxu1 %v9137_v61 }
 0x54d   :  { %4556 = vmatpush1.bf16.msra.mxu0 %v8269_v4  ;;  %4475 = vmatprep.subr.bf16.mxu1 %v9141_v22  ;;  %v9157_v4 = vld [vmem:[#allocation11 + $0x384] ss:$48 sps:$4 sm:$0xff]  }
 0x54e   :  { %4557 = vmatprep.subr.bf16.mxu0 %v8272_v11  ;;  %v9161_v11 = vld [vmem:[#allocation11 + $0x380] ss:$48 sps:$4 sm:$0xff]  }
 0x550   :  { %4476 = vmatpush1.bf16.msra.mxu1 %v9145_v63 }
 0x551   :  { %4558 = vmatpush1.bf16.msra.mxu0 %v8275_v15  ;;  %4477 = vmatprep.subr.bf16.mxu1 %v9149_v1  ;;  %v9165_v15 = vld [vmem:[#allocation11 + $0x3e4] ss:$48 sps:$4 sm:$0xff]  }
 0x552   :  { %4559 = vmatprep.subr.bf16.mxu0 %v8278_v19  ;;  %v9169_v19 = vld [vmem:[#allocation11 + $0x3e0] ss:$48 sps:$4 sm:$0xff]  }
 0x554   :  { %4478 = vmatpush1.bf16.msra.mxu1 %v9153_v2 }
 0x555   :  { %4560 = vmatpush1.bf16.msra.mxu0 %v8281_v23  ;;  %4479 = vmatprep.subr.bf16.mxu1 %v9157_v4  ;;  %v9173_v23 = vld [vmem:[#allocation11 + $0x444] ss:$48 sps:$4 sm:$0xff]  }
 0x556   :  { %4561 = vmatprep.subr.bf16.mxu0 %v8284_v25  ;;  %v9177_v25 = vld [vmem:[#allocation11 + $0x440] ss:$48 sps:$4 sm:$0xff]  }
 0x558   :  { %4480 = vmatpush1.bf16.msra.mxu1 %v9161_v11 }
 0x559   :  { %4562 = vmatpush1.bf16.msra.mxu0 %v8288_v27  ;;  %4481 = vmatprep.subr.bf16.mxu1 %v9165_v15  ;;  %v9181_v27 = vld [vmem:[#allocation11 + $0x4a4] ss:$48 sps:$4 sm:$0xff]  }
 0x55a   :  { %4563 = vmatprep.subr.bf16.mxu0 %v8291_v29  ;;  %v9185_v29 = vld [vmem:[#allocation11 + $0x4a0] ss:$48 sps:$4 sm:$0xff]  }
 0x55c   :  { %4482 = vmatpush1.bf16.msra.mxu1 %v9169_v19 }
 0x55d   :  { %4564 = vmatpush1.bf16.msra.mxu0 %v8295_v31  ;;  %4483 = vmatprep.subr.bf16.mxu1 %v9173_v23  ;;  %v9189_v31 = vld [vmem:[#allocation11 + $0x504] ss:$48 sps:$4 sm:$0xff]  }
 0x55e   :  { %4565 = vmatprep.subr.bf16.mxu0 %v8298_v33  ;;  %v9193_v33 = vld [vmem:[#allocation11 + $0x500] ss:$48 sps:$4 sm:$0xff]  }
 0x55f   :  { %10374 = vst [vmem:[#allocation227_spill] sm:$0xff] %v9193_v33 }
 0x560   :  { %4484 = vmatpush1.bf16.msra.mxu1 %v9177_v25 }
 0x561   :  { %4566 = vmatpush1.bf16.msra.mxu0 %v8301_v35  ;;  %4485 = vmatprep.subr.bf16.mxu1 %v9181_v27  ;;  %v9197_v35 = vld [vmem:[#allocation11 + $0x564] ss:$48 sps:$4 sm:$0xff]  }
 0x562   :  { %4567 = vmatprep.subr.bf16.mxu0 %v8304_v37  ;;  %10375 = vst [vmem:[#allocation228_spill] sm:$0xff] %v9197_v35  ;;  %v9201_v37 = vld [vmem:[#allocation11 + $0x560] ss:$48 sps:$4 sm:$0xff]  }
 0x563   :  { %10376 = vst [vmem:[#allocation229_spill] sm:$0xff] %v9201_v37 }
 0x564   :  { %4486 = vmatpush1.bf16.msra.mxu1 %v9185_v29 }
 0x565   :  { %4568 = vmatpush1.bf16.msra.mxu0 %v8309_v40  ;;  %4487 = vmatprep.subr.bf16.mxu1 %v9189_v31  ;;  %v9205_v40 = vld [vmem:[#allocation11 + $0x5c4] ss:$48 sps:$4 sm:$0xff]  }
 0x566   :  { %4569 = vmatprep.subr.bf16.mxu0 %v8316_v48  ;;  %10377 = vst [vmem:[#allocation230_spill] sm:$0xff] %v9205_v40  ;;  %v9209_v48 = vld [vmem:[#allocation11 + $0x5c0] ss:$48 sps:$4 sm:$0xff]  }
 0x567   :  { %10378 = vst [vmem:[#allocation231_spill] sm:$0xff] %v9209_v48 }
 0x568   :  { %4488 = vmatpush1.bf16.msra.mxu1 %v9193_v33 }
 0x569   :  { %4570 = vmatpush1.bf16.msra.mxu0 %v8323_v51  ;;  %4489 = vmatprep.subr.bf16.mxu1 %v9197_v35  ;;  %v9213_v51 = vld [vmem:[#allocation11 + $0x624] ss:$48 sps:$4 sm:$0xff]  }
 0x56a   :  { %4571 = vmatprep.subr.bf16.mxu0 %v8330_v54  ;;  %10379 = vst [vmem:[#allocation232_spill] sm:$0xff] %v9213_v51  ;;  %v9219_v54 = vld [vmem:[#allocation11 + $0x620] ss:$48 sps:$4 sm:$0xff]  }
 0x56b   :  { %10380 = vst [vmem:[#allocation233_spill] sm:$0xff] %v9219_v54 }
 0x56c   :  { %4490 = vmatpush1.bf16.msra.mxu1 %v9201_v37 }
 0x56d   :  { %4572 = vmatpush1.bf16.msra.mxu0 %v8337_v8  ;;  %4491 = vmatprep.subr.bf16.mxu1 %v9205_v40  ;;  %v9223_v8 = vld [vmem:[#allocation11 + $0x684] ss:$48 sps:$4 sm:$0xff]  }
 0x56e   :  { %4573 = vmatprep.subr.bf16.mxu0 %v8345_v24  ;;  %10381 = vst [vmem:[#allocation234_spill] sm:$0xff] %v9223_v8  ;;  %v9229_v24 = vld [vmem:[#allocation11 + $0x680] ss:$48 sps:$4 sm:$0xff]  }
 0x56f   :  { %10382 = vst [vmem:[#allocation235_spill] sm:$0xff] %v9229_v24 }
 0x570   :  { %4492 = vmatpush1.bf16.msra.mxu1 %v9209_v48 }
 0x571   :  { %4574 = vmatpush1.bf16.msra.mxu0 %v8353_v32  ;;  %4502 = vmatprep.subr.bf16.mxu1 %v9213_v51  ;;  %v9233_v32 = vld [vmem:[#allocation11 + $0x6e4] ss:$48 sps:$4 sm:$0xff]   ;;  %v10402_v51 = vld [vmem:[#allocation23_spill] sm:$0xff] }
 0x572   :  { %4584 = vmatprep.subr.bf16.mxu0 %v8357_v34  ;;  %10383 = vst [vmem:[#allocation236_spill] sm:$0xff] %v9233_v32  ;;  %v9237_v34 = vld [vmem:[#allocation11 + $0x6e0] ss:$48 sps:$4 sm:$0xff]  }
 0x573   :  { %4494 = vmatmul.mubr.bf16.vlgmr.msra.gmra.mrb[16].mxu1 %v8664_v28  ;;  %10384 = vst [vmem:[#allocation237_spill] sm:$0xff] %v9237_v34 }
 0x574   :  { %4576 = vmatmul.mubr.bf16.vlgmr.msra.gmra.mrb[32].mxu0 %v8664_v28  ;;  %4503 = vmatpush1.bf16.msra.mxu1 %v9219_v54  ;;  %v10387_v28 = vld [vmem:[#allocation29_spill] sm:$0xff] }
 0x575   :  { %4585 = vmatpush1.bf16.msra.mxu0 %v8361_v36  ;;  %4504 = vmatprep.subr.bf16.mxu1 %v9223_v8  ;;  %v10385_v36 = vld [vmem:[#allocation28_spill] sm:$0xff]  ;;  %v10399_v54 = vld [vmem:[#allocation41_spill] sm:$0xff] }
 0x576   :  { %4586 = vmatprep.subr.bf16.mxu0 %v8364_v39  ;;  %4534 = vmatprep.mubr.bf16.mxu1 %v10200_v45  ;;  %v9241_v39 = vld [vmem:[#allocation11 + $0x744] ss:$48 sps:$4 sm:$0xff]  }
 0x577   :  { %4616 = vmatprep.mubr.bf16.mxu0 %v10200_v45  ;;  %10386 = vst [vmem:[#allocation28_spill] sm:$0xff] %v9241_v39  ;;  %v10396_v8 = vld [vmem:[#allocation20_spill] sm:$0xff] }
 0x578   :  { %4505 = vmatpush1.bf16.msra.mxu1 %v9229_v24  ;;  %v9245_v24 = vld [vmem:[#allocation11 + $0x740] ss:$48 sps:$4 sm:$0xff]  }
 0x579   :  { %4587 = vmatpush1.bf16.msra.mxu0 %v8372_v49  ;;  %4506 = vmatprep.subr.bf16.mxu1 %v9233_v32  ;;  %10388 = vst [vmem:[#allocation29_spill] sm:$0xff] %v9245_v24  ;;  %v10389_v49 = vld [vmem:[#allocation32_spill] sm:$0xff] }
 0x57a   :  { %4588 = vmatprep.subr.bf16.mxu0 %v8376_v52  ;;  %v9249_v32 = vld [vmem:[#allocation11 + $0x7a4] ss:$48 sps:$4 sm:$0xff]   ;;  %v10391_v52 = vld [vmem:[#allocation33_spill] sm:$0xff] }
 0x57b   :  { %10390 = vst [vmem:[#allocation32_spill] sm:$0xff] %v9249_v32 }
 0x57c   :  { %4507 = vmatpush1.bf16.msra.mxu1 %v9237_v34  ;;  %v9253_v34 = vld [vmem:[#allocation11 + $0x7a0] ss:$48 sps:$4 sm:$0xff]  }
 0x57d   :  { %4589 = vmatpush1.bf16.msra.mxu0 %v10385_v36  ;;  %4508 = vmatprep.subr.bf16.mxu1 %v9241_v39  ;;  %10392 = vst [vmem:[#allocation33_spill] sm:$0xff] %v9253_v34  ;;  %v10393_v36 = vld [vmem:[#allocation36_spill] sm:$0xff]  ;;  %v10394_v39 = vld [vmem:[#allocation19_spill] sm:$0xff] }
 0x57e   :  { %4590 = vmatprep.subr.bf16.mxu0 %v10387_v28  ;;  %v10395_v28 = vld [vmem:[#allocation37_spill] sm:$0xff] }
 0x580   :  { %4509 = vmatpush1.bf16.msra.mxu1 %v9245_v24  ;;  %v10397_v24 = vld [vmem:[#allocation40_spill] sm:$0xff] }
 0x581   :  { %4591 = vmatpush1.bf16.msra.mxu0 %v10389_v49  ;;  %4510 = vmatprep.subr.bf16.mxu1 %v9249_v32  ;;  %v10398_v49 = vld [vmem:[#allocation21_spill] sm:$0xff]  ;;  %v10400_v32 = vld [vmem:[#allocation22_spill] sm:$0xff] }
 0x582   :  { %4592 = vmatprep.subr.bf16.mxu0 %v10391_v52  ;;  %v10401_v52 = vld [vmem:[#allocation44_spill] sm:$0xff] }
 0x584   :  { %4511 = vmatpush1.bf16.msra.mxu1 %v9253_v34  ;;  %v10403_v34 = vld [vmem:[#allocation45_spill] sm:$0xff] }
 0x585   :  { %4593 = vmatpush1.bf16.msra.mxu0 %v10393_v36  ;;  %4512 = vmatprep.subr.bf16.mxu1 %v10394_v39  ;;  %v10404_v36 = vld [vmem:[#allocation24_spill] sm:$0xff] }
 0x586   :  { %4594 = vmatprep.subr.bf16.mxu0 %v10395_v28  ;;  %v10405_v39 = vld [vmem:[#allocation48_spill] sm:$0xff]  ;;  %v10406_v28 = vld [vmem:[#allocation25_spill] sm:$0xff] }
 0x588   :  { %4513 = vmatpush1.bf16.msra.mxu1 %v10396_v8  ;;  %v10407_v8 = vld [vmem:[#allocation51_spill] sm:$0xff] }
 0x589   :  { %4595 = vmatpush1.bf16.msra.mxu0 %v10397_v24  ;;  %4514 = vmatprep.subr.bf16.mxu1 %v10398_v49  ;;  %v10409_v24 = vld [vmem:[#allocation54_spill] sm:$0xff] }
 0x58a   :  { %4596 = vmatprep.subr.bf16.mxu0 %v10399_v54  ;;  %v10408_v54 = vld [vmem:[#allocation26_spill] sm:$0xff] }
 0x58b   :  { %v10413_v49 = vld [vmem:[#allocation58_spill] sm:$0xff] }
 0x58c   :  { %4515 = vmatpush1.bf16.msra.mxu1 %v10400_v32  ;;  %v10410_v32 = vld [vmem:[#allocation27_spill] sm:$0xff] }
 0x58d   :  { %4597 = vmatpush1.bf16.msra.mxu0 %v10401_v52  ;;  %4516 = vmatprep.subr.bf16.mxu1 %v10402_v51  ;;  %v10411_v51 = vld [vmem:[#allocation55_spill] sm:$0xff] }
 0x58e   :  { %4598 = vmatprep.subr.bf16.mxu0 %v10403_v34  ;;  %v10412_v34 = vld [vmem:[#allocation30_spill] sm:$0xff]  ;;  %v10414_v52 = vld [vmem:[#allocation31_spill] sm:$0xff] }
 0x590   :  { %4517 = vmatpush1.bf16.msra.mxu1 %v10404_v36  ;;  %v10415_v36 = vld [vmem:[#allocation59_spill] sm:$0xff] }
 0x591   :  { %4599 = vmatpush1.bf16.msra.mxu0 %v10405_v39  ;;  %4694 = vmatprep.subr.bf16.mxu1 %v10406_v28  ;;  %v10416_v39 = vld [vmem:[#allocation34_spill] sm:$0xff] }
 0x592   :  { %4776 = vmatprep.subr.bf16.mxu0 %v10407_v8  ;;  %v10417_v28 = vld [vmem:[#allocation62_spill] sm:$0xff]  ;;  %v10419_v8 = vld [vmem:[#allocation64_spill] sm:$0xff] }
 0x593   :  { %4535 = vmatmul.mubr.bf16.vlgmr.msra.gmra.mrb[16].mxu1 %v8763_v58 }
 0x594   :  { %4617 = vmatmul.mubr.bf16.vlgmr.msra.gmra.mrb[32].mxu0 %v8763_v58  ;;  %4695 = vmatpush1.bf16.msra.mxu1 %v10408_v54  ;;  %v10418_v58 = vld [vmem:[#allocation35_spill] sm:$0xff]  ;;  %v10420_v54 = vld [vmem:[#allocation38_spill] sm:$0xff] }
 0x595   :  { %4777 = vmatpush1.bf16.msra.mxu0 %v10409_v24  ;;  %4696 = vmatprep.subr.bf16.mxu1 %v10410_v32  ;;  %v10421_v24 = vld [vmem:[#allocation68_spill] sm:$0xff]  ;;  %v10422_v32 = vld [vmem:[#allocation39_spill] sm:$0xff] }
 0x596   :  { %4778 = vmatprep.subr.bf16.mxu0 %v10411_v51  ;;  %v10423_v51 = vld [vmem:[#allocation69_spill] sm:$0xff] }
 0x598   :  { %4697 = vmatpush1.bf16.msra.mxu1 %v10412_v34  ;;  %v10424_v34 = vld [vmem:[#allocation42_spill] sm:$0xff] }
 0x599   :  { %4779 = vmatpush1.bf16.msra.mxu0 %v10413_v49  ;;  %4698 = vmatprep.subr.bf16.mxu1 %v10414_v52  ;;  %v10425_v49 = vld [vmem:[#allocation72_spill] sm:$0xff]  ;;  %v10426_v52 = vld [vmem:[#allocation43_spill] sm:$0xff] }
 0x59a   :  { %4780 = vmatprep.subr.bf16.mxu0 %v10415_v36 }
 0x59c   :  { %4699 = vmatpush1.bf16.msra.mxu1 %v10416_v39 }
 0x59d   :  { %4781 = vmatpush1.bf16.msra.mxu0 %v10417_v28  ;;  %4700 = vmatprep.subr.bf16.mxu1 %v10418_v58  ;;  %v10427_v28 = vld [vmem:[#allocation73_spill] sm:$0xff] }
 0x59e   :  { %4782 = vmatprep.subr.bf16.mxu0 %v10419_v8 }
 0x5a0   :  { %4701 = vmatpush1.bf16.msra.mxu1 %v10420_v54 }
 0x5a1   :  { %4783 = vmatpush1.bf16.msra.mxu0 %v10421_v24  ;;  %4702 = vmatprep.subr.bf16.mxu1 %v10422_v32  ;;  %v10428_v32 = vld [vmem:[#allocation46_spill] sm:$0xff] }
 0x5a2   :  { %4784 = vmatprep.subr.bf16.mxu0 %v10423_v51 }
 0x5a4   :  { %4703 = vmatpush1.bf16.msra.mxu1 %v10424_v34  ;;  %v10429_v34 = vld [vmem:[#allocation47_spill] sm:$0xff] }
 0x5a5   :  { %4785 = vmatpush1.bf16.msra.mxu0 %v10425_v49  ;;  %4704 = vmatprep.subr.bf16.mxu1 %v10426_v52  ;;  %v10430_v49 = vld [vmem:[#allocation49_spill] sm:$0xff]  ;;  %v10431_v52 = vld [vmem:[#allocation50_spill] sm:$0xff] }
 0x5a6   :  { %v9292_v36 = vpop.f32.mrb[8].mxu1  ;;  %v9294_v39 = vpop.f32.mrb[24].mxu0  ;;  %4786 = vmatprep.subr.bf16.mxu0 %v10427_v28  ;;  %v10432_v28 = vld [vmem:[#allocation52_spill] sm:$0xff] }
 0x5a7   :  { %v9297_v58 = vpop.f32.mrb[9].mxu1  ;;  %v4292_v8 = vpop.f32.mrb[25].mxu0 }
 0x5a8   :  { %v4212_v54 = vpop.f32.mrb[10].mxu1  ;;  %v4294_v24 = vpop.f32.mrb[26].mxu0  ;;  %4705 = vmatpush1.bf16.msra.mxu1 %v10428_v32  ;;  %v10439_v32 = vld [vmem:[#allocation84_spill] sm:$0xff] }
 0x5a9   :  { %v4213_v51 = vpop.f32.mrb[11].mxu1  ;;  %v4295_v48 = vpop.f32.mrb[27].mxu0  ;;  %4787 = vmatpush1.bf16.msra.mxu0 %v8545_v60  ;;  %4706 = vmatprep.subr.bf16.mxu1 %v10429_v34  ;;  %v10433_v54 = vld [vmem:[#allocation53_spill] sm:$0xff]  ;;  %v10434_v60 = vld [vmem:[#allocation56_spill] sm:$0xff]  ;;  %v10437_v24 = vld [vmem:[#allocation83_spill] sm:$0xff] }
 0x5aa   :  { %4788 = vmatprep.subr.bf16.mxu0 %v8551_v59  ;;  %v10435_v48 = vld [vmem:[#allocation82_spill] sm:$0xff]  ;;  %v10436_v59 = vld [vmem:[#allocation57_spill] sm:$0xff] }
 0x5ab   :  { %v10441_v51 = vld [vmem:[#allocation85_spill] sm:$0xff]  ;;  %v10443_v34 = vld [vmem:[#allocation86_spill] sm:$0xff] }
 0x5ac   :  { %4707 = vmatpush1.bf16.msra.mxu1 %v10430_v49  ;;  %v10445_v49 = vld [vmem:[#allocation87_spill] sm:$0xff] }
 0x5ad   :  { %4789 = vmatpush1.bf16.msra.mxu0 %v8561_v10  ;;  %4708 = vmatprep.subr.bf16.mxu1 %v10431_v52  ;;  %v10438_v10 = vld [vmem:[#allocation60_spill] sm:$0xff]  ;;  %v10446_v52 = vld [vmem:[#allocation70_spill] sm:$0xff] }
 0x5ae   :  { %4790 = vmatprep.subr.bf16.mxu0 %v8564_v55  ;;  %v10440_v55 = vld [vmem:[#allocation61_spill] sm:$0xff] }
 0x5b0   :  { %4709 = vmatpush1.bf16.msra.mxu1 %v10432_v28  ;;  %v10447_v28 = vld [vmem:[#allocation88_spill] sm:$0xff] }
 0x5b1   :  { %4791 = vmatpush1.bf16.msra.mxu0 %v8573_v0  ;;  %4710 = vmatprep.subr.bf16.mxu1 %v10433_v54  ;;  %v10442_v0 = vld [vmem:[#allocation65_spill] sm:$0xff]  ;;  %v10448_v54 = vld [vmem:[#allocation71_spill] sm:$0xff] }
 0x5b2   :  { %4792 = vmatprep.subr.bf16.mxu0 %v8576_v21  ;;  %v10444_v21 = vld [vmem:[#allocation67_spill] sm:$0xff] }
 0x5b4   :  { %4711 = vmatpush1.bf16.msra.mxu1 %v10434_v60  ;;  %v9326_v60 = vld [vmem:[#allocation11 + $0x48c] ss:$48 sps:$4 sm:$0xff]  }
 0x5b5   :  { %4793 = vmatpush1.bf16.msra.mxu0 %v10435_v48  ;;  %4712 = vmatprep.subr.bf16.mxu1 %v10436_v59  ;;  %10449 = vst [vmem:[#allocation36_spill] sm:$0xff] %v9326_v60  ;;  %v10450_v48 = vld [vmem:[#allocation74_spill] sm:$0xff] }
 0x5b6   :  { %4794 = vmatprep.subr.bf16.mxu0 %v10437_v24  ;;  %v9330_v59 = vld [vmem:[#allocation11 + $0x488] ss:$48 sps:$4 sm:$0xff]   ;;  %v10452_v24 = vld [vmem:[#allocation75_spill] sm:$0xff] }
 0x5b7   :  { %10451 = vst [vmem:[#allocation19_spill] sm:$0xff] %v9330_v59 }
 0x5b8   :  { %4713 = vmatpush1.bf16.msra.mxu1 %v10438_v10  ;;  %v9334_v10 = vld [vmem:[#allocation11 + $0x4ec] ss:$48 sps:$4 sm:$0xff]  }
 0x5b9   :  { %4795 = vmatpush1.bf16.msra.mxu0 %v10439_v32  ;;  %4714 = vmatprep.subr.bf16.mxu1 %v10440_v55  ;;  %10453 = vst [vmem:[#allocation37_spill] sm:$0xff] %v9334_v10  ;;  %v10454_v32 = vld [vmem:[#allocation76_spill] sm:$0xff] }
 0x5ba   :  { %4796 = vmatprep.subr.bf16.mxu0 %v10441_v51  ;;  %v9338_v55 = vld [vmem:[#allocation11 + $0x4e8] ss:$48 sps:$4 sm:$0xff]   ;;  %v10456_v51 = vld [vmem:[#allocation77_spill] sm:$0xff] }
 0x5bb   :  { %10455 = vst [vmem:[#allocation20_spill] sm:$0xff] %v9338_v55 }
 0x5bc   :  { %4715 = vmatpush1.bf16.msra.mxu1 %v10442_v0  ;;  %v9342_v0 = vld [vmem:[#allocation11 + $0x54c] ss:$48 sps:$4 sm:$0xff]  }
 0x5bd   :  { %4797 = vmatpush1.bf16.msra.mxu0 %v10443_v34  ;;  %4716 = vmatprep.subr.bf16.mxu1 %v10444_v21  ;;  %10457 = vst [vmem:[#allocation40_spill] sm:$0xff] %v9342_v0  ;;  %v10458_v34 = vld [vmem:[#allocation78_spill] sm:$0xff] }
 0x5be   :  { %4798 = vmatprep.subr.bf16.mxu0 %v10445_v49  ;;  %v9346_v21 = vld [vmem:[#allocation11 + $0x548] ss:$48 sps:$4 sm:$0xff]   ;;  %v10460_v49 = vld [vmem:[#allocation79_spill] sm:$0xff] }
 0x5bf   :  { %10459 = vst [vmem:[#allocation21_spill] sm:$0xff] %v9346_v21 }
 0x5c0   :  { %4717 = vmatpush1.bf16.msra.mxu1 %v10446_v52  ;;  %v9350_v52 = vld [vmem:[#allocation11 + $0x5ac] ss:$48 sps:$4 sm:$0xff]  }
 0x5c1   :  { %4799 = vmatpush1.bf16.msra.mxu0 %v10447_v28  ;;  %4718 = vmatprep.subr.bf16.mxu1 %v10448_v54  ;;  %10461 = vst [vmem:[#allocation41_spill] sm:$0xff] %v9350_v52  ;;  %v10462_v28 = vld [vmem:[#allocation80_spill] sm:$0xff] }
 0x5c2   :  { %4800 = vmatprep.subr.bf16.mxu0 %v9326_v60  ;;  %v9354_v54 = vld [vmem:[#allocation11 + $0x5a8] ss:$48 sps:$4 sm:$0xff]  }
 0x5c3   :  { %10463 = vst [vmem:[#allocation22_spill] sm:$0xff] %v9354_v54 }
 0x5c4   :  { %4719 = vmatpush1.bf16.msra.mxu1 %v10450_v48  ;;  %v10464_v48 = vld [vmem:[#allocation81_spill] sm:$0xff] }
 0x5c5   :  { %4801 = vmatpush1.bf16.msra.mxu0 %v9330_v59  ;;  %4720 = vmatprep.subr.bf16.mxu1 %v10452_v24  ;;  %v10465_v24 = vld [vmem:[#allocation89_spill] sm:$0xff] }
 0x5c6   :  { %4802 = vmatprep.subr.bf16.mxu0 %v9334_v10 }
 0x5c8   :  { %4721 = vmatpush1.bf16.msra.mxu1 %v10454_v32  ;;  %v414_v32 = vrot.slane %v8648_v13, %v8637_v6 }
 0x5c9   :  { %4803 = vmatpush1.bf16.msra.mxu0 %v9338_v55  ;;  %4722 = vmatprep.subr.bf16.mxu1 %v10456_v51  ;;  %v10466_v51 = vld [vmem:[#allocation90_spill] sm:$0xff] }
 0x5ca   :  { %4804 = vmatprep.subr.bf16.mxu0 %v9342_v0 }
 0x5cc   :  { %4723 = vmatpush1.bf16.msra.mxu1 %v10458_v34  ;;  %v402_v34 = vrot.slane %v8648_v13, %v10466_v51 }
 0x5cd   :  { %4805 = vmatpush1.bf16.msra.mxu0 %v9346_v21  ;;  %4724 = vmatprep.subr.bf16.mxu1 %v10460_v49  ;;  %v6361_v49 = vadd.f32 %v4292_v8, %v414_v32  ;;  %v10467_v21 = vld [vmem:[#allocation91_spill] sm:$0xff] }
 0x5ce   :  { %4806 = vmatprep.subr.bf16.mxu0 %v9350_v52  ;;  %v406_v52 = vrot.slane %v8648_v13, %v10467_v21 }
 0x5cf   :  { %v4649_v0 = vmul.f32 0.5, %v6361_v49 }
 0x5d0   :  { %4725 = vmatpush1.bf16.msra.mxu1 %v10462_v28  ;;  %v6358_v28 = vadd.f32 %v9292_v36, %v402_v34  ;;  %v6359_v55 = vadd.f32 %v9297_v58, %v406_v52 }
 0x5d1   :  { %4807 = vmatpush1.bf16.msra.mxu0 %v9354_v54  ;;  %4735 = vmatprep.subr.bf16.mxu1 %v10464_v48  ;;  %7087 = vtanh.f32 %v4649_v0  ;;  %v9367_v48 = vld [vmem:[#allocation10 + $0x10] sm:$0xff] }
 0x5d2   :  { %4817 = vmatprep.subr.bf16.mxu0 %v10465_v24  ;;  %v4637_v54 = vmul.f32 0.5, %v6358_v28  ;;  %v4638_v24 = vmul.f32 0.5, %v6359_v55  ;;  %v418_v10 = vrot.slane %v9367_v48, %v8078_v42  ;;  %v426_v8 = vrot.slane %v9367_v48, %v8497_v53 }
 0x5d3   :  { %v430_v32 = vrot.slane %v9367_v48, %v8506_v43 }
 0x5d4   :  { %7089 = vtanh.f32 %v4637_v54 }
 0x5d5   :  { %7091 = vtanh.f32 %v4638_v24 }
 0x5db   :  { %v7088_v40 = vpop.eup %7087 }
 0x5dc   :  { %v4655_v24 = vadd.f32 1.0, %v7088_v40 }
 0x5de   :  { %v7090_v53 = vpop.eup %7089  ;;  %v4658_v35 = vmul.f32 0.5, %v4655_v24 }
 0x5df   :  { %v7092_v37 = vpop.eup %7091  ;;  %v4643_v43 = vadd.f32 1.0, %v7090_v53  ;;  %v422_v53 = vrot.slane %v9367_v48, %v8081_v44 }
 0x606   :  { %v4372_v36 = vpop.f32.mrb[12].mxu1 }
 0x607   :  { %v6362_v34 = vadd.f32 %v4372_v36, %v418_v10  ;;  %v4454_v49 = vpop.f32.mrb[28].mxu0  ;;  %v4374_v58 = vpop.f32.mrb[13].mxu1  ;;  %v4644_v10 = vadd.f32 1.0, %v7092_v37  ;;  %v4646_v36 = vmul.f32 0.5, %v4643_v43  ;;  %v410_v43 = vrot.slane %v8648_v13, %v8634_v5 }
 0x608   :  { %v6364_v52 = vadd.f32 %v4454_v49, %v426_v8  ;;  %v4456_v0 = vpop.f32.mrb[29].mxu0  ;;  %v4376_v28 = vpop.f32.mrb[14].mxu1  ;;  %v4676_v49 = vmul.f32 %v4658_v35, %v8643_v17  ;;  %v6363_v37 = vadd.f32 %v4374_v58, %v422_v53 }
 0x609   :  { %v4650_v59 = vmul.f32 0.5, %v6362_v34  ;;  %v6365_v55 = vadd.f32 %v4456_v0, %v430_v32  ;;  %v4458_v54 = vpop.f32.mrb[30].mxu0  ;;  %v4377_v60 = vpop.f32.mrb[15].mxu1  ;;  %v4647_v32 = vmul.f32 0.5, %v4644_v10  ;;  %v6360_v17 = vadd.f32 %v9294_v39, %v410_v43 }
 0x60a   :  { %7093 = vtanh.f32 %v6364_v52  ;;  %v4459_v42 = vpop.f32.mrb[31].mxu0  ;;  %v438_v54 = vrot.slane %v9367_v48, %v10467_v21 }
 0x60b   :  { %7095 = vtanh.f32 %v4650_v59  ;;  %v4639_v35 = vmul.f32 0.5, %v6360_v17 }
 0x60c   :  { %7097 = vtanh.f32 %v6365_v55  ;;  %v434_v55 = vrot.slane %v9367_v48, %v10466_v51 }
 0x614   :  { %v7094_v33 = vpop.eup %7093 }
 0x615   :  { %v7096_v8 = vpop.eup %7095  ;;  %v4679_v34 = vmul.f32 %v7094_v33, %v4646_v36  ;;  %v4651_v33 = vmul.f32 0.5, %v6363_v37 }
 0x616   :  { %v4656_v0 = vadd.f32 1.0, %v7096_v8  ;;  %v7098_v60 = vpop.eup %7097 }
 0x617   :  { %v9376_v28 = vadd.f32 %v4679_v34, %v4676_v49  ;;  %v4680_v59 = vmul.f32 %v7098_v60, %v4647_v32  ;;  %7099 = vtanh.f32 %v4651_v33 }
 0x618   :  { %v4659_v42 = vmul.f32 0.5, %v4656_v0  ;;  %7101 = vtanh.f32 %v4639_v35 }
 0x61a   :  { %v4677_v40 = vmul.f32 %v4659_v42, %v8645_v56  ;;  %v442_v56 = vrot.slane %v9367_v48, %v8634_v5 }
 0x61c   :  { %v9379_v52 = vadd.f32 %v4680_v59, %v4677_v40 }
 0x621   :  { %v7100_v34 = vpop.eup %7099 }
 0x622   :  { %v7102_v40 = vpop.eup %7101  ;;  %v4657_v53 = vadd.f32 1.0, %v7100_v34 }
 0x623   :  { %v4645_v43 = vadd.f32 1.0, %v7102_v40  ;;  %v10478_v40 = vld [vmem:[#allocation104_spill] sm:$0xff] }
 0x624   :  { %v4660_v37 = vmul.f32 0.5, %v4657_v53 }
 0x625   :  { %v4648_v17 = vmul.f32 0.5, %v4645_v43  ;;  %v10479_v43 = vld [vmem:[#allocation105_spill] sm:$0xff] }
 0x626   :  { %v4678_v35 = vmul.f32 %v4660_v37, %v8652_v26  ;;  %v10480_v37 = vld [vmem:[#allocation106_spill] sm:$0xff] }
 0x666   :  { %v4536_v24 = vpop.f32.mrb[16].mxu1 }
 0x667   :  { %v6366_v10 = vadd.f32 %v4536_v24, %v434_v55  ;;  %v4618_v36 = vpop.f32.mrb[32].mxu0  ;;  %v4538_v13 = vpop.f32.mrb[17].mxu1 }
 0x668   :  { %v6368_v58 = vadd.f32 %v4618_v36, %v442_v56  ;;  %v6367_v8 = vadd.f32 %v4538_v13, %v438_v54  ;;  %v4620_v39 = vpop.f32.mrb[33].mxu0  ;;  %v4540_v49 = vpop.f32.mrb[18].mxu1 }
 0x669   :  { %7103 = vtanh.f32 %v6366_v10  ;;  %v4622_v32 = vpop.f32.mrb[34].mxu0  ;;  %v4541_v0 = vpop.f32.mrb[19].mxu1 }
 0x66a   :  { %v4665_v60 = vmul.f32 0.5, %v6368_v58  ;;  %v4664_v42 = vmul.f32 0.5, %v6367_v8  ;;  %v4623_v59 = vpop.f32.mrb[35].mxu0  ;;  %v446_v32 = vrot.slane %v9367_v48, %v8637_v6 }
 0x66b   :  { %v10477_v59 = vld [vmem:[#allocation103_spill] sm:$0xff] }
 0x66c   :  { %7105 = vtanh.f32 %v4665_v60  ;;  %v6369_v26 = vadd.f32 %v4620_v39, %v446_v32  ;;  %v10475_v39 = vld [vmem:[#allocation101_spill] sm:$0xff]  ;;  %v10492_v32 = vld [vmem:[#allocation118_spill] sm:$0xff] }
 0x66d   :  { %7107 = vtanh.f32 %v4664_v42 }
 0x66e   :  { %7109 = vtanh.f32 %v9379_v52  ;;  %v4666_v48 = vmul.f32 0.5, %v6369_v26  ;;  %v10494_v26 = vld [vmem:[#allocation120_spill] sm:$0xff] }
 0x66f   :  { %7111 = vtanh.f32 %v9376_v28 }
 0x670   :  { %7113 = vtanh.f32 %v4666_v48  ;;  %v10495_v48 = vld [vmem:[#allocation121_spill] sm:$0xff] }
 0x673   :  { %v7104_v33 = vpop.eup %7103 }
 0x674   :  { %v4681_v55 = vmul.f32 %v7104_v33, %v4648_v17  ;;  %v10481_v17 = vld [vmem:[#allocation107_spill] sm:$0xff]  ;;  %v10482_v33 = vld [vmem:[#allocation108_spill] sm:$0xff] }
 0x676   :  { %v7106_v56 = vpop.eup %7105  ;;  %v9395_v54 = vadd.f32 %v4681_v55, %v4678_v35 }
 0x677   :  { %v7108_v24 = vpop.eup %7107  ;;  %v4671_v10 = vadd.f32 1.0, %v7106_v56  ;;  %v10483_v56 = vld [vmem:[#allocation109_spill] sm:$0xff] }
 0x678   :  { %v4670_v36 = vadd.f32 1.0, %v7108_v24  ;;  %v7110_v58 = vpop.eup %7109  ;;  %7115 = vtanh.f32 %v9395_v54  ;;  %v10484_v24 = vld [vmem:[#allocation110_spill] sm:$0xff] }
 0x679   :  { %v4674_v13 = vmul.f32 0.5, %v4671_v10  ;;  %v7112_v49 = vpop.eup %7111 }
 0x67a   :  { %v4673_v8 = vmul.f32 0.5, %v4670_v36  ;;  %v10485_v36 = vld [vmem:[#allocation111_spill] sm:$0xff] }
 0x67b   :  { %v4689_v34 = vmul.f32 %v7110_v58, %v4674_v13  ;;  %v10486_v13 = vld [vmem:[#allocation112_spill] sm:$0xff] }
 0x67c   :  { %v4688_v0 = vmul.f32 %v7112_v49, %v4673_v8  ;;  %v10487_v8 = vld [vmem:[#allocation113_spill] sm:$0xff]  ;;  %v10488_v49 = vld [vmem:[#allocation114_spill] sm:$0xff] }
 0x67d   :  { %v9399_v60 = vpack.c.bf16 %v4689_v34, %v4689_v34  ;;  %v10489_v34 = vld [vmem:[#allocation115_spill] sm:$0xff] }
 0x67e   :  { %v9401_v42 = vpack.c.bf16 %v4688_v0, %v4688_v0  ;;  %v10493_v0 = vld [vmem:[#allocation119_spill] sm:$0xff] }
 0x67f   :  { %4726 = vmatprep.mubr.bf16.mxu1 %v9399_v60  ;;  %4808 = vmatprep.mubr.bf16.mxu0 %v9399_v60 }
 0x680   :  { %4727 = vmatmul.mubr.bf16.vlgmr.msra.gmra.mrb[20].mxu1 %v9401_v42  ;;  %4809 = vmatmul.mubr.bf16.vlgmr.msra.gmra.mrb[36].mxu0 %v9401_v42 }
 0x681   :  { %4736 = vmatpush1.bf16.msra.mxu1 %v8670_v46  ;;  %4818 = vmatpush1.bf16.msra.mxu0 %v8673_v62  ;;  %v10468_v46 = vld [vmem:[#allocation94_spill] sm:$0xff]  ;;  %v10469_v62 = vld [vmem:[#allocation95_spill] sm:$0xff] }
 0x682   :  { %4737 = vmatprep.subr.bf16.mxu1 %v8676_v41  ;;  %4819 = vmatprep.subr.bf16.mxu0 %v8679_v7  ;;  %v10470_v41 = vld [vmem:[#allocation96_spill] sm:$0xff]  ;;  %v10471_v7 = vld [vmem:[#allocation97_spill] sm:$0xff] }
 0x683   :  { %4767 = vmatprep.mubr.bf16.mxu1 %v10200_v45  ;;  %4849 = vmatprep.mubr.bf16.mxu0 %v10200_v45 }
 0x685   :  { %4738 = vmatpush1.bf16.msra.mxu1 %v8684_v9  ;;  %4820 = vmatpush1.bf16.msra.mxu0 %v8687_v12  ;;  %v10472_v9 = vld [vmem:[#allocation98_spill] sm:$0xff]  ;;  %v10473_v12 = vld [vmem:[#allocation99_spill] sm:$0xff] }
 0x686   :  { %4739 = vmatprep.subr.bf16.mxu1 %v8690_v14  ;;  %4821 = vmatprep.subr.bf16.mxu0 %v8693_v16  ;;  %v10474_v14 = vld [vmem:[#allocation100_spill] sm:$0xff]  ;;  %v7114_v16 = vpop.eup %7113 }
 0x687   :  { %v4672_v53 = vadd.f32 1.0, %v7114_v16  ;;  %v7116_v35 = vpop.eup %7115  ;;  %v10503_v16 = vld [vmem:[#allocation129_spill] sm:$0xff] }
 0x689   :  { %4740 = vmatpush1.bf16.msra.mxu1 %v8696_v30  ;;  %4822 = vmatpush1.bf16.msra.mxu0 %v10468_v46  ;;  %v10476_v30 = vld [vmem:[#allocation102_spill] sm:$0xff]  ;;  %v4675_v55 = vmul.f32 0.5, %v4672_v53 }
 0x68a   :  { %4741 = vmatprep.subr.bf16.mxu1 %v10469_v62  ;;  %4823 = vmatprep.subr.bf16.mxu0 %v10470_v41  ;;  %v10496_v46 = vld [vmem:[#allocation122_spill] sm:$0xff]  ;;  %v10497_v62 = vld [vmem:[#allocation123_spill] sm:$0xff]  ;;  %v10498_v41 = vld [vmem:[#allocation124_spill] sm:$0xff] }
 0x68b   :  { %v4690_v10 = vmul.f32 %v7116_v35, %v4675_v55  ;;  %v10508_v53 = vld [vmem:[#allocation134_spill] sm:$0xff]  ;;  %v10513_v35 = vld [vmem:[#allocation139_spill] sm:$0xff]  ;;  %v10514_v55 = vld [vmem:[#allocation140_spill] sm:$0xff] }
 0x68d   :  { %4742 = vmatpush1.bf16.msra.mxu1 %v10471_v7  ;;  %4824 = vmatpush1.bf16.msra.mxu0 %v10472_v9  ;;  %v9440_v58 = vpack.c.bf16 %v4690_v10, %v4690_v10  ;;  %v10499_v7 = vld [vmem:[#allocation125_spill] sm:$0xff]  ;;  %v10500_v9 = vld [vmem:[#allocation126_spill] sm:$0xff]  ;;  %v10517_v10 = vld [vmem:[#allocation143_spill] sm:$0xff] }
 0x68e   :  { %4743 = vmatprep.subr.bf16.mxu1 %v10473_v12  ;;  %4825 = vmatprep.subr.bf16.mxu0 %v10474_v14  ;;  %v10501_v12 = vld [vmem:[#allocation127_spill] sm:$0xff]  ;;  %v10502_v14 = vld [vmem:[#allocation128_spill] sm:$0xff] }
 0x691   :  { %4744 = vmatpush1.bf16.msra.mxu1 %v10475_v39  ;;  %4826 = vmatpush1.bf16.msra.mxu0 %v10476_v30  ;;  %v10504_v39 = vld [vmem:[#allocation130_spill] sm:$0xff]  ;;  %v10505_v30 = vld [vmem:[#allocation131_spill] sm:$0xff] }
 0x692   :  { %4745 = vmatprep.subr.bf16.mxu1 %v10477_v59  ;;  %4827 = vmatprep.subr.bf16.mxu0 %v10478_v40  ;;  %v10506_v59 = vld [vmem:[#allocation132_spill] sm:$0xff]  ;;  %v10507_v40 = vld [vmem:[#allocation133_spill] sm:$0xff] }
 0x695   :  { %4746 = vmatpush1.bf16.msra.mxu1 %v10479_v43  ;;  %4828 = vmatpush1.bf16.msra.mxu0 %v10480_v37  ;;  %v10509_v43 = vld [vmem:[#allocation135_spill] sm:$0xff]  ;;  %v10510_v37 = vld [vmem:[#allocation136_spill] sm:$0xff] }
 0x696   :  { %4747 = vmatprep.subr.bf16.mxu1 %v10481_v17  ;;  %4829 = vmatprep.subr.bf16.mxu0 %v10482_v33  ;;  %v10511_v17 = vld [vmem:[#allocation137_spill] sm:$0xff]  ;;  %v10512_v33 = vld [vmem:[#allocation138_spill] sm:$0xff] }
 0x699   :  { %4748 = vmatpush1.bf16.msra.mxu1 %v10483_v56  ;;  %4830 = vmatpush1.bf16.msra.mxu0 %v10484_v24  ;;  %v10515_v56 = vld [vmem:[#allocation141_spill] sm:$0xff]  ;;  %v10516_v24 = vld [vmem:[#allocation142_spill] sm:$0xff] }
 0x69a   :  { %4749 = vmatprep.subr.bf16.mxu1 %v8751_v3  ;;  %4831 = vmatprep.subr.bf16.mxu0 %v8754_v20  ;;  %v10490_v3 = vld [vmem:[#allocation116_spill] sm:$0xff]  ;;  %v10491_v20 = vld [vmem:[#allocation117_spill] sm:$0xff] }
 0x69d   :  { %4750 = vmatpush1.bf16.msra.mxu1 %v10485_v36  ;;  %4832 = vmatpush1.bf16.msra.mxu0 %v10486_v13  ;;  %v10518_v36 = vld [vmem:[#allocation144_spill] sm:$0xff]  ;;  %v10519_v13 = vld [vmem:[#allocation145_spill] sm:$0xff] }
 0x69e   :  { %4858 = vmatprep.subr.bf16.mxu1 %v10487_v8  ;;  %4940 = vmatprep.subr.bf16.mxu0 %v10488_v49  ;;  %v10520_v8 = vld [vmem:[#allocation146_spill] sm:$0xff]  ;;  %v10521_v49 = vld [vmem:[#allocation147_spill] sm:$0xff] }
 0x6a0   :  { %4768 = vmatmul.mubr.bf16.vlgmr.msra.gmra.mrb[20].mxu1 %v9440_v58  ;;  %4850 = vmatmul.mubr.bf16.vlgmr.msra.gmra.mrb[36].mxu0 %v9440_v58 }
 0x6a1   :  { %4859 = vmatpush1.bf16.msra.mxu1 %v10489_v34  ;;  %4890 = vmatprep.mubr.bf16.mxu1 %v9399_v60  ;;  %v10522_v34 = vld [vmem:[#allocation148_spill] sm:$0xff] }
 0x6a2   :  { %4941 = vmatpush1.bf16.msra.mxu0 %v10490_v3  ;;  %4972 = vmatprep.mubr.bf16.mxu0 %v9399_v60  ;;  %v10523_v3 = vld [vmem:[#allocation149_spill] sm:$0xff] }
 0x6a3   :  { %4860 = vmatprep.subr.bf16.mxu1 %v10491_v20  ;;  %4942 = vmatprep.subr.bf16.mxu0 %v10492_v32  ;;  %v10524_v20 = vld [vmem:[#allocation150_spill] sm:$0xff]  ;;  %v10525_v32 = vld [vmem:[#allocation151_spill] sm:$0xff] }
 0x6a5   :  { %4861 = vmatpush1.bf16.msra.mxu1 %v10493_v0  ;;  %v10526_v0 = vld [vmem:[#allocation152_spill] sm:$0xff] }
 0x6a6   :  { %4943 = vmatpush1.bf16.msra.mxu0 %v10494_v26  ;;  %4862 = vmatprep.subr.bf16.mxu1 %v10495_v48  ;;  %v10527_v26 = vld [vmem:[#allocation153_spill] sm:$0xff]  ;;  %v10528_v48 = vld [vmem:[#allocation154_spill] sm:$0xff] }
 0x6a7   :  { %4944 = vmatprep.subr.bf16.mxu0 %v10496_v46  ;;  %v10529_v46 = vld [vmem:[#allocation155_spill] sm:$0xff] }
 0x6a9   :  { %4863 = vmatpush1.bf16.msra.mxu1 %v10497_v62  ;;  %v10530_v62 = vld [vmem:[#allocation156_spill] sm:$0xff] }
 0x6aa   :  { %4945 = vmatpush1.bf16.msra.mxu0 %v10498_v41  ;;  %4864 = vmatprep.subr.bf16.mxu1 %v10499_v7  ;;  %v10531_v41 = vld [vmem:[#allocation157_spill] sm:$0xff]  ;;  %v10532_v7 = vld [vmem:[#allocation158_spill] sm:$0xff] }
 0x6ab   :  { %4946 = vmatprep.subr.bf16.mxu0 %v10500_v9  ;;  %v10533_v9 = vld [vmem:[#allocation159_spill] sm:$0xff] }
 0x6ad   :  { %4865 = vmatpush1.bf16.msra.mxu1 %v10501_v12  ;;  %v10534_v12 = vld [vmem:[#allocation160_spill] sm:$0xff] }
 0x6ae   :  { %4947 = vmatpush1.bf16.msra.mxu0 %v10502_v14  ;;  %4866 = vmatprep.subr.bf16.mxu1 %v10503_v16  ;;  %v10535_v14 = vld [vmem:[#allocation161_spill] sm:$0xff]  ;;  %v10536_v16 = vld [vmem:[#allocation162_spill] sm:$0xff] }
 0x6af   :  { %4948 = vmatprep.subr.bf16.mxu0 %v10504_v39  ;;  %v10537_v39 = vld [vmem:[#allocation163_spill] sm:$0xff] }
 0x6b1   :  { %4867 = vmatpush1.bf16.msra.mxu1 %v10505_v30  ;;  %v10538_v30 = vld [vmem:[#allocation164_spill] sm:$0xff] }
 0x6b2   :  { %4949 = vmatpush1.bf16.msra.mxu0 %v10506_v59  ;;  %4868 = vmatprep.subr.bf16.mxu1 %v10507_v40  ;;  %v10539_v59 = vld [vmem:[#allocation165_spill] sm:$0xff]  ;;  %v10540_v40 = vld [vmem:[#allocation166_spill] sm:$0xff] }
 0x6b3   :  { %4950 = vmatprep.subr.bf16.mxu0 %v10508_v53  ;;  %v10541_v53 = vld [vmem:[#allocation167_spill] sm:$0xff] }
 0x6b5   :  { %4869 = vmatpush1.bf16.msra.mxu1 %v10509_v43  ;;  %v10542_v43 = vld [vmem:[#allocation168_spill] sm:$0xff] }
 0x6b6   :  { %4951 = vmatpush1.bf16.msra.mxu0 %v10510_v37  ;;  %4870 = vmatprep.subr.bf16.mxu1 %v10511_v17  ;;  %v10543_v37 = vld [vmem:[#allocation169_spill] sm:$0xff]  ;;  %v10544_v17 = vld [vmem:[#allocation170_spill] sm:$0xff] }
 0x6b7   :  { %4952 = vmatprep.subr.bf16.mxu0 %v10512_v33  ;;  %v10545_v33 = vld [vmem:[#allocation171_spill] sm:$0xff] }
 0x6b9   :  { %4871 = vmatpush1.bf16.msra.mxu1 %v10513_v35  ;;  %v10546_v35 = vld [vmem:[#allocation172_spill] sm:$0xff] }
 0x6ba   :  { %4953 = vmatpush1.bf16.msra.mxu0 %v10514_v55  ;;  %4872 = vmatprep.subr.bf16.mxu1 %v10515_v56  ;;  %v10547_v55 = vld [vmem:[#allocation173_spill] sm:$0xff]  ;;  %v10548_v56 = vld [vmem:[#allocation174_spill] sm:$0xff] }
 0x6bb   :  { %4954 = vmatprep.subr.bf16.mxu0 %v10516_v24  ;;  %v10549_v24 = vld [vmem:[#allocation175_spill] sm:$0xff] }
 0x6bd   :  { %4873 = vmatpush1.bf16.msra.mxu1 %v10517_v10  ;;  %v10550_v10 = vld [vmem:[#allocation176_spill] sm:$0xff] }
 0x6be   :  { %4955 = vmatpush1.bf16.msra.mxu0 %v10518_v36  ;;  %4874 = vmatprep.subr.bf16.mxu1 %v10519_v13  ;;  %v10551_v36 = vld [vmem:[#allocation177_spill] sm:$0xff]  ;;  %v10552_v13 = vld [vmem:[#allocation178_spill] sm:$0xff] }
 0x6bf   :  { %4956 = vmatprep.subr.bf16.mxu0 %v10520_v8  ;;  %v10553_v8 = vld [vmem:[#allocation179_spill] sm:$0xff] }
 0x6c1   :  { %4875 = vmatpush1.bf16.msra.mxu1 %v10521_v49  ;;  %v10554_v49 = vld [vmem:[#allocation180_spill] sm:$0xff] }
 0x6c2   :  { %4957 = vmatpush1.bf16.msra.mxu0 %v10522_v34  ;;  %4876 = vmatprep.subr.bf16.mxu1 %v10523_v3  ;;  %v10555_v34 = vld [vmem:[#allocation181_spill] sm:$0xff]  ;;  %v10556_v3 = vld [vmem:[#allocation182_spill] sm:$0xff] }
 0x6c3   :  { %4958 = vmatprep.subr.bf16.mxu0 %v10524_v20  ;;  %v10557_v20 = vld [vmem:[#allocation183_spill] sm:$0xff] }
 0x6c5   :  { %4877 = vmatpush1.bf16.msra.mxu1 %v10525_v32  ;;  %v10558_v32 = vld [vmem:[#allocation184_spill] sm:$0xff] }
 0x6c6   :  { %4959 = vmatpush1.bf16.msra.mxu0 %v10526_v0  ;;  %4878 = vmatprep.subr.bf16.mxu1 %v10527_v26  ;;  %v10559_v0 = vld [vmem:[#allocation185_spill] sm:$0xff]  ;;  %v10560_v26 = vld [vmem:[#allocation186_spill] sm:$0xff] }
 0x6c7   :  { %4960 = vmatprep.subr.bf16.mxu0 %v10528_v48  ;;  %v10561_v48 = vld [vmem:[#allocation187_spill] sm:$0xff] }
 0x6c9   :  { %4879 = vmatpush1.bf16.msra.mxu1 %v10529_v46  ;;  %v10562_v46 = vld [vmem:[#allocation188_spill] sm:$0xff] }
 0x6ca   :  { %4961 = vmatpush1.bf16.msra.mxu0 %v10530_v62  ;;  %4880 = vmatprep.subr.bf16.mxu1 %v10531_v41  ;;  %v10563_v62 = vld [vmem:[#allocation189_spill] sm:$0xff]  ;;  %v10564_v41 = vld [vmem:[#allocation190_spill] sm:$0xff] }
 0x6cb   :  { %4962 = vmatprep.subr.bf16.mxu0 %v10532_v7  ;;  %v10565_v7 = vld [vmem:[#allocation191_spill] sm:$0xff] }
 0x6cd   :  { %4881 = vmatpush1.bf16.msra.mxu1 %v10533_v9  ;;  %v10566_v9 = vld [vmem:[#allocation192_spill] sm:$0xff] }
 0x6ce   :  { %4963 = vmatpush1.bf16.msra.mxu0 %v10534_v12  ;;  %4882 = vmatprep.subr.bf16.mxu1 %v10535_v14  ;;  %v10567_v12 = vld [vmem:[#allocation193_spill] sm:$0xff]  ;;  %v10568_v14 = vld [vmem:[#allocation194_spill] sm:$0xff] }
 0x6cf   :  { %4964 = vmatprep.subr.bf16.mxu0 %v10536_v16  ;;  %v10569_v16 = vld [vmem:[#allocation195_spill] sm:$0xff] }
 0x6d1   :  { %4883 = vmatpush1.bf16.msra.mxu1 %v10537_v39  ;;  %v10570_v39 = vld [vmem:[#allocation196_spill] sm:$0xff] }
 0x6d2   :  { %4965 = vmatpush1.bf16.msra.mxu0 %v10538_v30  ;;  %4884 = vmatprep.subr.bf16.mxu1 %v10539_v59  ;;  %v10571_v30 = vld [vmem:[#allocation197_spill] sm:$0xff]  ;;  %v10572_v59 = vld [vmem:[#allocation198_spill] sm:$0xff] }
 0x6d3   :  { %4966 = vmatprep.subr.bf16.mxu0 %v10540_v40  ;;  %v10573_v40 = vld [vmem:[#allocation199_spill] sm:$0xff] }
 0x6d5   :  { %4885 = vmatpush1.bf16.msra.mxu1 %v10541_v53  ;;  %v10574_v53 = vld [vmem:[#allocation200_spill] sm:$0xff] }
 0x6d6   :  { %4967 = vmatpush1.bf16.msra.mxu0 %v10542_v43  ;;  %4886 = vmatprep.subr.bf16.mxu1 %v10543_v37  ;;  %v10575_v43 = vld [vmem:[#allocation201_spill] sm:$0xff]  ;;  %v10576_v37 = vld [vmem:[#allocation202_spill] sm:$0xff] }
 0x6d7   :  { %4968 = vmatprep.subr.bf16.mxu0 %v10544_v17  ;;  %v10577_v17 = vld [vmem:[#allocation203_spill] sm:$0xff] }
 0x6d9   :  { %4887 = vmatpush1.bf16.msra.mxu1 %v10545_v33  ;;  %v10578_v33 = vld [vmem:[#allocation204_spill] sm:$0xff] }
 0x6da   :  { %4969 = vmatpush1.bf16.msra.mxu0 %v10546_v35  ;;  %4888 = vmatprep.subr.bf16.mxu1 %v10547_v55  ;;  %v10579_v35 = vld [vmem:[#allocation205_spill] sm:$0xff]  ;;  %v10580_v55 = vld [vmem:[#allocation206_spill] sm:$0xff] }
 0x6db   :  { %4970 = vmatprep.subr.bf16.mxu0 %v10548_v56  ;;  %v10581_v56 = vld [vmem:[#allocation207_spill] sm:$0xff] }
 0x6dd   :  { %4889 = vmatpush1.bf16.msra.mxu1 %v10549_v24  ;;  %v10582_v24 = vld [vmem:[#allocation208_spill] sm:$0xff] }
 0x6de   :  { %4971 = vmatpush1.bf16.msra.mxu0 %v10550_v10  ;;  %4899 = vmatprep.subr.bf16.mxu1 %v10551_v36  ;;  %v10583_v10 = vld [vmem:[#allocation209_spill] sm:$0xff]  ;;  %v10584_v36 = vld [vmem:[#allocation210_spill] sm:$0xff] }
 0x6df   :  { %4981 = vmatprep.subr.bf16.mxu0 %v10552_v13  ;;  %v10585_v13 = vld [vmem:[#allocation211_spill] sm:$0xff] }
 0x6e0   :  { %4891 = vmatmul.mubr.bf16.vlgmr.msra.gmra.mrb[24].mxu1 %v9401_v42 }
 0x6e1   :  { %4973 = vmatmul.mubr.bf16.vlgmr.msra.gmra.mrb[40].mxu0 %v9401_v42  ;;  %4900 = vmatpush1.bf16.msra.mxu1 %v10553_v8  ;;  %v10586_v8 = vld [vmem:[#allocation212_spill] sm:$0xff] }
 0x6e2   :  { %4982 = vmatpush1.bf16.msra.mxu0 %v10554_v49  ;;  %4901 = vmatprep.subr.bf16.mxu1 %v10555_v34  ;;  %v10587_v49 = vld [vmem:[#allocation213_spill] sm:$0xff]  ;;  %v10588_v34 = vld [vmem:[#allocation214_spill] sm:$0xff] }
 0x6e3   :  { %4983 = vmatprep.subr.bf16.mxu0 %v10556_v3  ;;  %4931 = vmatprep.mubr.bf16.mxu1 %v10200_v45  ;;  %v10589_v3 = vld [vmem:[#allocation215_spill] sm:$0xff] }
 0x6e4   :  { %5013 = vmatprep.mubr.bf16.mxu0 %v10200_v45 }
 0x6e5   :  { %4902 = vmatpush1.bf16.msra.mxu1 %v10557_v20  ;;  %v10590_v20 = vld [vmem:[#allocation216_spill] sm:$0xff] }
 0x6e6   :  { %4984 = vmatpush1.bf16.msra.mxu0 %v10558_v32  ;;  %4903 = vmatprep.subr.bf16.mxu1 %v10559_v0  ;;  %v10591_v32 = vld [vmem:[#allocation217_spill] sm:$0xff]  ;;  %v10592_v0 = vld [vmem:[#allocation218_spill] sm:$0xff] }
 0x6e7   :  { %4985 = vmatprep.subr.bf16.mxu0 %v10560_v26  ;;  %v10593_v26 = vld [vmem:[#allocation219_spill] sm:$0xff] }
 0x6e9   :  { %4904 = vmatpush1.bf16.msra.mxu1 %v10561_v48  ;;  %v10594_v48 = vld [vmem:[#allocation220_spill] sm:$0xff] }
 0x6ea   :  { %4986 = vmatpush1.bf16.msra.mxu0 %v10562_v46  ;;  %4905 = vmatprep.subr.bf16.mxu1 %v10563_v62  ;;  %v10597_v46 = vld [vmem:[#allocation223_spill] sm:$0xff]  ;;  %v10598_v62 = vld [vmem:[#allocation224_spill] sm:$0xff] }
 0x6eb   :  { %4987 = vmatprep.subr.bf16.mxu0 %v10564_v41  ;;  %v10599_v41 = vld [vmem:[#allocation225_spill] sm:$0xff] }
 0x6ed   :  { %4906 = vmatpush1.bf16.msra.mxu1 %v10565_v7  ;;  %v10600_v7 = vld [vmem:[#allocation226_spill] sm:$0xff] }
 0x6ee   :  { %4988 = vmatpush1.bf16.msra.mxu0 %v10566_v9  ;;  %4907 = vmatprep.subr.bf16.mxu1 %v10567_v12  ;;  %v9571_v9 = vld [vmem:[#allocation11 + $0x20c] ss:$48 sps:$4 sm:$0xff]   ;;  %v9575_v12 = vld [vmem:[#allocation11 + $0x208] ss:$48 sps:$4 sm:$0xff]  }
 0x6ef   :  { %4989 = vmatprep.subr.bf16.mxu0 %v10568_v14  ;;  %v9587_v14 = vld [vmem:[#allocation11 + $0x2cc] ss:$48 sps:$4 sm:$0xff]  }
 0x6f1   :  { %4908 = vmatpush1.bf16.msra.mxu1 %v10569_v16  ;;  %v9639_v16 = vld [vmem:[#allocation11 + $0x508] ss:$48 sps:$4 sm:$0xff]  }
 0x6f2   :  { %4990 = vmatpush1.bf16.msra.mxu0 %v10570_v39  ;;  %4909 = vmatprep.subr.bf16.mxu1 %v10571_v30  ;;  %v9643_v39 = vld [vmem:[#allocation11 + $0x56c] ss:$48 sps:$4 sm:$0xff]   ;;  %v9647_v30 = vld [vmem:[#allocation11 + $0x568] ss:$48 sps:$4 sm:$0xff]  }
 0x6f3   :  { %4991 = vmatprep.subr.bf16.mxu0 %v10572_v59  ;;  %v9651_v59 = vld [vmem:[#allocation11 + $0x5cc] ss:$48 sps:$4 sm:$0xff]  }
 0x6f5   :  { %4910 = vmatpush1.bf16.msra.mxu1 %v10573_v40  ;;  %v10605_v40 = vld [vmem:[#allocation231_spill] sm:$0xff] }
 0x6f6   :  { %4992 = vmatpush1.bf16.msra.mxu0 %v10574_v53  ;;  %4911 = vmatprep.subr.bf16.mxu1 %v10575_v43  ;;  %v9655_v53 = vld [vmem:[#allocation11 + $0x5c8] ss:$48 sps:$4 sm:$0xff]  }
 0x6f7   :  { %4993 = vmatprep.subr.bf16.mxu0 %v10576_v37  ;;  %v10606_v43 = vld [vmem:[#allocation232_spill] sm:$0xff]  ;;  %v9659_v37 = vld [vmem:[#allocation11 + $0x62c] ss:$48 sps:$4 sm:$0xff]  }
 0x6f9   :  { %4912 = vmatpush1.bf16.msra.mxu1 %v10577_v17  ;;  %v10607_v17 = vld [vmem:[#allocation233_spill] sm:$0xff] }
 0x6fa   :  { %4994 = vmatpush1.bf16.msra.mxu0 %v10578_v33  ;;  %4913 = vmatprep.subr.bf16.mxu1 %v10579_v35  ;;  %v9665_v33 = vld [vmem:[#allocation11 + $0x628] ss:$48 sps:$4 sm:$0xff]  }
 0x6fb   :  { %4995 = vmatprep.subr.bf16.mxu0 %v10580_v55  ;;  %v10608_v35 = vld [vmem:[#allocation234_spill] sm:$0xff]  ;;  %v9669_v55 = vld [vmem:[#allocation11 + $0x68c] ss:$48 sps:$4 sm:$0xff]  }
 0x6fd   :  { %4914 = vmatpush1.bf16.msra.mxu1 %v10581_v56  ;;  %v10609_v56 = vld [vmem:[#allocation235_spill] sm:$0xff] }
 0x6fe   :  { %4996 = vmatpush1.bf16.msra.mxu0 %v10582_v24  ;;  %5022 = vmatprep.subr.bf16.mxu1 %v10583_v10  ;;  %v9675_v24 = vld [vmem:[#allocation11 + $0x688] ss:$48 sps:$4 sm:$0xff]   ;;  %v9679_v10 = vld [vmem:[#allocation11 + $0x6ec] ss:$48 sps:$4 sm:$0xff]  }
 0x6ff   :  { %5104 = vmatprep.subr.bf16.mxu0 %v10584_v36  ;;  %v10611_v36 = vld [vmem:[#allocation237_spill] sm:$0xff] }
 0x700   :  { %4932 = vmatmul.mubr.bf16.vlgmr.msra.gmra.mrb[24].mxu1 %v9440_v58 }
 0x701   :  { %5014 = vmatmul.mubr.bf16.vlgmr.msra.gmra.mrb[40].mxu0 %v9440_v58  ;;  %5023 = vmatpush1.bf16.msra.mxu1 %v10585_v13  ;;  %v9683_v13 = vld [vmem:[#allocation11 + $0x6e8] ss:$48 sps:$4 sm:$0xff]  }
 0x702   :  { %5054 = vmatprep.mubr.bf16.mxu1 %v9399_v60  ;;  %5105 = vmatpush1.bf16.msra.mxu0 %v9073_v38  ;;  %v10595_v38 = vld [vmem:[#allocation221_spill] sm:$0xff] }
 0x703   :  { %5136 = vmatprep.mubr.bf16.mxu0 %v9399_v60  ;;  %5024 = vmatprep.subr.bf16.mxu1 %v10586_v8  ;;  %v10596_v60 = vld [vmem:[#allocation222_spill] sm:$0xff]  ;;  %v10612_v8 = vld [vmem:[#allocation28_spill] sm:$0xff] }
 0x704   :  { %5106 = vmatprep.subr.bf16.mxu0 %v10587_v49  ;;  %v9687_v49 = vld [vmem:[#allocation11 + $0x74c] ss:$48 sps:$4 sm:$0xff]  }
 0x705   :  { %5025 = vmatpush1.bf16.msra.mxu1 %v10588_v34  ;;  %v10613_v34 = vld [vmem:[#allocation29_spill] sm:$0xff] }
 0x706   :  { %5107 = vmatpush1.bf16.msra.mxu0 %v10589_v3  ;;  %5026 = vmatprep.subr.bf16.mxu1 %v10590_v20  ;;  %v9691_v3 = vld [vmem:[#allocation11 + $0x748] ss:$48 sps:$4 sm:$0xff]  }
 0x707   :  { %5108 = vmatprep.subr.bf16.mxu0 %v10591_v32  ;;  %v10614_v20 = vld [vmem:[#allocation32_spill] sm:$0xff]  ;;  %v9695_v32 = vld [vmem:[#allocation11 + $0x7ac] ss:$48 sps:$4 sm:$0xff]  }
 0x709   :  { %5027 = vmatpush1.bf16.msra.mxu1 %v10592_v0  ;;  %v10615_v0 = vld [vmem:[#allocation33_spill] sm:$0xff] }
 0x70a   :  { %5109 = vmatpush1.bf16.msra.mxu0 %v10593_v26  ;;  %5028 = vmatprep.subr.bf16.mxu1 %v10594_v48  ;;  %v9699_v26 = vld [vmem:[#allocation11 + $0x7a8] ss:$48 sps:$4 sm:$0xff]   ;;  %v9702_v48 = vld [vmem:[#allocation11 + $0x804] ss:$48 sps:$4 sm:$0xff]  }
 0x70b   :  { %5110 = vmatprep.subr.bf16.mxu0 %v10595_v38  ;;  %10616 = vst [vmem:[#allocation44_spill] sm:$0xff] %v9702_v48  ;;  %v9705_v38 = vld [vmem:[#allocation11 + $0x80c] ss:$48 sps:$4 sm:$0xff]  }
 0x70c   :  { %10617 = vst [vmem:[#allocation23_spill] sm:$0xff] %v9705_v38 }
 0x70d   :  { %5029 = vmatpush1.bf16.msra.mxu1 %v10596_v60  ;;  %v9708_v60 = vld [vmem:[#allocation11 + $0x800] ss:$48 sps:$4 sm:$0xff]  }
 0x70e   :  { %5111 = vmatpush1.bf16.msra.mxu0 %v10597_v46  ;;  %5030 = vmatprep.subr.bf16.mxu1 %v9113_v18  ;;  %v9579_v18 = vld [vmem:[#allocation11 + $0x26c] ss:$48 sps:$4 sm:$0xff]   ;;  %10618 = vst [vmem:[#allocation45_spill] sm:$0xff] %v9708_v60  ;;  %v9711_v46 = vld [vmem:[#allocation11 + $0x808] ss:$48 sps:$4 sm:$0xff]  }
 0x70f   :  { %5112 = vmatprep.subr.bf16.mxu0 %v10598_v62  ;;  %10619 = vst [vmem:[#allocation24_spill] sm:$0xff] %v9711_v46  ;;  %v9714_v62 = vld [vmem:[#allocation11 + $0x864] ss:$48 sps:$4 sm:$0xff]  }
 0x710   :  { %10620 = vst [vmem:[#allocation48_spill] sm:$0xff] %v9714_v62 }
 0x711   :  { %5031 = vmatpush1.bf16.msra.mxu1 %v10599_v41  ;;  %v9717_v41 = vld [vmem:[#allocation11 + $0x86c] ss:$48 sps:$4 sm:$0xff]  }
 0x712   :  { %5113 = vmatpush1.bf16.msra.mxu0 %v9122_v47  ;;  %5032 = vmatprep.subr.bf16.mxu1 %v10600_v7  ;;  %v9583_v47 = vld [vmem:[#allocation11 + $0x268] ss:$48 sps:$4 sm:$0xff]   ;;  %10621 = vst [vmem:[#allocation25_spill] sm:$0xff] %v9717_v41  ;;  %v9720_v7 = vld [vmem:[#allocation11 + $0x860] ss:$48 sps:$4 sm:$0xff]  }
 0x713   :  { %5114 = vmatprep.subr.bf16.mxu0 %v9571_v9  ;;  %10622 = vst [vmem:[#allocation51_spill] sm:$0xff] %v9720_v7 }
 0x715   :  { %5033 = vmatpush1.bf16.msra.mxu1 %v9129_v57  ;;  %v9591_v57 = vld [vmem:[#allocation11 + $0x2c8] ss:$48 sps:$4 sm:$0xff]  }
 0x716   :  { %5115 = vmatpush1.bf16.msra.mxu0 %v9575_v12  ;;  %5034 = vmatprep.subr.bf16.mxu1 %v9133_v50  ;;  %v9595_v50 = vld [vmem:[#allocation11 + $0x32c] ss:$48 sps:$4 sm:$0xff]  }
 0x717   :  { %5116 = vmatprep.subr.bf16.mxu0 %v9579_v18 }
 0x719   :  { %5035 = vmatpush1.bf16.msra.mxu1 %v9137_v61  ;;  %v9599_v61 = vld [vmem:[#allocation11 + $0x328] ss:$48 sps:$4 sm:$0xff]  }
 0x71a   :  { %5117 = vmatpush1.bf16.msra.mxu0 %v9583_v47  ;;  %5036 = vmatprep.subr.bf16.mxu1 %v9141_v22  ;;  %v9603_v22 = vld [vmem:[#allocation11 + $0x38c] ss:$48 sps:$4 sm:$0xff]  }
 0x71b   :  { %5118 = vmatprep.subr.bf16.mxu0 %v9587_v14 }
 0x71d   :  { %5037 = vmatpush1.bf16.msra.mxu1 %v9145_v63  ;;  %v9607_v63 = vld [vmem:[#allocation11 + $0x388] ss:$48 sps:$4 sm:$0xff]  }
 0x71e   :  { %5119 = vmatpush1.bf16.msra.mxu0 %v9591_v57  ;;  %5038 = vmatprep.subr.bf16.mxu1 %v9149_v1  ;;  %v9611_v1 = vld [vmem:[#allocation11 + $0x3ec] ss:$48 sps:$4 sm:$0xff]  }
 0x71f   :  { %5120 = vmatprep.subr.bf16.mxu0 %v9595_v50 }
 0x721   :  { %5039 = vmatpush1.bf16.msra.mxu1 %v9153_v2  ;;  %v9615_v2 = vld [vmem:[#allocation11 + $0x3e8] ss:$48 sps:$4 sm:$0xff]  }
 0x722   :  { %5121 = vmatpush1.bf16.msra.mxu0 %v9599_v61  ;;  %5040 = vmatprep.subr.bf16.mxu1 %v9157_v4  ;;  %v9619_v4 = vld [vmem:[#allocation11 + $0x44c] ss:$48 sps:$4 sm:$0xff]  }
 0x723   :  { %5122 = vmatprep.subr.bf16.mxu0 %v9603_v22 }
 0x725   :  { %5041 = vmatpush1.bf16.msra.mxu1 %v9161_v11  ;;  %v9623_v11 = vld [vmem:[#allocation11 + $0x448] ss:$48 sps:$4 sm:$0xff]  }
 0x726   :  { %5123 = vmatpush1.bf16.msra.mxu0 %v9607_v63  ;;  %5042 = vmatprep.subr.bf16.mxu1 %v9165_v15  ;;  %v9627_v15 = vld [vmem:[#allocation11 + $0x4ac] ss:$48 sps:$4 sm:$0xff]  }
 0x727   :  { %5124 = vmatprep.subr.bf16.mxu0 %v9611_v1 }
 0x729   :  { %5043 = vmatpush1.bf16.msra.mxu1 %v9169_v19  ;;  %v9631_v19 = vld [vmem:[#allocation11 + $0x4a8] ss:$48 sps:$4 sm:$0xff]  }
 0x72a   :  { %5125 = vmatpush1.bf16.msra.mxu0 %v9615_v2  ;;  %5044 = vmatprep.subr.bf16.mxu1 %v9173_v23  ;;  %v9635_v23 = vld [vmem:[#allocation11 + $0x50c] ss:$48 sps:$4 sm:$0xff]  }
 0x72b   :  { %5126 = vmatprep.subr.bf16.mxu0 %v9619_v4 }
 0x72d   :  { %5045 = vmatpush1.bf16.msra.mxu1 %v9177_v25  ;;  %v10601_v25 = vld [vmem:[#allocation227_spill] sm:$0xff] }
 0x72e   :  { %5127 = vmatpush1.bf16.msra.mxu0 %v9623_v11  ;;  %5046 = vmatprep.subr.bf16.mxu1 %v9181_v27  ;;  %v10602_v27 = vld [vmem:[#allocation228_spill] sm:$0xff] }
 0x72f   :  { %5128 = vmatprep.subr.bf16.mxu0 %v9627_v15 }
 0x731   :  { %5047 = vmatpush1.bf16.msra.mxu1 %v9185_v29  ;;  %v10603_v29 = vld [vmem:[#allocation229_spill] sm:$0xff] }
 0x732   :  { %5129 = vmatpush1.bf16.msra.mxu0 %v9631_v19  ;;  %5048 = vmatprep.subr.bf16.mxu1 %v9189_v31  ;;  %v10604_v31 = vld [vmem:[#allocation230_spill] sm:$0xff] }
 0x733   :  { %5130 = vmatprep.subr.bf16.mxu0 %v9635_v23 }
 0x735   :  { %5049 = vmatpush1.bf16.msra.mxu1 %v10601_v25  ;;  %v9723_v25 = vld [vmem:[#allocation11 + $0x868] ss:$48 sps:$4 sm:$0xff]  }
 0x736   :  { %5131 = vmatpush1.bf16.msra.mxu0 %v9639_v16  ;;  %5050 = vmatprep.subr.bf16.mxu1 %v10602_v27  ;;  %10623 = vst [vmem:[#allocation26_spill] sm:$0xff] %v9723_v25  ;;  %v9726_v27 = vld [vmem:[#allocation11 + $0x8c4] ss:$48 sps:$4 sm:$0xff]  }
 0x737   :  { %5132 = vmatprep.subr.bf16.mxu0 %v9643_v39  ;;  %10624 = vst [vmem:[#allocation54_spill] sm:$0xff] %v9726_v27 }
 0x739   :  { %5051 = vmatpush1.bf16.msra.mxu1 %v10603_v29  ;;  %v9729_v29 = vld [vmem:[#allocation11 + $0x8cc] ss:$48 sps:$4 sm:$0xff]  }
 0x73a   :  { %5133 = vmatpush1.bf16.msra.mxu0 %v9647_v30  ;;  %5052 = vmatprep.subr.bf16.mxu1 %v10604_v31  ;;  %10625 = vst [vmem:[#allocation27_spill] sm:$0xff] %v9729_v29  ;;  %v9732_v31 = vld [vmem:[#allocation11 + $0x8c0] ss:$48 sps:$4 sm:$0xff]  }
 0x73b   :  { %5134 = vmatprep.subr.bf16.mxu0 %v9651_v59  ;;  %10626 = vst [vmem:[#allocation55_spill] sm:$0xff] %v9732_v31 }
 0x73d   :  { %5053 = vmatpush1.bf16.msra.mxu1 %v10605_v40  ;;  %v9735_v40 = vld [vmem:[#allocation11 + $0x8c8] ss:$48 sps:$4 sm:$0xff]  }
 0x73e   :  { %5135 = vmatpush1.bf16.msra.mxu0 %v9655_v53  ;;  %5063 = vmatprep.subr.bf16.mxu1 %v10606_v43  ;;  %10627 = vst [vmem:[#allocation30_spill] sm:$0xff] %v9735_v40  ;;  %v7467_v43 = vld [vmem:[#allocation11 + $0x4] ss:$48 sps:$4 sm:$0xff]  }
 0x73f   :  { %5145 = vmatprep.subr.bf16.mxu0 %v9659_v37 }
 0x740   :  { %5055 = vmatmul.mubr.bf16.vlgmr.msra.gmra.mrb[28].mxu1 %v9401_v42 }
 0x741   :  { %5137 = vmatmul.mubr.bf16.vlgmr.msra.gmra.mrb[44].mxu0 %v9401_v42  ;;  %5064 = vmatpush1.bf16.msra.mxu1 %v10607_v17  ;;  %v10610_v42 = vld [vmem:[#allocation236_spill] sm:$0xff]  ;;  %v7468_v17 = vld [vmem:[#allocation11 + $0xc] ss:$48 sps:$4 sm:$0xff]  }
 0x742   :  { %5146 = vmatpush1.bf16.msra.mxu0 %v9665_v33  ;;  %5065 = vmatprep.subr.bf16.mxu1 %v10608_v35  ;;  %v7469_v35 = vld [vmem:[#allocation11] ss:$48 sps:$4 sm:$0xff]  }
 0x743   :  { %5147 = vmatprep.subr.bf16.mxu0 %v9669_v55  ;;  %5095 = vmatprep.mubr.bf16.mxu1 %v10200_v45 }
 0x744   :  { %5177 = vmatprep.mubr.bf16.mxu0 %v10200_v45 }
 0x745   :  { %5066 = vmatpush1.bf16.msra.mxu1 %v10609_v56  ;;  %v7470_v56 = vld [vmem:[#allocation11 + $0x8] ss:$48 sps:$4 sm:$0xff]  }
 0x746   :  { %5148 = vmatpush1.bf16.msra.mxu0 %v9675_v24  ;;  %5067 = vmatprep.subr.bf16.mxu1 %v10610_v42  ;;  %v7471_v42 = vld [vmem:[#allocation11 + $0x64] ss:$48 sps:$4 sm:$0xff]  }
 0x747   :  { %5149 = vmatprep.subr.bf16.mxu0 %v9679_v10 }
 0x749   :  { %5068 = vmatpush1.bf16.msra.mxu1 %v10611_v36  ;;  %v7472_v36 = vld [vmem:[#allocation11 + $0x6c] ss:$48 sps:$4 sm:$0xff]  }
 0x74a   :  { %5150 = vmatpush1.bf16.msra.mxu0 %v9683_v13  ;;  %5069 = vmatprep.subr.bf16.mxu1 %v10612_v8  ;;  %v7473_v8 = vld [vmem:[#allocation11 + $0x60] ss:$48 sps:$4 sm:$0xff]  }
 0x74b   :  { %5151 = vmatprep.subr.bf16.mxu0 %v9687_v49 }
 0x74d   :  { %5070 = vmatpush1.bf16.msra.mxu1 %v10613_v34  ;;  %v7474_v34 = vld [vmem:[#allocation11 + $0x68] ss:$48 sps:$4 sm:$0xff]  }
 0x74e   :  { %5152 = vmatpush1.bf16.msra.mxu0 %v9691_v3  ;;  %5071 = vmatprep.subr.bf16.mxu1 %v10614_v20  ;;  %v7475_v20 = vld [vmem:[#allocation11 + $0xc4] ss:$48 sps:$4 sm:$0xff]  }
 0x74f   :  { %5153 = vmatprep.subr.bf16.mxu0 %v9695_v32 }
 0x751   :  { %5072 = vmatpush1.bf16.msra.mxu1 %v10615_v0  ;;  %v7476_v0 = vld [vmem:[#allocation11 + $0xcc] ss:$48 sps:$4 sm:$0xff]  }
 0x752   :  { %5154 = vmatpush1.bf16.msra.mxu0 %v9699_v26  ;;  %5073 = vmatprep.subr.bf16.mxu1 %v9702_v48 }
 0x753   :  { %5155 = vmatprep.subr.bf16.mxu0 %v9705_v38 }
 0x755   :  { %5074 = vmatpush1.bf16.msra.mxu1 %v9708_v60 }
 0x756   :  { %5156 = vmatpush1.bf16.msra.mxu0 %v9711_v46  ;;  %5075 = vmatprep.subr.bf16.mxu1 %v9714_v62 }
 0x757   :  { %5157 = vmatprep.subr.bf16.mxu0 %v9717_v41 }
 0x759   :  { %5076 = vmatpush1.bf16.msra.mxu1 %v9720_v7 }
 0x75a   :  { %5158 = vmatpush1.bf16.msra.mxu0 %v9723_v25  ;;  %5077 = vmatprep.subr.bf16.mxu1 %v9726_v27  ;;  %v7494_v27 = vld [vmem:[#allocation11 + $0x248] ss:$48 sps:$4 sm:$0xff]   ;;  %v7496_v25 = vld [vmem:[#allocation11 + $0x2ac] ss:$48 sps:$4 sm:$0xff]  }
 0x75b   :  { %5159 = vmatprep.subr.bf16.mxu0 %v9729_v29  ;;  %v7493_v29 = vld [vmem:[#allocation11 + $0x240] ss:$48 sps:$4 sm:$0xff]  }
 0x75d   :  { %5078 = vmatpush1.bf16.msra.mxu1 %v9732_v31  ;;  %v7490_v31 = vld [vmem:[#allocation11 + $0x1e8] ss:$48 sps:$4 sm:$0xff]  }
 0x75e   :  { %5160 = vmatpush1.bf16.msra.mxu0 %v9735_v40  ;;  %5255 = vmatprep.subr.bf16.mxu1 %v7467_v43  ;;  %v7477_v43 = vld [vmem:[#allocation11 + $0xc0] ss:$48 sps:$4 sm:$0xff]  }
 0x75f   :  { %5337 = vmatprep.subr.bf16.mxu0 %v7468_v17  ;;  %v7478_v17 = vld [vmem:[#allocation11 + $0xc8] ss:$48 sps:$4 sm:$0xff]   ;;  %v7489_v40 = vld [vmem:[#allocation11 + $0x1e0] ss:$48 sps:$4 sm:$0xff]  }
 0x760   :  { %5096 = vmatmul.mubr.bf16.vlgmr.msra.gmra.mrb[28].mxu1 %v9440_v58 }
 0x761   :  { %5178 = vmatmul.mubr.bf16.vlgmr.msra.gmra.mrb[44].mxu0 %v9440_v58  ;;  %5256 = vmatpush1.bf16.msra.mxu1 %v7469_v35  ;;  %v7479_v58 = vld [vmem:[#allocation11 + $0x124] ss:$48 sps:$4 sm:$0xff]   ;;  %v7480_v35 = vld [vmem:[#allocation11 + $0x12c] ss:$48 sps:$4 sm:$0xff]  }
 0x762   :  { %5338 = vmatpush1.bf16.msra.mxu0 %v7470_v56  ;;  %5257 = vmatprep.subr.bf16.mxu1 %v7471_v42  ;;  %v7481_v56 = vld [vmem:[#allocation11 + $0x120] ss:$48 sps:$4 sm:$0xff]   ;;  %v7482_v42 = vld [vmem:[#allocation11 + $0x128] ss:$48 sps:$4 sm:$0xff]  }
 0x763   :  { %5339 = vmatprep.subr.bf16.mxu0 %v7472_v36  ;;  %v7483_v36 = vld [vmem:[#allocation11 + $0x184] ss:$48 sps:$4 sm:$0xff]  }
 0x765   :  { %5258 = vmatpush1.bf16.msra.mxu1 %v7473_v8  ;;  %v7484_v8 = vld [vmem:[#allocation11 + $0x18c] ss:$48 sps:$4 sm:$0xff]  }
 0x766   :  { %5340 = vmatpush1.bf16.msra.mxu0 %v7474_v34  ;;  %5259 = vmatprep.subr.bf16.mxu1 %v7475_v20  ;;  %v7485_v34 = vld [vmem:[#allocation11 + $0x180] ss:$48 sps:$4 sm:$0xff]   ;;  %v7486_v20 = vld [vmem:[#allocation11 + $0x188] ss:$48 sps:$4 sm:$0xff]  }
 0x767   :  { %5341 = vmatprep.subr.bf16.mxu0 %v7476_v0  ;;  %v7487_v0 = vld [vmem:[#allocation11 + $0x1e4] ss:$48 sps:$4 sm:$0xff]  }
 0x769   :  { %5260 = vmatpush1.bf16.msra.mxu1 %v7477_v43 }
 0x76a   :  { %5342 = vmatpush1.bf16.msra.mxu0 %v7478_v17  ;;  %5261 = vmatprep.subr.bf16.mxu1 %v7479_v58  ;;  %v7488_v58 = vld [vmem:[#allocation11 + $0x1ec] ss:$48 sps:$4 sm:$0xff]  }
 0x76b   :  { %5343 = vmatprep.subr.bf16.mxu0 %v7480_v35 }
 0x76d   :  { %5262 = vmatpush1.bf16.msra.mxu1 %v7481_v56 }
 0x76e   :  { %5344 = vmatpush1.bf16.msra.mxu0 %v7482_v42  ;;  %5263 = vmatprep.subr.bf16.mxu1 %v7483_v36 }
 0x76f   :  { %5345 = vmatprep.subr.bf16.mxu0 %v7484_v8 }
 0x771   :  { %5264 = vmatpush1.bf16.msra.mxu1 %v7485_v34 }
 0x772   :  { %5346 = vmatpush1.bf16.msra.mxu0 %v7486_v20  ;;  %5265 = vmatprep.subr.bf16.mxu1 %v7487_v0  ;;  %v7491_v20 = vld [vmem:[#allocation11 + $0x244] ss:$48 sps:$4 sm:$0xff]   ;;  %v7492_v0 = vld [vmem:[#allocation11 + $0x24c] ss:$48 sps:$4 sm:$0xff]  }
 0x773   :  { %v9740_v43 = vpop.f32.mrb[20].mxu1  ;;  %v9742_v17 = vpop.f32.mrb[36].mxu0  ;;  %5347 = vmatprep.subr.bf16.mxu0 %v7488_v58  ;;  %v7495_v58 = vld [vmem:[#allocation11 + $0x2a4] ss:$48 sps:$4 sm:$0xff]  }
 0x774   :  { %v9744_v35 = vpop.f32.mrb[21].mxu1  ;;  %v9746_v56 = vpop.f32.mrb[37].mxu0 }
 0x775   :  { %v4773_v42 = vpop.f32.mrb[22].mxu1  ;;  %v4855_v36 = vpop.f32.mrb[38].mxu0  ;;  %5266 = vmatpush1.bf16.msra.mxu1 %v7489_v40  ;;  %v7499_v40 = vld [vmem:[#allocation11 + $0x304] ss:$48 sps:$4 sm:$0xff]  }
 0x776   :  { %v4774_v8 = vpop.f32.mrb[23].mxu1  ;;  %v4856_v34 = vpop.f32.mrb[39].mxu0  ;;  %5348 = vmatpush1.bf16.msra.mxu0 %v7490_v31  ;;  %5267 = vmatprep.subr.bf16.mxu1 %v7491_v20  ;;  %v7497_v42 = vld [vmem:[#allocation11 + $0x2a0] ss:$48 sps:$4 sm:$0xff]   ;;  %v7498_v36 = vld [vmem:[#allocation11 + $0x2a8] ss:$48 sps:$4 sm:$0xff]  }
 0x777   :  { %5349 = vmatprep.subr.bf16.mxu0 %v7492_v0  ;;  %v7500_v8 = vld [vmem:[#allocation11 + $0x30c] ss:$48 sps:$4 sm:$0xff]   ;;  %v7501_v31 = vld [vmem:[#allocation11 + $0x300] ss:$48 sps:$4 sm:$0xff]   ;;  %v7502_v34 = vld [vmem:[#allocation11 + $0x308] ss:$48 sps:$4 sm:$0xff]  }
 0x778   :  { %v7503_v20 = vld [vmem:[#allocation11 + $0x364] ss:$48 sps:$4 sm:$0xff]   ;;  %v7506_v0 = vld [vmem:[#allocation11 + $0x368] ss:$48 sps:$4 sm:$0xff]  }
 0x779   :  { %5268 = vmatpush1.bf16.msra.mxu1 %v7493_v29  ;;  %v7504_v29 = vld [vmem:[#allocation11 + $0x36c] ss:$48 sps:$4 sm:$0xff]  }
 0x77a   :  { %5350 = vmatpush1.bf16.msra.mxu0 %v7494_v27  ;;  %5269 = vmatprep.subr.bf16.mxu1 %v7495_v58  ;;  %v7505_v27 = vld [vmem:[#allocation11 + $0x360] ss:$48 sps:$4 sm:$0xff]   ;;  %v7508_v58 = vld [vmem:[#allocation11 + $0x3cc] ss:$48 sps:$4 sm:$0xff]  }
 0x77b   :  { %5351 = vmatprep.subr.bf16.mxu0 %v7496_v25  ;;  %v7507_v25 = vld [vmem:[#allocation11 + $0x3c4] ss:$48 sps:$4 sm:$0xff]  }
 0x77d   :  { %5270 = vmatpush1.bf16.msra.mxu1 %v7497_v42  ;;  %v7509_v42 = vld [vmem:[#allocation11 + $0x3c0] ss:$48 sps:$4 sm:$0xff]  }
 0x77e   :  { %5352 = vmatpush1.bf16.msra.mxu0 %v7498_v36  ;;  %5271 = vmatprep.subr.bf16.mxu1 %v7499_v40  ;;  %v7510_v36 = vld [vmem:[#allocation11 + $0x3c8] ss:$48 sps:$4 sm:$0xff]   ;;  %v7511_v40 = vld [vmem:[#allocation11 + $0x424] ss:$48 sps:$4 sm:$0xff]  }
 0x77f   :  { %5353 = vmatprep.subr.bf16.mxu0 %v7500_v8  ;;  %v7512_v8 = vld [vmem:[#allocation11 + $0x42c] ss:$48 sps:$4 sm:$0xff]  }
 0x781   :  { %5272 = vmatpush1.bf16.msra.mxu1 %v7501_v31  ;;  %v7513_v31 = vld [vmem:[#allocation11 + $0x420] ss:$48 sps:$4 sm:$0xff]  }
 0x782   :  { %5354 = vmatpush1.bf16.msra.mxu0 %v7502_v34  ;;  %5273 = vmatprep.subr.bf16.mxu1 %v7503_v20  ;;  %v7514_v34 = vld [vmem:[#allocation11 + $0x428] ss:$48 sps:$4 sm:$0xff]   ;;  %v7515_v20 = vld [vmem:[#allocation11 + $0x484] ss:$48 sps:$4 sm:$0xff]  }
 0x783   :  { %5355 = vmatprep.subr.bf16.mxu0 %v7504_v29  ;;  %v10628_v29 = vld [vmem:[#allocation36_spill] sm:$0xff] }
 0x785   :  { %5274 = vmatpush1.bf16.msra.mxu1 %v7505_v27  ;;  %v7516_v27 = vld [vmem:[#allocation11 + $0x480] ss:$48 sps:$4 sm:$0xff]  }
 0x786   :  { %5356 = vmatpush1.bf16.msra.mxu0 %v7506_v0  ;;  %5275 = vmatprep.subr.bf16.mxu1 %v7507_v25  ;;  %v10629_v0 = vld [vmem:[#allocation19_spill] sm:$0xff]  ;;  %v7517_v25 = vld [vmem:[#allocation11 + $0x4e4] ss:$48 sps:$4 sm:$0xff]  }
 0x787   :  { %5357 = vmatprep.subr.bf16.mxu0 %v7508_v58  ;;  %v10630_v58 = vld [vmem:[#allocation37_spill] sm:$0xff] }
 0x789   :  { %5276 = vmatpush1.bf16.msra.mxu1 %v7509_v42  ;;  %v7518_v42 = vld [vmem:[#allocation11 + $0x4e0] ss:$48 sps:$4 sm:$0xff]  }
 0x78a   :  { %5358 = vmatpush1.bf16.msra.mxu0 %v7510_v36  ;;  %5277 = vmatprep.subr.bf16.mxu1 %v7511_v40  ;;  %v10631_v36 = vld [vmem:[#allocation20_spill] sm:$0xff] }
 0x78b   :  { %5359 = vmatprep.subr.bf16.mxu0 %v7512_v8  ;;  %v7519_v40 = vld [vmem:[#allocation11 + $0x544] ss:$48 sps:$4 sm:$0xff]  }
 0x78c   :  { %v10632_v8 = vld [vmem:[#allocation40_spill] sm:$0xff] }
 0x78d   :  { %5278 = vmatpush1.bf16.msra.mxu1 %v7513_v31  ;;  %v7520_v31 = vld [vmem:[#allocation11 + $0x540] ss:$48 sps:$4 sm:$0xff]  }
 0x78e   :  { %5360 = vmatpush1.bf16.msra.mxu0 %v7514_v34  ;;  %5279 = vmatprep.subr.bf16.mxu1 %v7515_v20  ;;  %v10633_v34 = vld [vmem:[#allocation21_spill] sm:$0xff]  ;;  %v7521_v20 = vld [vmem:[#allocation11 + $0x5a4] ss:$48 sps:$4 sm:$0xff]  }
 0x78f   :  { %5361 = vmatprep.subr.bf16.mxu0 %v10628_v29  ;;  %v10634_v29 = vld [vmem:[#allocation41_spill] sm:$0xff] }
 0x791   :  { %5280 = vmatpush1.bf16.msra.mxu1 %v7516_v27  ;;  %v7522_v27 = vld [vmem:[#allocation11 + $0x5a0] ss:$48 sps:$4 sm:$0xff]  }
 0x792   :  { %5362 = vmatpush1.bf16.msra.mxu0 %v10629_v0  ;;  %5281 = vmatprep.subr.bf16.mxu1 %v7517_v25  ;;  %v10635_v0 = vld [vmem:[#allocation22_spill] sm:$0xff] }
 0x793   :  { %5363 = vmatprep.subr.bf16.mxu0 %v10630_v58  ;;  %v7523_v25 = vld [vmem:[#allocation11 + $0x604] ss:$48 sps:$4 sm:$0xff]   ;;  %v7524_v58 = vld [vmem:[#allocation11 + $0x60c] ss:$48 sps:$4 sm:$0xff]  }
 0x795   :  { %5282 = vmatpush1.bf16.msra.mxu1 %v7518_v42  ;;  %v342_v42 = vld [vmem:[#allocation10 + $0x18] sm:$0xff] }
 0x796   :  { %5364 = vmatpush1.bf16.msra.mxu0 %v10631_v36  ;;  %5283 = vmatprep.subr.bf16.mxu1 %v7519_v40  ;;  %v10636_v36 = vld [vmem:[#allocation66_spill] sm:$0xff]  ;;  %v478_v62 = vrot.slane %v342_v42, %v8637_v6 }
 0x797   :  { %5365 = vmatprep.subr.bf16.mxu0 %v10632_v8  ;;  %v462_v40 = vrot.slane %v342_v42, %v10636_v36  ;;  %v10637_v8 = vld [vmem:[#allocation18_spill] sm:$0xff] }
 0x798   :  { %v450_v7 = vrot.slane %v342_v42, %v10637_v8 }
 0x799   :  { %5284 = vmatpush1.bf16.msra.mxu1 %v7520_v31  ;;  %v6373_v31 = vadd.f32 %v9746_v56, %v462_v40 }
 0x79a   :  { %5366 = vmatpush1.bf16.msra.mxu0 %v10633_v34  ;;  %5285 = vmatprep.subr.bf16.mxu1 %v7521_v20  ;;  %v454_v34 = vrot.slane %v342_v42, %v8081_v44  ;;  %v6370_v20 = vadd.f32 %v9740_v43, %v450_v7 }
 0x79b   :  { %5367 = vmatprep.subr.bf16.mxu0 %v10634_v29  ;;  %v5210_v29 = vmul.f32 0.5, %v6373_v31 }
 0x79c   :  { %v5198_v41 = vmul.f32 0.5, %v6370_v20 }
 0x79d   :  { %5286 = vmatpush1.bf16.msra.mxu1 %v7522_v27  ;;  %v6371_v27 = vadd.f32 %v9744_v35, %v454_v34  ;;  %7117 = vtanh.f32 %v5210_v29 }
 0x79e   :  { %5368 = vmatpush1.bf16.msra.mxu0 %v10635_v0  ;;  %5296 = vmatprep.subr.bf16.mxu1 %v7523_v25  ;;  %7119 = vtanh.f32 %v5198_v41  ;;  %v466_v25 = vrot.slane %v342_v42, %v10466_v51 }
 0x79f   :  { %5378 = vmatprep.subr.bf16.mxu0 %v7524_v58  ;;  %v5199_v0 = vmul.f32 0.5, %v6371_v27  ;;  %v474_v58 = vrot.slane %v342_v42, %v8634_v5 }
 0x7a1   :  { %7121 = vtanh.f32 %v5199_v0 }
 0x7a7   :  { %v7118_v29 = vpop.eup %7117 }
 0x7a8   :  { %v7120_v27 = vpop.eup %7119  ;;  %v5216_v5 = vadd.f32 1.0, %v7118_v29  ;;  %v10638_v29 = vld [vmem:[#allocation63_spill] sm:$0xff] }
 0x7a9   :  { %v5204_v51 = vadd.f32 1.0, %v7120_v27 }
 0x7aa   :  { %v5219_v6 = vmul.f32 0.5, %v5216_v5  ;;  %v470_v5 = vrot.slane %v342_v42, %v10467_v21 }
 0x7ab   :  { %v7122_v0 = vpop.eup %7121 }
 0x7d3   :  { %v4933_v46 = vpop.f32.mrb[24].mxu1 }
 0x7d4   :  { %v6374_v56 = vadd.f32 %v4933_v46, %v466_v25  ;;  %v5015_v40 = vpop.f32.mrb[40].mxu0  ;;  %v4935_v60 = vpop.f32.mrb[25].mxu1  ;;  %v5205_v46 = vadd.f32 1.0, %v7122_v0  ;;  %v5207_v25 = vmul.f32 0.5, %v5204_v51  ;;  %v458_v51 = vrot.slane %v342_v42, %v10638_v29 }
 0x7d5   :  { %v6376_v38 = vadd.f32 %v5015_v40, %v474_v58  ;;  %v5017_v7 = vpop.f32.mrb[41].mxu0  ;;  %v4937_v43 = vpop.f32.mrb[26].mxu1  ;;  %v5237_v40 = vmul.f32 %v5219_v6, %v9376_v28 }
 0x7d6   :  { %v5211_v31 = vmul.f32 0.5, %v6374_v56  ;;  %v6377_v35 = vadd.f32 %v5017_v7, %v478_v62  ;;  %v5019_v34 = vpop.f32.mrb[42].mxu0  ;;  %v4938_v20 = vpop.f32.mrb[27].mxu1  ;;  %v5208_v62 = vmul.f32 0.5, %v5205_v46  ;;  %v6372_v27 = vadd.f32 %v9742_v17, %v458_v51 }
 0x7d7   :  { %7123 = vtanh.f32 %v6376_v38  ;;  %v5020_v41 = vpop.f32.mrb[43].mxu0 }
 0x7d8   :  { %7125 = vtanh.f32 %v5211_v31  ;;  %v6375_v41 = vadd.f32 %v4935_v60, %v470_v5  ;;  %v5200_v28 = vmul.f32 0.5, %v6372_v27 }
 0x7d9   :  { %7127 = vtanh.f32 %v6377_v35 }
 0x7da   :  { %v5212_v6 = vmul.f32 0.5, %v6375_v41 }
 0x7dc   :  { %7129 = vtanh.f32 %v5212_v6 }
 0x7dd   :  { %7131 = vtanh.f32 %v5200_v28 }
 0x7e1   :  { %v7124_v48 = vpop.eup %7123 }
 0x7e2   :  { %v7126_v58 = vpop.eup %7125  ;;  %v5240_v56 = vmul.f32 %v7124_v48, %v5207_v25  ;;  %v9774_v48 = vld [vmem:[#allocation10 + $0x20] sm:$0xff] }
 0x7e3   :  { %v5217_v7 = vadd.f32 1.0, %v7126_v58  ;;  %v7128_v43 = vpop.eup %7127  ;;  %v482_v0 = vrot.slane %v9774_v48, %v10637_v8  ;;  %v486_v46 = vrot.slane %v9774_v48, %v8081_v44 }
 0x7e4   :  { %v9766_v34 = vadd.f32 %v5240_v56, %v5237_v40  ;;  %v5241_v31 = vmul.f32 %v7128_v43, %v5208_v62 }
 0x7e5   :  { %v5220_v38 = vmul.f32 0.5, %v5217_v7 }
 0x7e6   :  { %v7130_v7 = vpop.eup %7129 }
 0x7e7   :  { %v5238_v20 = vmul.f32 %v5220_v38, %v9379_v52  ;;  %v490_v52 = vrot.slane %v9774_v48, %v10638_v29  ;;  %v7132_v51 = vpop.eup %7131  ;;  %v5218_v41 = vadd.f32 1.0, %v7130_v7 }
 0x7e8   :  { %v5206_v27 = vadd.f32 1.0, %v7132_v51 }
 0x7e9   :  { %v9769_v35 = vadd.f32 %v5241_v31, %v5238_v20  ;;  %v5221_v6 = vmul.f32 0.5, %v5218_v41  ;;  %v7525_v41 = vld [vmem:[#allocation11 + $0x600] ss:$48 sps:$4 sm:$0xff]  }
 0x7ea   :  { %v5209_v28 = vmul.f32 0.5, %v5206_v27  ;;  %v7526_v27 = vld [vmem:[#allocation11 + $0x608] ss:$48 sps:$4 sm:$0xff]  }
 0x833   :  { %v5097_v25 = vpop.f32.mrb[28].mxu1 }
 0x834   :  { %v6378_v42 = vadd.f32 %v5097_v25, %v482_v0  ;;  %v5179_v60 = vpop.f32.mrb[44].mxu0  ;;  %v5099_v58 = vpop.f32.mrb[29].mxu1 }
 0x835   :  { %v6380_v17 = vadd.f32 %v5179_v60, %v490_v52  ;;  %v6379_v40 = vadd.f32 %v5099_v58, %v486_v46  ;;  %v5181_v56 = vpop.f32.mrb[45].mxu0  ;;  %v5101_v62 = vpop.f32.mrb[30].mxu1  ;;  %v5239_v52 = vmul.f32 %v5221_v6, %v9395_v54  ;;  %v7527_v6 = vld [vmem:[#allocation11 + $0x664] ss:$48 sps:$4 sm:$0xff]  }
 0x836   :  { %7133 = vtanh.f32 %v6378_v42  ;;  %v5183_v43 = vpop.f32.mrb[46].mxu0  ;;  %v5102_v38 = vpop.f32.mrb[31].mxu1 }
 0x837   :  { %v5226_v31 = vmul.f32 0.5, %v6380_v17  ;;  %v5225_v20 = vmul.f32 0.5, %v6379_v40  ;;  %v5184_v5 = vpop.f32.mrb[47].mxu0 }
 0x839   :  { %7135 = vtanh.f32 %v5226_v31  ;;  %v494_v31 = vrot.slane %v9774_v48, %v10636_v36 }
 0x83a   :  { %7137 = vtanh.f32 %v5225_v20 }
 0x83b   :  { %7139 = vtanh.f32 %v9769_v35  ;;  %v6381_v54 = vadd.f32 %v5181_v56, %v494_v31  ;;  %v7529_v56 = vld [vmem:[#allocation11 + $0x660] ss:$48 sps:$4 sm:$0xff]  }
 0x83c   :  { %7141 = vtanh.f32 %v9766_v34 }
 0x840   :  { %v7134_v0 = vpop.eup %7133 }
 0x841   :  { %v5242_v46 = vmul.f32 %v7134_v0, %v5209_v28  ;;  %v7528_v28 = vld [vmem:[#allocation11 + $0x66c] ss:$48 sps:$4 sm:$0xff]   ;;  %v5227_v0 = vmul.f32 0.5, %v6381_v54  ;;  %v7542_v54 = vld [vmem:[#allocation11 + $0x788] ss:$48 sps:$4 sm:$0xff]  }
 0x843   :  { %v7136_v25 = vpop.eup %7135  ;;  %v9785_v42 = vadd.f32 %v5242_v46, %v5239_v52  ;;  %v7530_v52 = vld [vmem:[#allocation11 + $0x668] ss:$48 sps:$4 sm:$0xff]   ;;  %v7531_v46 = vld [vmem:[#allocation11 + $0x6c4] ss:$48 sps:$4 sm:$0xff]   ;;  %7143 = vtanh.f32 %v5227_v0 }
 0x844   :  { %v7138_v60 = vpop.eup %7137  ;;  %v5232_v58 = vadd.f32 1.0, %v7136_v25  ;;  %v7532_v25 = vld [vmem:[#allocation11 + $0x6cc] ss:$48 sps:$4 sm:$0xff]   ;;  %v7546_v0 = vld [vmem:[#allocation11 + $0x7e8] ss:$48 sps:$4 sm:$0xff]  }
 0x845   :  { %v5231_v17 = vadd.f32 1.0, %v7138_v60  ;;  %v7140_v62 = vpop.eup %7139  ;;  %v7533_v60 = vld [vmem:[#allocation11 + $0x6c0] ss:$48 sps:$4 sm:$0xff]   ;;  %7145 = vtanh.f32 %v9785_v42 }
 0x846   :  { %v5235_v40 = vmul.f32 0.5, %v5232_v58  ;;  %v7142_v43 = vpop.eup %7141  ;;  %v7534_v58 = vld [vmem:[#allocation11 + $0x6c8] ss:$48 sps:$4 sm:$0xff]  }
 0x847   :  { %v5234_v7 = vmul.f32 0.5, %v5231_v17  ;;  %v7535_v17 = vld [vmem:[#allocation11 + $0x724] ss:$48 sps:$4 sm:$0xff]  }
 0x848   :  { %v5250_v38 = vmul.f32 %v7140_v62, %v5235_v40  ;;  %v7536_v40 = vld [vmem:[#allocation11 + $0x72c] ss:$48 sps:$4 sm:$0xff]   ;;  %v7537_v62 = vld [vmem:[#allocation11 + $0x720] ss:$48 sps:$4 sm:$0xff]  }
 0x849   :  { %v5249_v20 = vmul.f32 %v7142_v43, %v5234_v7  ;;  %v7538_v7 = vld [vmem:[#allocation11 + $0x728] ss:$48 sps:$4 sm:$0xff]   ;;  %v7539_v43 = vld [vmem:[#allocation11 + $0x784] ss:$48 sps:$4 sm:$0xff]  }
 0x84a   :  { %v9789_v5 = vpack.c.bf16 %v5250_v38, %v5250_v38  ;;  %v7540_v38 = vld [vmem:[#allocation11 + $0x78c] ss:$48 sps:$4 sm:$0xff]  }
 0x84b   :  { %v9791_v51 = vpack.c.bf16 %v5249_v20, %v5249_v20  ;;  %v7541_v20 = vld [vmem:[#allocation11 + $0x780] ss:$48 sps:$4 sm:$0xff]  }
 0x84c   :  { %5287 = vmatprep.mubr.bf16.mxu1 %v9789_v5  ;;  %5369 = vmatprep.mubr.bf16.mxu0 %v9789_v5 }
 0x84d   :  { %5288 = vmatmul.mubr.bf16.vlgmr.msra.gmra.mrb[32].mxu1 %v9791_v51  ;;  %5370 = vmatmul.mubr.bf16.vlgmr.msra.gmra.mrb[48].mxu0 %v9791_v51  ;;  %v7144_v31 = vpop.eup %7143 }
 0x84e   :  { %5297 = vmatpush1.bf16.msra.mxu1 %v7525_v41  ;;  %5379 = vmatpush1.bf16.msra.mxu0 %v7526_v27  ;;  %v7543_v41 = vld [vmem:[#allocation11 + $0x7e4] ss:$48 sps:$4 sm:$0xff]   ;;  %v7544_v27 = vld [vmem:[#allocation11 + $0x7ec] ss:$48 sps:$4 sm:$0xff]  }
 0x84f   :  { %5298 = vmatprep.subr.bf16.mxu1 %v7527_v6  ;;  %5380 = vmatprep.subr.bf16.mxu0 %v7528_v28  ;;  %v5233_v6 = vadd.f32 1.0, %v7144_v31  ;;  %v7545_v28 = vld [vmem:[#allocation11 + $0x7e0] ss:$48 sps:$4 sm:$0xff]   ;;  %v7555_v31 = vld [vmem:[#allocation11 + $0x14] ss:$48 sps:$4 sm:$0xff]  }
 0x850   :  { %5328 = vmatprep.mubr.bf16.mxu1 %v10200_v45  ;;  %5410 = vmatprep.mubr.bf16.mxu0 %v10200_v45 }
 0x852   :  { %5299 = vmatpush1.bf16.msra.mxu1 %v7529_v56  ;;  %5381 = vmatpush1.bf16.msra.mxu0 %v7530_v52  ;;  %v7547_v56 = vld [vmem:[#allocation11 + $0x844] ss:$48 sps:$4 sm:$0xff]   ;;  %v7548_v52 = vld [vmem:[#allocation11 + $0x84c] ss:$48 sps:$4 sm:$0xff]  }
 0x853   :  { %5300 = vmatprep.subr.bf16.mxu1 %v7531_v46  ;;  %5382 = vmatprep.subr.bf16.mxu0 %v7532_v25  ;;  %v7146_v46 = vpop.eup %7145  ;;  %v5236_v25 = vmul.f32 0.5, %v5233_v6  ;;  %v7560_v6 = vld [vmem:[#allocation11 + $0x7c] ss:$48 sps:$4 sm:$0xff]  }
 0x856   :  { %5301 = vmatpush1.bf16.msra.mxu1 %v7533_v60  ;;  %5383 = vmatpush1.bf16.msra.mxu0 %v7534_v58  ;;  %v7549_v60 = vld [vmem:[#allocation11 + $0x840] ss:$48 sps:$4 sm:$0xff]   ;;  %v7550_v58 = vld [vmem:[#allocation11 + $0x848] ss:$48 sps:$4 sm:$0xff]  }
 0x857   :  { %5302 = vmatprep.subr.bf16.mxu1 %v7535_v17  ;;  %5384 = vmatprep.subr.bf16.mxu0 %v7536_v40  ;;  %v5251_v17 = vmul.f32 %v7146_v46, %v5236_v25  ;;  %v7551_v40 = vld [vmem:[#allocation11 + $0x8a4] ss:$48 sps:$4 sm:$0xff]   ;;  %v7565_v46 = vld [vmem:[#allocation11 + $0xd0] ss:$48 sps:$4 sm:$0xff]   ;;  %v7566_v25 = vld [vmem:[#allocation11 + $0xd8] ss:$48 sps:$4 sm:$0xff]  }
 0x85a   :  { %5303 = vmatpush1.bf16.msra.mxu1 %v7537_v62  ;;  %5385 = vmatpush1.bf16.msra.mxu0 %v7538_v7  ;;  %v7552_v62 = vld [vmem:[#allocation11 + $0x8ac] ss:$48 sps:$4 sm:$0xff]   ;;  %v7553_v7 = vld [vmem:[#allocation11 + $0x8a0] ss:$48 sps:$4 sm:$0xff]  }
 0x85b   :  { %5304 = vmatprep.subr.bf16.mxu1 %v7539_v43  ;;  %5386 = vmatprep.subr.bf16.mxu0 %v7540_v38  ;;  %v7554_v43 = vld [vmem:[#allocation11 + $0x8a8] ss:$48 sps:$4 sm:$0xff]   ;;  %v9800_v38 = vpack.c.bf16 %v5251_v17, %v5251_v17  ;;  %v7569_v17 = vld [vmem:[#allocation11 + $0x130] ss:$48 sps:$4 sm:$0xff]  }
 0x85e   :  { %5305 = vmatpush1.bf16.msra.mxu1 %v7541_v20  ;;  %5387 = vmatpush1.bf16.msra.mxu0 %v7542_v54  ;;  %v7556_v20 = vld [vmem:[#allocation11 + $0x1c] ss:$48 sps:$4 sm:$0xff]   ;;  %v7557_v54 = vld [vmem:[#allocation11 + $0x10] ss:$48 sps:$4 sm:$0xff]  }
 0x85f   :  { %5306 = vmatprep.subr.bf16.mxu1 %v7543_v41  ;;  %5388 = vmatprep.subr.bf16.mxu0 %v7544_v27  ;;  %v7558_v41 = vld [vmem:[#allocation11 + $0x18] ss:$48 sps:$4 sm:$0xff]   ;;  %v7559_v27 = vld [vmem:[#allocation11 + $0x74] ss:$48 sps:$4 sm:$0xff]  }
 0x862   :  { %5307 = vmatpush1.bf16.msra.mxu1 %v7545_v28  ;;  %5389 = vmatpush1.bf16.msra.mxu0 %v7546_v0  ;;  %v7561_v28 = vld [vmem:[#allocation11 + $0x70] ss:$48 sps:$4 sm:$0xff]   ;;  %v7562_v0 = vld [vmem:[#allocation11 + $0x78] ss:$48 sps:$4 sm:$0xff]  }
 0x863   :  { %5308 = vmatprep.subr.bf16.mxu1 %v7547_v56  ;;  %5390 = vmatprep.subr.bf16.mxu0 %v7548_v52  ;;  %v7563_v56 = vld [vmem:[#allocation11 + $0xd4] ss:$48 sps:$4 sm:$0xff]   ;;  %v7564_v52 = vld [vmem:[#allocation11 + $0xdc] ss:$48 sps:$4 sm:$0xff]  }
 0x866   :  { %5309 = vmatpush1.bf16.msra.mxu1 %v7549_v60  ;;  %5391 = vmatpush1.bf16.msra.mxu0 %v7550_v58  ;;  %v7567_v60 = vld [vmem:[#allocation11 + $0x134] ss:$48 sps:$4 sm:$0xff]   ;;  %v7568_v58 = vld [vmem:[#allocation11 + $0x13c] ss:$48 sps:$4 sm:$0xff]  }
 0x867   :  { %5310 = vmatprep.subr.bf16.mxu1 %v7551_v40  ;;  %5392 = vmatprep.subr.bf16.mxu0 %v7552_v62  ;;  %v7570_v40 = vld [vmem:[#allocation11 + $0x138] ss:$48 sps:$4 sm:$0xff]   ;;  %v7571_v62 = vld [vmem:[#allocation11 + $0x194] ss:$48 sps:$4 sm:$0xff]  }
 0x86a   :  { %5311 = vmatpush1.bf16.msra.mxu1 %v7553_v7  ;;  %5393 = vmatpush1.bf16.msra.mxu0 %v7554_v43  ;;  %v7572_v7 = vld [vmem:[#allocation11 + $0x19c] ss:$48 sps:$4 sm:$0xff]   ;;  %v7573_v43 = vld [vmem:[#allocation11 + $0x190] ss:$48 sps:$4 sm:$0xff]  }
 0x86b   :  { %5419 = vmatprep.subr.bf16.mxu1 %v7555_v31  ;;  %5501 = vmatprep.subr.bf16.mxu0 %v7556_v20  ;;  %v7574_v31 = vld [vmem:[#allocation11 + $0x198] ss:$48 sps:$4 sm:$0xff]   ;;  %v7575_v20 = vld [vmem:[#allocation11 + $0x1f4] ss:$48 sps:$4 sm:$0xff]  }
 0x86d   :  { %5329 = vmatmul.mubr.bf16.vlgmr.msra.gmra.mrb[32].mxu1 %v9800_v38  ;;  %5411 = vmatmul.mubr.bf16.vlgmr.msra.gmra.mrb[48].mxu0 %v9800_v38 }
 0x86e   :  { %5420 = vmatpush1.bf16.msra.mxu1 %v7557_v54  ;;  %5451 = vmatprep.mubr.bf16.mxu1 %v9789_v5  ;;  %v7576_v54 = vld [vmem:[#allocation11 + $0x1fc] ss:$48 sps:$4 sm:$0xff]  }
 0x86f   :  { %5502 = vmatpush1.bf16.msra.mxu0 %v7558_v41  ;;  %5533 = vmatprep.mubr.bf16.mxu0 %v9789_v5  ;;  %v7577_v41 = vld [vmem:[#allocation11 + $0x1f0] ss:$48 sps:$4 sm:$0xff]  }
 0x870   :  { %5421 = vmatprep.subr.bf16.mxu1 %v7559_v27  ;;  %5503 = vmatprep.subr.bf16.mxu0 %v7560_v6  ;;  %v7578_v27 = vld [vmem:[#allocation11 + $0x1f8] ss:$48 sps:$4 sm:$0xff]   ;;  %v7579_v6 = vld [vmem:[#allocation11 + $0x254] ss:$48 sps:$4 sm:$0xff]  }
 0x872   :  { %5422 = vmatpush1.bf16.msra.mxu1 %v7561_v28  ;;  %v7580_v28 = vld [vmem:[#allocation11 + $0x25c] ss:$48 sps:$4 sm:$0xff]  }
 0x873   :  { %5504 = vmatpush1.bf16.msra.mxu0 %v7562_v0  ;;  %5423 = vmatprep.subr.bf16.mxu1 %v7563_v56  ;;  %v7581_v0 = vld [vmem:[#allocation11 + $0x250] ss:$48 sps:$4 sm:$0xff]   ;;  %v7582_v56 = vld [vmem:[#allocation11 + $0x258] ss:$48 sps:$4 sm:$0xff]  }
 0x874   :  { %5505 = vmatprep.subr.bf16.mxu0 %v7564_v52  ;;  %v7583_v52 = vld [vmem:[#allocation11 + $0x2b4] ss:$48 sps:$4 sm:$0xff]  }
 0x876   :  { %5424 = vmatpush1.bf16.msra.mxu1 %v7565_v46  ;;  %v7584_v46 = vld [vmem:[#allocation11 + $0x2bc] ss:$48 sps:$4 sm:$0xff]  }
 0x877   :  { %5506 = vmatpush1.bf16.msra.mxu0 %v7566_v25  ;;  %5425 = vmatprep.subr.bf16.mxu1 %v7567_v60  ;;  %v7585_v25 = vld [vmem:[#allocation11 + $0x2b0] ss:$48 sps:$4 sm:$0xff]   ;;  %v7586_v60 = vld [vmem:[#allocation11 + $0x2b8] ss:$48 sps:$4 sm:$0xff]  }
 0x878   :  { %5507 = vmatprep.subr.bf16.mxu0 %v7568_v58  ;;  %v7587_v58 = vld [vmem:[#allocation11 + $0x314] ss:$48 sps:$4 sm:$0xff]  }
 0x87a   :  { %5426 = vmatpush1.bf16.msra.mxu1 %v7569_v17  ;;  %v7588_v17 = vld [vmem:[#allocation11 + $0x31c] ss:$48 sps:$4 sm:$0xff]  }
 0x87b   :  { %5508 = vmatpush1.bf16.msra.mxu0 %v7570_v40  ;;  %5427 = vmatprep.subr.bf16.mxu1 %v7571_v62  ;;  %v7589_v40 = vld [vmem:[#allocation11 + $0x310] ss:$48 sps:$4 sm:$0xff]   ;;  %v7590_v62 = vld [vmem:[#allocation11 + $0x318] ss:$48 sps:$4 sm:$0xff]  }
 0x87c   :  { %5509 = vmatprep.subr.bf16.mxu0 %v7572_v7  ;;  %v7591_v7 = vld [vmem:[#allocation11 + $0x374] ss:$48 sps:$4 sm:$0xff]  }
 0x87e   :  { %5428 = vmatpush1.bf16.msra.mxu1 %v7573_v43  ;;  %v7592_v43 = vld [vmem:[#allocation11 + $0x37c] ss:$48 sps:$4 sm:$0xff]  }
 0x87f   :  { %5510 = vmatpush1.bf16.msra.mxu0 %v7574_v31  ;;  %5429 = vmatprep.subr.bf16.mxu1 %v7575_v20  ;;  %v7593_v31 = vld [vmem:[#allocation11 + $0x370] ss:$48 sps:$4 sm:$0xff]   ;;  %v7594_v20 = vld [vmem:[#allocation11 + $0x378] ss:$48 sps:$4 sm:$0xff]  }
 0x880   :  { %5511 = vmatprep.subr.bf16.mxu0 %v7576_v54  ;;  %v7595_v54 = vld [vmem:[#allocation11 + $0x3d4] ss:$48 sps:$4 sm:$0xff]  }
 0x882   :  { %5430 = vmatpush1.bf16.msra.mxu1 %v7577_v41  ;;  %v7596_v41 = vld [vmem:[#allocation11 + $0x3dc] ss:$48 sps:$4 sm:$0xff]  }
 0x883   :  { %5512 = vmatpush1.bf16.msra.mxu0 %v7578_v27  ;;  %5431 = vmatprep.subr.bf16.mxu1 %v7579_v6  ;;  %v7597_v27 = vld [vmem:[#allocation11 + $0x3d0] ss:$48 sps:$4 sm:$0xff]   ;;  %v7598_v6 = vld [vmem:[#allocation11 + $0x3d8] ss:$48 sps:$4 sm:$0xff]  }
 0x884   :  { %5513 = vmatprep.subr.bf16.mxu0 %v7580_v28  ;;  %v7599_v28 = vld [vmem:[#allocation11 + $0x434] ss:$48 sps:$4 sm:$0xff]  }
 0x886   :  { %5432 = vmatpush1.bf16.msra.mxu1 %v7581_v0  ;;  %v7600_v0 = vld [vmem:[#allocation11 + $0x43c] ss:$48 sps:$4 sm:$0xff]  }
 0x887   :  { %5514 = vmatpush1.bf16.msra.mxu0 %v7582_v56  ;;  %5433 = vmatprep.subr.bf16.mxu1 %v7583_v52  ;;  %v7601_v56 = vld [vmem:[#allocation11 + $0x430] ss:$48 sps:$4 sm:$0xff]   ;;  %v7602_v52 = vld [vmem:[#allocation11 + $0x438] ss:$48 sps:$4 sm:$0xff]  }
 0x888   :  { %5515 = vmatprep.subr.bf16.mxu0 %v7584_v46  ;;  %v7603_v46 = vld [vmem:[#allocation11 + $0x494] ss:$48 sps:$4 sm:$0xff]  }
 0x88a   :  { %5434 = vmatpush1.bf16.msra.mxu1 %v7585_v25  ;;  %v7604_v25 = vld [vmem:[#allocation11 + $0x49c] ss:$48 sps:$4 sm:$0xff]  }
 0x88b   :  { %5516 = vmatpush1.bf16.msra.mxu0 %v7586_v60  ;;  %5435 = vmatprep.subr.bf16.mxu1 %v7587_v58  ;;  %v7605_v60 = vld [vmem:[#allocation11 + $0x490] ss:$48 sps:$4 sm:$0xff]   ;;  %v7606_v58 = vld [vmem:[#allocation11 + $0x498] ss:$48 sps:$4 sm:$0xff]  }
 0x88c   :  { %5517 = vmatprep.subr.bf16.mxu0 %v7588_v17  ;;  %v7607_v17 = vld [vmem:[#allocation11 + $0x4f4] ss:$48 sps:$4 sm:$0xff]  }
 0x88e   :  { %5436 = vmatpush1.bf16.msra.mxu1 %v7589_v40  ;;  %v7608_v40 = vld [vmem:[#allocation11 + $0x4fc] ss:$48 sps:$4 sm:$0xff]  }
 0x88f   :  { %5518 = vmatpush1.bf16.msra.mxu0 %v7590_v62  ;;  %5437 = vmatprep.subr.bf16.mxu1 %v7591_v7  ;;  %v7609_v62 = vld [vmem:[#allocation11 + $0x4f0] ss:$48 sps:$4 sm:$0xff]   ;;  %v7610_v7 = vld [vmem:[#allocation11 + $0x4f8] ss:$48 sps:$4 sm:$0xff]  }
 0x890   :  { %5519 = vmatprep.subr.bf16.mxu0 %v7592_v43  ;;  %v7611_v43 = vld [vmem:[#allocation11 + $0x554] ss:$48 sps:$4 sm:$0xff]  }
 0x892   :  { %5438 = vmatpush1.bf16.msra.mxu1 %v7593_v31  ;;  %v7612_v31 = vld [vmem:[#allocation11 + $0x55c] ss:$48 sps:$4 sm:$0xff]  }
 0x893   :  { %5520 = vmatpush1.bf16.msra.mxu0 %v7594_v20  ;;  %5439 = vmatprep.subr.bf16.mxu1 %v7595_v54  ;;  %v7613_v20 = vld [vmem:[#allocation11 + $0x550] ss:$48 sps:$4 sm:$0xff]   ;;  %v7614_v54 = vld [vmem:[#allocation11 + $0x558] ss:$48 sps:$4 sm:$0xff]  }
 0x894   :  { %5521 = vmatprep.subr.bf16.mxu0 %v7596_v41  ;;  %v7615_v41 = vld [vmem:[#allocation11 + $0x5b4] ss:$48 sps:$4 sm:$0xff]  }
 0x896   :  { %5440 = vmatpush1.bf16.msra.mxu1 %v7597_v27  ;;  %v7616_v27 = vld [vmem:[#allocation11 + $0x5bc] ss:$48 sps:$4 sm:$0xff]  }
 0x897   :  { %5522 = vmatpush1.bf16.msra.mxu0 %v7598_v6  ;;  %5441 = vmatprep.subr.bf16.mxu1 %v7599_v28  ;;  %v7617_v6 = vld [vmem:[#allocation11 + $0x5b0] ss:$48 sps:$4 sm:$0xff]   ;;  %v7618_v28 = vld [vmem:[#allocation11 + $0x5b8] ss:$48 sps:$4 sm:$0xff]  }
 0x898   :  { %5523 = vmatprep.subr.bf16.mxu0 %v7600_v0  ;;  %v7619_v0 = vld [vmem:[#allocation11 + $0x614] ss:$48 sps:$4 sm:$0xff]  }
 0x89a   :  { %5442 = vmatpush1.bf16.msra.mxu1 %v7601_v56  ;;  %v7620_v56 = vld [vmem:[#allocation11 + $0x61c] ss:$48 sps:$4 sm:$0xff]  }
 0x89b   :  { %5524 = vmatpush1.bf16.msra.mxu0 %v7602_v52  ;;  %5443 = vmatprep.subr.bf16.mxu1 %v7603_v46  ;;  %v7621_v52 = vld [vmem:[#allocation11 + $0x610] ss:$48 sps:$4 sm:$0xff]   ;;  %v7622_v46 = vld [vmem:[#allocation11 + $0x618] ss:$48 sps:$4 sm:$0xff]  }
 0x89c   :  { %5525 = vmatprep.subr.bf16.mxu0 %v7604_v25  ;;  %v7623_v25 = vld [vmem:[#allocation11 + $0x674] ss:$48 sps:$4 sm:$0xff]  }
 0x89e   :  { %5444 = vmatpush1.bf16.msra.mxu1 %v7605_v60  ;;  %v7624_v60 = vld [vmem:[#allocation11 + $0x67c] ss:$48 sps:$4 sm:$0xff]  }
 0x89f   :  { %5526 = vmatpush1.bf16.msra.mxu0 %v7606_v58  ;;  %5445 = vmatprep.subr.bf16.mxu1 %v7607_v17  ;;  %v7625_v58 = vld [vmem:[#allocation11 + $0x670] ss:$48 sps:$4 sm:$0xff]   ;;  %v7626_v17 = vld [vmem:[#allocation11 + $0x678] ss:$48 sps:$4 sm:$0xff]  }
 0x8a0   :  { %5527 = vmatprep.subr.bf16.mxu0 %v7608_v40  ;;  %v7627_v40 = vld [vmem:[#allocation11 + $0x6d4] ss:$48 sps:$4 sm:$0xff]  }
 0x8a2   :  { %5446 = vmatpush1.bf16.msra.mxu1 %v7609_v62  ;;  %v7628_v62 = vld [vmem:[#allocation11 + $0x6dc] ss:$48 sps:$4 sm:$0xff]  }
 0x8a3   :  { %5528 = vmatpush1.bf16.msra.mxu0 %v7610_v7  ;;  %5447 = vmatprep.subr.bf16.mxu1 %v7611_v43  ;;  %v7629_v7 = vld [vmem:[#allocation11 + $0x6d0] ss:$48 sps:$4 sm:$0xff]   ;;  %v7630_v43 = vld [vmem:[#allocation11 + $0x6d8] ss:$48 sps:$4 sm:$0xff]  }
 0x8a4   :  { %5529 = vmatprep.subr.bf16.mxu0 %v7612_v31  ;;  %v7631_v31 = vld [vmem:[#allocation11 + $0x734] ss:$48 sps:$4 sm:$0xff]  }
 0x8a6   :  { %5448 = vmatpush1.bf16.msra.mxu1 %v7613_v20  ;;  %v7632_v20 = vld [vmem:[#allocation11 + $0x73c] ss:$48 sps:$4 sm:$0xff]  }
 0x8a7   :  { %5530 = vmatpush1.bf16.msra.mxu0 %v7614_v54  ;;  %5449 = vmatprep.subr.bf16.mxu1 %v7615_v41  ;;  %v7633_v54 = vld [vmem:[#allocation11 + $0x730] ss:$48 sps:$4 sm:$0xff]   ;;  %v7634_v41 = vld [vmem:[#allocation11 + $0x738] ss:$48 sps:$4 sm:$0xff]  }
 0x8a8   :  { %5531 = vmatprep.subr.bf16.mxu0 %v7616_v27  ;;  %v7635_v27 = vld [vmem:[#allocation11 + $0x794] ss:$48 sps:$4 sm:$0xff]  }
 0x8aa   :  { %5450 = vmatpush1.bf16.msra.mxu1 %v7617_v6  ;;  %v7636_v6 = vld [vmem:[#allocation11 + $0x79c] ss:$48 sps:$4 sm:$0xff]  }
 0x8ab   :  { %5532 = vmatpush1.bf16.msra.mxu0 %v7618_v28  ;;  %5460 = vmatprep.subr.bf16.mxu1 %v7619_v0  ;;  %v7637_v28 = vld [vmem:[#allocation11 + $0x790] ss:$48 sps:$4 sm:$0xff]   ;;  %v7638_v0 = vld [vmem:[#allocation11 + $0x798] ss:$48 sps:$4 sm:$0xff]  }
 0x8ac   :  { %5542 = vmatprep.subr.bf16.mxu0 %v7620_v56  ;;  %v7639_v56 = vld [vmem:[#allocation11 + $0x7f4] ss:$48 sps:$4 sm:$0xff]  }
 0x8ad   :  { %5452 = vmatmul.mubr.bf16.vlgmr.msra.gmra.mrb[36].mxu1 %v9791_v51 }
 0x8ae   :  { %5534 = vmatmul.mubr.bf16.vlgmr.msra.gmra.mrb[52].mxu0 %v9791_v51  ;;  %5461 = vmatpush1.bf16.msra.mxu1 %v7621_v52  ;;  %v7640_v52 = vld [vmem:[#allocation11 + $0x7fc] ss:$48 sps:$4 sm:$0xff]  }
 0x8af   :  { %5543 = vmatpush1.bf16.msra.mxu0 %v7622_v46  ;;  %5462 = vmatprep.subr.bf16.mxu1 %v7623_v25  ;;  %v7641_v46 = vld [vmem:[#allocation11 + $0x7f0] ss:$48 sps:$4 sm:$0xff]   ;;  %v7642_v25 = vld [vmem:[#allocation11 + $0x7f8] ss:$48 sps:$4 sm:$0xff]  }
 0x8b0   :  { %5544 = vmatprep.subr.bf16.mxu0 %v7624_v60  ;;  %5492 = vmatprep.mubr.bf16.mxu1 %v10200_v45  ;;  %v7643_v60 = vld [vmem:[#allocation11 + $0x854] ss:$48 sps:$4 sm:$0xff]  }
 0x8b1   :  { %5574 = vmatprep.mubr.bf16.mxu0 %v10200_v45 }
 0x8b2   :  { %5463 = vmatpush1.bf16.msra.mxu1 %v7625_v58  ;;  %v7644_v58 = vld [vmem:[#allocation11 + $0x85c] ss:$48 sps:$4 sm:$0xff]  }
 0x8b3   :  { %5545 = vmatpush1.bf16.msra.mxu0 %v7626_v17  ;;  %5464 = vmatprep.subr.bf16.mxu1 %v7627_v40  ;;  %v7645_v17 = vld [vmem:[#allocation11 + $0x850] ss:$48 sps:$4 sm:$0xff]   ;;  %v7646_v40 = vld [vmem:[#allocation11 + $0x858] ss:$48 sps:$4 sm:$0xff]  }
 0x8b4   :  { %5546 = vmatprep.subr.bf16.mxu0 %v7628_v62  ;;  %v7647_v62 = vld [vmem:[#allocation11 + $0x8b4] ss:$48 sps:$4 sm:$0xff]  }
 0x8b6   :  { %5465 = vmatpush1.bf16.msra.mxu1 %v7629_v7  ;;  %v7648_v7 = vld [vmem:[#allocation11 + $0x8bc] ss:$48 sps:$4 sm:$0xff]  }
 0x8b7   :  { %5547 = vmatpush1.bf16.msra.mxu0 %v7630_v43  ;;  %5466 = vmatprep.subr.bf16.mxu1 %v7631_v31  ;;  %v7649_v43 = vld [vmem:[#allocation11 + $0x8b0] ss:$48 sps:$4 sm:$0xff]   ;;  %v7650_v31 = vld [vmem:[#allocation11 + $0x8b8] ss:$48 sps:$4 sm:$0xff]  }
 0x8b8   :  { %5548 = vmatprep.subr.bf16.mxu0 %v7632_v20  ;;  %v7651_v20 = vld [vmem:[#allocation11 + $0x24] ss:$48 sps:$4 sm:$0xff]  }
 0x8ba   :  { %5467 = vmatpush1.bf16.msra.mxu1 %v7633_v54  ;;  %v7652_v54 = vld [vmem:[#allocation11 + $0x2c] ss:$48 sps:$4 sm:$0xff]  }
 0x8bb   :  { %5549 = vmatpush1.bf16.msra.mxu0 %v7634_v41  ;;  %5468 = vmatprep.subr.bf16.mxu1 %v7635_v27  ;;  %v7653_v41 = vld [vmem:[#allocation11 + $0x20] ss:$48 sps:$4 sm:$0xff]   ;;  %v7654_v27 = vld [vmem:[#allocation11 + $0x28] ss:$48 sps:$4 sm:$0xff]  }
 0x8bc   :  { %5550 = vmatprep.subr.bf16.mxu0 %v7636_v6  ;;  %v7655_v6 = vld [vmem:[#allocation11 + $0x84] ss:$48 sps:$4 sm:$0xff]  }
 0x8be   :  { %5469 = vmatpush1.bf16.msra.mxu1 %v7637_v28  ;;  %v7656_v28 = vld [vmem:[#allocation11 + $0x8c] ss:$48 sps:$4 sm:$0xff]  }
 0x8bf   :  { %5551 = vmatpush1.bf16.msra.mxu0 %v7638_v0  ;;  %5470 = vmatprep.subr.bf16.mxu1 %v7639_v56  ;;  %v7657_v0 = vld [vmem:[#allocation11 + $0x80] ss:$48 sps:$4 sm:$0xff]   ;;  %v7658_v56 = vld [vmem:[#allocation11 + $0x88] ss:$48 sps:$4 sm:$0xff]  }
 0x8c0   :  { %5552 = vmatprep.subr.bf16.mxu0 %v7640_v52  ;;  %v7659_v52 = vld [vmem:[#allocation11 + $0xe4] ss:$48 sps:$4 sm:$0xff]  }
 0x8c2   :  { %5471 = vmatpush1.bf16.msra.mxu1 %v7641_v46  ;;  %v7660_v46 = vld [vmem:[#allocation11 + $0xec] ss:$48 sps:$4 sm:$0xff]  }
 0x8c3   :  { %5553 = vmatpush1.bf16.msra.mxu0 %v7642_v25  ;;  %5472 = vmatprep.subr.bf16.mxu1 %v7643_v60  ;;  %v7661_v25 = vld [vmem:[#allocation11 + $0xe0] ss:$48 sps:$4 sm:$0xff]   ;;  %v7662_v60 = vld [vmem:[#allocation11 + $0xe8] ss:$48 sps:$4 sm:$0xff]  }
 0x8c4   :  { %5554 = vmatprep.subr.bf16.mxu0 %v7644_v58  ;;  %v7663_v58 = vld [vmem:[#allocation11 + $0x144] ss:$48 sps:$4 sm:$0xff]  }
 0x8c6   :  { %5473 = vmatpush1.bf16.msra.mxu1 %v7645_v17  ;;  %v7664_v17 = vld [vmem:[#allocation11 + $0x14c] ss:$48 sps:$4 sm:$0xff]  }
 0x8c7   :  { %5555 = vmatpush1.bf16.msra.mxu0 %v7646_v40  ;;  %5474 = vmatprep.subr.bf16.mxu1 %v7647_v62  ;;  %v7666_v40 = vld [vmem:[#allocation11 + $0x148] ss:$48 sps:$4 sm:$0xff]   ;;  %v7667_v62 = vld [vmem:[#allocation11 + $0x1a4] ss:$48 sps:$4 sm:$0xff]  }
 0x8c8   :  { %5556 = vmatprep.subr.bf16.mxu0 %v7648_v7  ;;  %v7668_v7 = vld [vmem:[#allocation11 + $0x1ac] ss:$48 sps:$4 sm:$0xff]  }
 0x8ca   :  { %5475 = vmatpush1.bf16.msra.mxu1 %v7649_v43  ;;  %v7669_v43 = vld [vmem:[#allocation11 + $0x1a0] ss:$48 sps:$4 sm:$0xff]  }
 0x8cb   :  { %5557 = vmatpush1.bf16.msra.mxu0 %v7650_v31  ;;  %5583 = vmatprep.subr.bf16.mxu1 %v7651_v20  ;;  %v7670_v31 = vld [vmem:[#allocation11 + $0x1a8] ss:$48 sps:$4 sm:$0xff]   ;;  %v7671_v20 = vld [vmem:[#allocation11 + $0x204] ss:$48 sps:$4 sm:$0xff]  }
 0x8cc   :  { %5665 = vmatprep.subr.bf16.mxu0 %v7652_v54  ;;  %v7672_v54 = vld [vmem:[#allocation11 + $0x200] ss:$48 sps:$4 sm:$0xff]  }
 0x8cd   :  { %5493 = vmatmul.mubr.bf16.vlgmr.msra.gmra.mrb[36].mxu1 %v9800_v38 }
 0x8ce   :  { %5575 = vmatmul.mubr.bf16.vlgmr.msra.gmra.mrb[52].mxu0 %v9800_v38  ;;  %5584 = vmatpush1.bf16.msra.mxu1 %v7653_v41  ;;  %v7673_v41 = vld [vmem:[#allocation11 + $0x264] ss:$48 sps:$4 sm:$0xff]  }
 0x8cf   :  { %5615 = vmatprep.mubr.bf16.mxu1 %v9789_v5  ;;  %5666 = vmatpush1.bf16.msra.mxu0 %v7654_v27  ;;  %v7674_v27 = vld [vmem:[#allocation11 + $0x260] ss:$48 sps:$4 sm:$0xff]  }
 0x8d0   :  { %5697 = vmatprep.mubr.bf16.mxu0 %v9789_v5  ;;  %5585 = vmatprep.subr.bf16.mxu1 %v7655_v6  ;;  %v7665_v5 = vld [vmem:[#allocation11 + $0x140] ss:$48 sps:$4 sm:$0xff]   ;;  %v7675_v6 = vld [vmem:[#allocation11 + $0x2c4] ss:$48 sps:$4 sm:$0xff]  }
 0x8d1   :  { %5667 = vmatprep.subr.bf16.mxu0 %v7656_v28  ;;  %v7676_v28 = vld [vmem:[#allocation11 + $0x2c0] ss:$48 sps:$4 sm:$0xff]  }
 0x8d2   :  { %5586 = vmatpush1.bf16.msra.mxu1 %v7657_v0  ;;  %v10644_v0 = vld [vmem:[#allocation25_spill] sm:$0xff] }
 0x8d3   :  { %5668 = vmatpush1.bf16.msra.mxu0 %v7658_v56  ;;  %5587 = vmatprep.subr.bf16.mxu1 %v7659_v52  ;;  %v10646_v56 = vld [vmem:[#allocation26_spill] sm:$0xff]  ;;  %v10648_v52 = vld [vmem:[#allocation27_spill] sm:$0xff] }
 0x8d4   :  { %5669 = vmatprep.subr.bf16.mxu0 %v7660_v46  ;;  %v10650_v46 = vld [vmem:[#allocation30_spill] sm:$0xff] }
 0x8d6   :  { %5588 = vmatpush1.bf16.msra.mxu1 %v7661_v25 }
 0x8d7   :  { %5670 = vmatpush1.bf16.msra.mxu0 %v7662_v60  ;;  %5589 = vmatprep.subr.bf16.mxu1 %v7663_v58 }
 0x8d8   :  { %5671 = vmatprep.subr.bf16.mxu0 %v7664_v17 }
 0x8da   :  { %5590 = vmatpush1.bf16.msra.mxu1 %v7665_v5 }
 0x8db   :  { %5672 = vmatpush1.bf16.msra.mxu0 %v7666_v40  ;;  %5591 = vmatprep.subr.bf16.mxu1 %v7667_v62 }
 0x8dc   :  { %5673 = vmatprep.subr.bf16.mxu0 %v7668_v7 }
 0x8de   :  { %5592 = vmatpush1.bf16.msra.mxu1 %v7669_v43  ;;  %v10651_v43 = vld [vmem:[#allocation93_spill] sm:$0xff] }
 0x8df   :  { %5674 = vmatpush1.bf16.msra.mxu0 %v7670_v31  ;;  %5593 = vmatprep.subr.bf16.mxu1 %v7671_v20  ;;  %v510_v31 = vrot.slane %v9774_v48, %v10651_v43  ;;  %v10652_v20 = vld [vmem:[#allocation90_spill] sm:$0xff] }
 0x8e0   :  { %5675 = vmatprep.subr.bf16.mxu0 %v9571_v9  ;;  %v7677_v9 = vld [vmem:[#allocation11 + $0x324] ss:$48 sps:$4 sm:$0xff]  }
 0x8e2   :  { %5594 = vmatpush1.bf16.msra.mxu1 %v7672_v54  ;;  %v498_v54 = vrot.slane %v9774_v48, %v10652_v20 }
 0x8e3   :  { %5676 = vmatpush1.bf16.msra.mxu0 %v9575_v12  ;;  %5595 = vmatprep.subr.bf16.mxu1 %v7673_v41  ;;  %v7678_v12 = vld [vmem:[#allocation11 + $0x320] ss:$48 sps:$4 sm:$0xff]  }
 0x8e4   :  { %5677 = vmatprep.subr.bf16.mxu0 %v9579_v18  ;;  %v7679_v18 = vld [vmem:[#allocation11 + $0x384] ss:$48 sps:$4 sm:$0xff]  }
 0x8e6   :  { %5596 = vmatpush1.bf16.msra.mxu1 %v7674_v27  ;;  %v502_v27 = vrot.slane %v9774_v48, %v10467_v21 }
 0x8e7   :  { %5678 = vmatpush1.bf16.msra.mxu0 %v9583_v47  ;;  %5597 = vmatprep.subr.bf16.mxu1 %v7675_v6  ;;  %v7680_v47 = vld [vmem:[#allocation11 + $0x380] ss:$48 sps:$4 sm:$0xff]  }
 0x8e8   :  { %5679 = vmatprep.subr.bf16.mxu0 %v9587_v14  ;;  %v7681_v14 = vld [vmem:[#allocation11 + $0x3e4] ss:$48 sps:$4 sm:$0xff]  }
 0x8ea   :  { %5598 = vmatpush1.bf16.msra.mxu1 %v7676_v28 }
 0x8eb   :  { %5680 = vmatpush1.bf16.msra.mxu0 %v9591_v57  ;;  %5599 = vmatprep.subr.bf16.mxu1 %v7677_v9  ;;  %v7682_v57 = vld [vmem:[#allocation11 + $0x3e0] ss:$48 sps:$4 sm:$0xff]  }
 0x8ec   :  { %5681 = vmatprep.subr.bf16.mxu0 %v9595_v50  ;;  %v7683_v50 = vld [vmem:[#allocation11 + $0x444] ss:$48 sps:$4 sm:$0xff]  }
 0x8ee   :  { %5600 = vmatpush1.bf16.msra.mxu1 %v7678_v12  ;;  %v9870_v12 = vld [vmem:[#allocation10 + $0x28] sm:$0xff] }
 0x8ef   :  { %5682 = vmatpush1.bf16.msra.mxu0 %v9599_v61  ;;  %5601 = vmatprep.subr.bf16.mxu1 %v7679_v18  ;;  %v7684_v61 = vld [vmem:[#allocation11 + $0x440] ss:$48 sps:$4 sm:$0xff]  }
 0x8f0   :  { %5683 = vmatprep.subr.bf16.mxu0 %v9603_v22  ;;  %v7685_v22 = vld [vmem:[#allocation11 + $0x4a4] ss:$48 sps:$4 sm:$0xff]  }
 0x8f2   :  { %5602 = vmatpush1.bf16.msra.mxu1 %v7680_v47  ;;  %v514_v47 = vrot.slane %v9870_v12, %v10637_v8 }
 0x8f3   :  { %5684 = vmatpush1.bf16.msra.mxu0 %v9607_v63  ;;  %5603 = vmatprep.subr.bf16.mxu1 %v7681_v14  ;;  %v7686_v63 = vld [vmem:[#allocation11 + $0x4a0] ss:$48 sps:$4 sm:$0xff]   ;;  %v522_v14 = vrot.slane %v9870_v12, %v10638_v29 }
 0x8f4   :  { %5685 = vmatprep.subr.bf16.mxu0 %v9611_v1  ;;  %v7687_v1 = vld [vmem:[#allocation11 + $0x504] ss:$48 sps:$4 sm:$0xff]  }
 0x8f6   :  { %5604 = vmatpush1.bf16.msra.mxu1 %v7682_v57  ;;  %v526_v57 = vrot.slane %v9870_v12, %v10636_v36 }
 0x8f7   :  { %5686 = vmatpush1.bf16.msra.mxu0 %v9615_v2  ;;  %5605 = vmatprep.subr.bf16.mxu1 %v7683_v50  ;;  %v7688_v2 = vld [vmem:[#allocation11 + $0x500] ss:$48 sps:$4 sm:$0xff]  }
 0x8f8   :  { %5687 = vmatprep.subr.bf16.mxu0 %v9619_v4  ;;  %v7689_v4 = vld [vmem:[#allocation11 + $0x564] ss:$48 sps:$4 sm:$0xff]  }
 0x8fa   :  { %5606 = vmatpush1.bf16.msra.mxu1 %v7684_v61 }
 0x8fb   :  { %5688 = vmatpush1.bf16.msra.mxu0 %v9623_v11  ;;  %5607 = vmatprep.subr.bf16.mxu1 %v7685_v22  ;;  %v7690_v11 = vld [vmem:[#allocation11 + $0x560] ss:$48 sps:$4 sm:$0xff]  }
 0x8fc   :  { %5689 = vmatprep.subr.bf16.mxu0 %v9627_v15  ;;  %v7691_v15 = vld [vmem:[#allocation11 + $0x5c4] ss:$48 sps:$4 sm:$0xff]  }
 0x8fe   :  { %5608 = vmatpush1.bf16.msra.mxu1 %v7686_v63 }
 0x8ff   :  { %5690 = vmatpush1.bf16.msra.mxu0 %v9631_v19  ;;  %5609 = vmatprep.subr.bf16.mxu1 %v7687_v1  ;;  %v7692_v19 = vld [vmem:[#allocation11 + $0x5c0] ss:$48 sps:$4 sm:$0xff]  }
 0x900   :  { %5691 = vmatprep.subr.bf16.mxu0 %v9635_v23  ;;  %v7693_v23 = vld [vmem:[#allocation11 + $0x624] ss:$48 sps:$4 sm:$0xff]  }
 0x902   :  { %5610 = vmatpush1.bf16.msra.mxu1 %v7688_v2 }
 0x903   :  { %5692 = vmatpush1.bf16.msra.mxu0 %v9639_v16  ;;  %5611 = vmatprep.subr.bf16.mxu1 %v7689_v4  ;;  %v7694_v16 = vld [vmem:[#allocation11 + $0x620] ss:$48 sps:$4 sm:$0xff]  }
 0x904   :  { %5693 = vmatprep.subr.bf16.mxu0 %v9643_v39  ;;  %v7695_v39 = vld [vmem:[#allocation11 + $0x684] ss:$48 sps:$4 sm:$0xff]  }
 0x906   :  { %5612 = vmatpush1.bf16.msra.mxu1 %v7690_v11 }
 0x907   :  { %5694 = vmatpush1.bf16.msra.mxu0 %v9647_v30  ;;  %5613 = vmatprep.subr.bf16.mxu1 %v7691_v15  ;;  %v7696_v30 = vld [vmem:[#allocation11 + $0x680] ss:$48 sps:$4 sm:$0xff]  }
 0x908   :  { %5695 = vmatprep.subr.bf16.mxu0 %v9651_v59  ;;  %v7697_v59 = vld [vmem:[#allocation11 + $0x6e4] ss:$48 sps:$4 sm:$0xff]  }
 0x90a   :  { %5614 = vmatpush1.bf16.msra.mxu1 %v7692_v19 }
 0x90b   :  { %5696 = vmatpush1.bf16.msra.mxu0 %v9655_v53  ;;  %5624 = vmatprep.subr.bf16.mxu1 %v7693_v23  ;;  %v7698_v53 = vld [vmem:[#allocation11 + $0x6e0] ss:$48 sps:$4 sm:$0xff]  }
 0x90c   :  { %5706 = vmatprep.subr.bf16.mxu0 %v9659_v37  ;;  %v7699_v37 = vld [vmem:[#allocation11 + $0x744] ss:$48 sps:$4 sm:$0xff]  }
 0x90d   :  { %5616 = vmatmul.mubr.bf16.vlgmr.msra.gmra.mrb[40].mxu1 %v9791_v51 }
 0x90e   :  { %5698 = vmatmul.mubr.bf16.vlgmr.msra.gmra.mrb[56].mxu0 %v9791_v51  ;;  %5625 = vmatpush1.bf16.msra.mxu1 %v7694_v16  ;;  %v10642_v51 = vld [vmem:[#allocation24_spill] sm:$0xff] }
 0x90f   :  { %5707 = vmatpush1.bf16.msra.mxu0 %v9665_v33  ;;  %5626 = vmatprep.subr.bf16.mxu1 %v7695_v39  ;;  %v7700_v33 = vld [vmem:[#allocation11 + $0x740] ss:$48 sps:$4 sm:$0xff]  }
 0x910   :  { %5708 = vmatprep.subr.bf16.mxu0 %v9669_v55  ;;  %5656 = vmatprep.mubr.bf16.mxu1 %v10200_v45  ;;  %v7702_v55 = vld [vmem:[#allocation11 + $0x7a0] ss:$48 sps:$4 sm:$0xff]  }
 0x911   :  { %5738 = vmatprep.mubr.bf16.mxu0 %v10200_v45  ;;  %v7701_v45 = vld [vmem:[#allocation11 + $0x7a4] ss:$48 sps:$4 sm:$0xff]  }
 0x912   :  { %5627 = vmatpush1.bf16.msra.mxu1 %v7696_v30 }
 0x913   :  { %5709 = vmatpush1.bf16.msra.mxu0 %v9675_v24  ;;  %5628 = vmatprep.subr.bf16.mxu1 %v7697_v59  ;;  %v10639_v24 = vld [vmem:[#allocation44_spill] sm:$0xff] }
 0x914   :  { %5710 = vmatprep.subr.bf16.mxu0 %v9679_v10  ;;  %v10640_v10 = vld [vmem:[#allocation23_spill] sm:$0xff] }
 0x916   :  { %5629 = vmatpush1.bf16.msra.mxu1 %v7698_v53 }
 0x917   :  { %5711 = vmatpush1.bf16.msra.mxu0 %v9683_v13  ;;  %5630 = vmatprep.subr.bf16.mxu1 %v7699_v37  ;;  %v10641_v13 = vld [vmem:[#allocation45_spill] sm:$0xff] }
 0x918   :  { %5712 = vmatprep.subr.bf16.mxu0 %v9687_v49  ;;  %v10643_v49 = vld [vmem:[#allocation48_spill] sm:$0xff] }
 0x91a   :  { %5631 = vmatpush1.bf16.msra.mxu1 %v7700_v33 }
 0x91b   :  { %5713 = vmatpush1.bf16.msra.mxu0 %v9691_v3  ;;  %5632 = vmatprep.subr.bf16.mxu1 %v7701_v45  ;;  %v10645_v3 = vld [vmem:[#allocation51_spill] sm:$0xff] }
 0x91c   :  { %5714 = vmatprep.subr.bf16.mxu0 %v9695_v32  ;;  %v10647_v32 = vld [vmem:[#allocation54_spill] sm:$0xff] }
 0x91e   :  { %5633 = vmatpush1.bf16.msra.mxu1 %v7702_v55 }
 0x91f   :  { %5715 = vmatpush1.bf16.msra.mxu0 %v9699_v26  ;;  %5634 = vmatprep.subr.bf16.mxu1 %v10639_v24  ;;  %v10649_v26 = vld [vmem:[#allocation55_spill] sm:$0xff] }
 0x920   :  { %5716 = vmatprep.subr.bf16.mxu0 %v10640_v10 }
 0x922   :  { %5635 = vmatpush1.bf16.msra.mxu1 %v10641_v13 }
 0x923   :  { %5717 = vmatpush1.bf16.msra.mxu0 %v10642_v51  ;;  %5636 = vmatprep.subr.bf16.mxu1 %v10643_v49 }
 0x924   :  { %5718 = vmatprep.subr.bf16.mxu0 %v10644_v0 }
 0x926   :  { %5637 = vmatpush1.bf16.msra.mxu1 %v10645_v3 }
 0x927   :  { %5719 = vmatpush1.bf16.msra.mxu0 %v10646_v56  ;;  %5638 = vmatprep.subr.bf16.mxu1 %v10647_v32 }
 0x928   :  { %5720 = vmatprep.subr.bf16.mxu0 %v10648_v52 }
 0x92a   :  { %5639 = vmatpush1.bf16.msra.mxu1 %v10649_v26 }
 0x92b   :  { %5721 = vmatpush1.bf16.msra.mxu0 %v10650_v46  ;;  %v518_v46 = vrot.slane %v9870_v12, %v8081_v44 }
 0x92d   :  { %5657 = vmatmul.mubr.bf16.vlgmr.msra.gmra.mrb[40].mxu1 %v9800_v38 }
 0x92e   :  { %5739 = vmatmul.mubr.bf16.vlgmr.msra.gmra.mrb[56].mxu0 %v9800_v38 }
 0x940   :  { %v5330_v25 = vpop.f32.mrb[32].mxu1  ;;  %v5412_v60 = vpop.f32.mrb[48].mxu0 }
 0x941   :  { %v5332_v58 = vpop.f32.mrb[33].mxu1  ;;  %v5414_v17 = vpop.f32.mrb[49].mxu0  ;;  %v6382_v6 = vadd.f32 %v5330_v25, %v498_v54  ;;  %v10653_v25 = vld [vmem:[#allocation92_spill] sm:$0xff] }
 0x942   :  { %v5334_v5 = vpop.f32.mrb[34].mxu1  ;;  %v5416_v40 = vpop.f32.mrb[50].mxu0  ;;  %v6385_v41 = vadd.f32 %v5414_v17, %v510_v31  ;;  %v6383_v28 = vadd.f32 %v5332_v58, %v502_v27  ;;  %v506_v58 = vrot.slane %v9774_v48, %v10653_v25  ;;  %v542_v31 = vrot.slane %v9870_v12, %v10651_v43 }
 0x943   :  { %v5335_v62 = vpop.f32.mrb[35].mxu1  ;;  %v5417_v7 = vpop.f32.mrb[51].mxu0  ;;  %v5759_v9 = vmul.f32 0.5, %v6382_v6 }
 0x944   :  { %v5771_v38 = vmul.f32 0.5, %v6385_v41  ;;  %v5760_v18 = vmul.f32 0.5, %v6383_v28  ;;  %v6384_v5 = vadd.f32 %v5412_v60, %v506_v58  ;;  %v530_v62 = vrot.slane %v9870_v12, %v10652_v20 }
 0x945   :  { %v538_v7 = vrot.slane %v9870_v12, %v10653_v25 }
 0x946   :  { %7147 = vtanh.f32 %v5771_v38 }
 0x947   :  { %7149 = vtanh.f32 %v5759_v9 }
 0x948   :  { %7151 = vtanh.f32 %v5760_v18 }
 0x950   :  { %v7148_v16 = vpop.eup %7147 }
 0x951   :  { %v7150_v30 = vpop.eup %7149  ;;  %v5777_v59 = vadd.f32 1.0, %v7148_v16 }
 0x952   :  { %v7152_v53 = vpop.eup %7151  ;;  %v5765_v36 = vadd.f32 1.0, %v7150_v30 }
 0x953   :  { %v5780_v37 = vmul.f32 0.5, %v5777_v59  ;;  %v5766_v33 = vadd.f32 1.0, %v7152_v53 }
 0x954   :  { %v5768_v45 = vmul.f32 0.5, %v5765_v36 }
 0x955   :  { %v5798_v10 = vmul.f32 %v5780_v37, %v9766_v34  ;;  %v5769_v51 = vmul.f32 0.5, %v5766_v33  ;;  %v5761_v34 = vmul.f32 0.5, %v6384_v5 }
 0x9a0   :  { %v5494_v50 = vpop.f32.mrb[36].mxu1 }
 0x9a1   :  { %v6386_v61 = vadd.f32 %v5494_v50, %v514_v47  ;;  %v5576_v22 = vpop.f32.mrb[52].mxu0  ;;  %v5496_v63 = vpop.f32.mrb[37].mxu1 }
 0x9a2   :  { %v6388_v1 = vadd.f32 %v5576_v22, %v522_v14  ;;  %v5578_v2 = vpop.f32.mrb[53].mxu0  ;;  %v5498_v4 = vpop.f32.mrb[38].mxu1  ;;  %v6387_v17 = vadd.f32 %v5496_v63, %v518_v46 }
 0x9a3   :  { %v5772_v11 = vmul.f32 0.5, %v6386_v61  ;;  %v6389_v15 = vadd.f32 %v5578_v2, %v526_v57  ;;  %v5580_v19 = vpop.f32.mrb[54].mxu0  ;;  %v5499_v23 = vpop.f32.mrb[39].mxu1 }
 0x9a4   :  { %7153 = vtanh.f32 %v6388_v1  ;;  %v5581_v39 = vpop.f32.mrb[55].mxu0  ;;  %v5773_v40 = vmul.f32 0.5, %v6387_v17  ;;  %v5813_v19 = vld [vmem:[#allocation13] sm:$0x7] }
 0x9a5   :  { %7155 = vtanh.f32 %v5772_v11  ;;  %v5822_v53 = vrot.slane %v5813_v19, %v8081_v44  ;;  %v5818_v33 = vrot.slane %v5813_v19, %v10637_v8  ;;  %v6249_v8 = vld [vmem:[#allocation2] ss:$0 sm:$0xff] }
 0x9a6   :  { %7157 = vtanh.f32 %v6389_v15 }
 0x9a7   :  { %7159 = vtanh.f32 %v5773_v40 }
 0x9a8   :  { %7161 = vtanh.f32 %v5761_v34 }
 0x9ae   :  { %v7154_v55 = vpop.eup %7153 }
 0x9af   :  { %v7156_v24 = vpop.eup %7155  ;;  %v5801_v13 = vmul.f32 %v7154_v55, %v5768_v45 }
 0x9b0   :  { %v5778_v49 = vadd.f32 1.0, %v7156_v24  ;;  %v7158_v0 = vpop.eup %7157 }
 0x9b1   :  { %v5804_v3 = vadd.f32 %v5801_v13, %v5798_v10  ;;  %v5802_v32 = vmul.f32 %v7158_v0, %v5769_v51  ;;  %v7160_v9 = vpop.eup %7159 }
 0x9b2   :  { %v5781_v56 = vmul.f32 0.5, %v5778_v49  ;;  %v5779_v61 = vadd.f32 1.0, %v7160_v9 }
 0x9b4   :  { %v5799_v52 = vmul.f32 %v5781_v56, %v9769_v35  ;;  %v534_v35 = vrot.slane %v9870_v12, %v10467_v21  ;;  %v7162_v21 = vpop.eup %7161  ;;  %v5782_v22 = vmul.f32 0.5, %v5779_v61 }
 0x9b5   :  { %v5767_v12 = vadd.f32 1.0, %v7162_v21 }
 0x9b6   :  { %v5805_v26 = vadd.f32 %v5802_v32, %v5799_v52  ;;  %v5800_v2 = vmul.f32 %v5782_v22, %v9785_v42 }
 0x9b7   :  { %v5770_v63 = vmul.f32 0.5, %v5767_v12 }
 0xa00   :  { %v5658_v54 = vpop.f32.mrb[40].mxu1 }
 0xa01   :  { %v6390_v48 = vadd.f32 %v5658_v54, %v530_v62  ;;  %v5740_v41 = vpop.f32.mrb[56].mxu0  ;;  %v5660_v60 = vpop.f32.mrb[41].mxu1 }
 0xa02   :  { %v6392_v27 = vadd.f32 %v5740_v41, %v538_v7  ;;  %v6391_v6 = vadd.f32 %v5660_v60, %v534_v35  ;;  %v5742_v38 = vpop.f32.mrb[57].mxu0  ;;  %v5662_v28 = vpop.f32.mrb[42].mxu1 }
 0xa03   :  { %7163 = vtanh.f32 %v6390_v48  ;;  %v6393_v20 = vadd.f32 %v5742_v38, %v542_v31  ;;  %v5744_v18 = vpop.f32.mrb[58].mxu0  ;;  %v5663_v47 = vpop.f32.mrb[43].mxu1 }
 0xa04   :  { %v5787_v14 = vmul.f32 0.5, %v6392_v27  ;;  %v5786_v57 = vmul.f32 0.5, %v6391_v6  ;;  %v5745_v50 = vpop.f32.mrb[59].mxu0 }
 0xa05   :  { %v5788_v43 = vmul.f32 0.5, %v6393_v20 }
 0xa06   :  { %7165 = vtanh.f32 %v5787_v14 }
 0xa07   :  { %7167 = vtanh.f32 %v5786_v57 }
 0xa08   :  { %7169 = vtanh.f32 %v5805_v26 }
 0xa09   :  { %7171 = vtanh.f32 %v5788_v43 }
 0xa0a   :  { %7173 = vtanh.f32 %v5804_v3  ;;  %v5826_v3 = vrot.slane %v5813_v19, %v10638_v29 }
 0xa0d   :  { %v7164_v1 = vpop.eup %7163 }
 0xa0e   :  { %v5803_v4 = vmul.f32 %v7164_v1, %v5770_v63 }
 0xa10   :  { %v7166_v11 = vpop.eup %7165  ;;  %v5806_v15 = vadd.f32 %v5803_v4, %v5800_v2 }
 0xa11   :  { %v7168_v23 = vpop.eup %7167  ;;  %v5793_v16 = vadd.f32 1.0, %v7166_v11 }
 0xa12   :  { %7175 = vtanh.f32 %v5806_v15  ;;  %v5792_v39 = vadd.f32 1.0, %v7168_v23  ;;  %v7170_v30 = vpop.eup %7169 }
 0xa13   :  { %v5796_v59 = vmul.f32 0.5, %v5793_v16  ;;  %v7172_v36 = vpop.eup %7171 }
 0xa14   :  { %v5795_v37 = vmul.f32 0.5, %v5792_v39  ;;  %v7174_v45 = vpop.eup %7173  ;;  %v5794_v42 = vadd.f32 1.0, %v7172_v36 }
 0xa15   :  { %v5811_v55 = vmul.f32 %v7170_v30, %v5796_v59 }
 0xa16   :  { %v5810_v24 = vmul.f32 %v7174_v45, %v5795_v37  ;;  %v5797_v0 = vmul.f32 0.5, %v5794_v42 }
 0xa17   :  { %v5831_v10 = vmul.f32 %v5822_v53, %v5811_v55 }
 0xa18   :  { %v5830_v13 = vmul.f32 %v5818_v33, %v5810_v24 }
 0xa19   :  { %v5835_v51 = vsel %vm5833_vm4, %v5831_v10, 0.0 }
 0xa1a   :  { %v5834_v49 = vsel %vm5833_vm4, %v5830_v13, 0.0 }
 0xa1b   :  { %v5836_v56 = vadd.f32 %v5835_v51, %v5834_v49 }
 0xa1c   :  { %v7176_v32 = vpop.eup %7175 }
 0xa1d   :  { %v5812_v52 = vmul.f32 %v7176_v32, %v5797_v0 }
 0xa1f   :  { %v5832_v44 = vmul.f32 %v5826_v3, %v5812_v52 }
 0xa21   :  { %v5837_v26 = vsel %vm5833_vm4, %v5832_v44, 0.0 }
 0xa22   :  { %v5838_v46 = vadd.f32 %v5837_v26, %v5836_v56 }
 0xa24   :  { %5839 = vadd.xlane.f32.xlu0 %v5838_v46 }
 0xab1   :  { %v5840_v25 = vpop.xlane.xlu0 %5839 }
 0xab2   :  { %v5848_v58 = vadd.f32 %v6249_v8, %v5840_v25 }
 0xab4   :  { %v5849_v17 = vmul.f32 0.5, %v5848_v58 }
 0xab6   :  { %7177 = vtanh.f32 %v5849_v17 }
 0xac0   :  { %v7178_v5 = vpop.eup %7177 }
 0xac1   :  { %v5851_v40 = vadd.f32 1.0, %v7178_v5 }
 0xac3   :  { %v5852_v34 = vmul.f32 0.5, %v5851_v40 }
 0xac5   :  { %5854 = vst.msk [vmem:[%s9909_s10] sm:$0x3] %vm5853_vm5, %v5852_v34 }
 0xac6   :  { %5859 = vsyncpa [#allocation4], 1 }
 0xac7   :  { %5860 = vsyncpa [#allocation6], 1 }
 0xac8   :  { %5861 = vsyncpa [#allocation9], 1 }
 0xac9   :  { %5862 = vsyncpa [#allocation12], 1 }

</bundles_post_ra>
